<compile_context>
chip_gen: v5e
topology: v5e:2x2
jax: 0.10.0
libtpu: 0.0.40
codegen_flags: <defaults>
</compile_context>

<pallas_src>
import functools

import numpy as np
import jax
import jax.numpy as jnp
from jax.experimental import pallas as pl
from jax.experimental.pallas import tpu as pltpu

_EPS = 1e-5


def _largest_divisor_le(n, cap):
    for t in range(min(n, cap), 0, -1):
        if n % t == 0:
            return t
    return 1


def _full_spec(shape):
    nd = len(shape)
    return pl.BlockSpec(shape, lambda i, _nd=nd: (0,) * _nd)


# ------------------------------ Pallas kernels ------------------------------

def _conv_bias_stats_kernel(x_ref, t_ref, bias_ref, y_ref, stats_ref, *, k, oh):
    """conv(k,k)+bias via k row-shifted Toeplitz matmuls (lane-dense K and output).

    Writes the pre-BN conv output and accumulates per-(ow,oc) sum / sum-of-squares
    across the whole batch (grid axis marked "arbitrary")."""
    tb = x_ref.shape[0]
    owoc = y_ref.shape[2]

    @pl.when(pl.program_id(0) == 0)
    def _():
        stats_ref[...] = jnp.zeros_like(stats_ref)

    bias = bias_ref[...]                                           # (1, OW*OC) f32

    def body(i, carry):
        s, ss = carry
        acc = None
        for kh in range(k):                                        # static, unrolled
            xs = x_ref[i, pl.ds(kh, oh), :].astype(jnp.bfloat16)   # (OH, W*C)
            part = jnp.dot(xs, t_ref[kh], preferred_element_type=jnp.float32)
            acc = part if acc is None else acc + part              # (OH, OW*OC) f32
        y = acc + bias
        y_ref[i] = y                                               # lane-dense store
        return (s + jnp.sum(y, axis=0, keepdims=True),
                ss + jnp.sum(y * y, axis=0, keepdims=True))

    zero = jnp.zeros((1, owoc), jnp.float32)
    s, ss = jax.lax.fori_loop(0, tb, body, (zero, zero))
    stats_ref[0:1, :] += s
    stats_ref[1:2, :] += ss


def _bn_relu_pool_kernel(y_ref, ss_ref, rse_ref, rso_ref, cse_ref, cso_ref, o_ref):
    """BN (precomputed batch scale/shift) + relu + 2x2/2 maxpool.

    Row pooling / column compaction are 0/1 selection matmuls on the MXU so no strided
    or sub-lane-strided accesses are needed; output stays lane-dense (PH, PW*OC)."""
    tb = y_ref.shape[0]
    ss = ss_ref[...]
    scale, shift = ss[0:1, :], ss[1:2, :]
    rse, rso = rse_ref[...], rso_ref[...]                          # (PH, OH) bf16
    cse, cso = cse_ref[...], cso_ref[...]                          # (OW*OC, PW*OC) bf16

    def body(i, carry):
        a = jnp.maximum(y_ref[i] * scale + shift, 0.0)             # (OH, OW*OC) f32
        ab = a.astype(jnp.bfloat16)
        h = jnp.maximum(                                           # H-pool (even/odd rows)
            jnp.dot(rse, ab, preferred_element_type=jnp.float32),
            jnp.dot(rso, ab, preferred_element_type=jnp.float32))  # (PH, OW*OC)
        hb = h.astype(jnp.bfloat16)
        p = jnp.maximum(                                           # W-pool (even/odd cols)
            jnp.dot(hb, cse, preferred_element_type=jnp.float32),
            jnp.dot(hb, cso, preferred_element_type=jnp.float32))  # (PH, PW*OC)
        o_ref[i] = p
        return carry

    jax.lax.fori_loop(0, tb, body, 0)


def _fc_head_kernel(x_ref, w1_ref, b1_ref, g1_ref, be1_ref,
                    w2_ref, b2_ref, g2_ref, be2_ref,
                    w3_ref, b3_ref, o_ref, *, eps):
    """fc1 -> BN1d -> relu -> fc2 -> BN1d -> relu -> fc3; all 128-lane-padded, VMEM-resident.

    BN1d here uses whole-batch statistics and is only correct because grid=(1,) covers the
    entire batch in one block."""
    def bn_relu(h, g, be):
        m = jnp.mean(h, axis=0, keepdims=True)
        var = jnp.maximum(jnp.mean(h * h, axis=0, keepdims=True) - m * m, 0.0)
        return jnp.maximum((h - m) * jax.lax.rsqrt(var + eps) * g + be, 0.0)

    h = jnp.dot(x_ref[...].astype(jnp.bfloat16), w1_ref[...],
                preferred_element_type=jnp.float32) + b1_ref[...]
    h = bn_relu(h, g1_ref[...], be1_ref[...])
    h = jnp.dot(h.astype(jnp.bfloat16), w2_ref[...],
                preferred_element_type=jnp.float32) + b2_ref[...]
    h = bn_relu(h, g2_ref[...], be2_ref[...])
    o_ref[...] = jnp.dot(h.astype(jnp.bfloat16), w3_ref[...],
                         preferred_element_type=jnp.float32) + b3_ref[...]


# ------------------------------- stage wrappers ------------------------------

def conv_stage(x, sp, *, eps=_EPS, tile_cap=64):
    """conv(5,5)+bias + BN2d(batch stats) + relu + 2x2 maxpool.

    x: (N, H, W*C) lane-dense activation; returns (N, PH, PW*OC)."""
    n, H, WC = x.shape
    k = sp["T"].shape[0]
    OC = sp["gamma"].shape[0]
    OWOC = sp["bias_t"].shape[1]
    OW = OWOC // OC
    W = OW + k - 1
    OH = H - k + 1
    assert WC == W * (WC // W) and OH % 2 == 0 and OW % 2 == 0  # LeNet geometry guard
    PH, PW = OH // 2, OW // 2
    PWOC = PW * OC

    # Batch tile: largest divisor of N up to 64.  At 64 the double-buffered VMEM footprint
    # is ~7 MB (stage 1), inside the 16 MiB v5e scoped default and v6e/v7x 32 MiB defaults.
    tb = _largest_divisor_le(n, tile_cap)
    grid = (n // tb,)

    x_spec = pl.BlockSpec((tb, H, WC), lambda i: (i, 0, 0))
    y_spec = pl.BlockSpec((tb, OH, OWOC), lambda i: (i, 0, 0))
    t_spec = pl.BlockSpec((k, WC, OWOC), lambda i: (0, 0, 0))

    # Pass 1: conv+bias computed ONCE; pre-BN output + batch moments.
    y, sums = pl.pallas_call(
        functools.partial(_conv_bias_stats_kernel, k=k, oh=OH),
        out_shape=(jax.ShapeDtypeStruct((n, OH, OWOC), jnp.float32),
                   jax.ShapeDtypeStruct((2, OWOC), jnp.float32)),
        grid=grid,
        in_specs=[x_spec, t_spec, pl.BlockSpec((1, OWOC), lambda i: (0, 0))],
        out_specs=(y_spec, pl.BlockSpec((2, OWOC), lambda i: (0, 0))),
        compiler_params=pltpu.CompilerParams(dimension_semantics=("arbitrary",)),
    )(x, sp["T"], sp["bias_t"])

    # Tiny XLA glue: per-channel batch mean/var -> BN scale/shift, tiled to OW*OC lanes.
    per_c = sums.reshape(2, OW, OC).sum(axis=1)                    # (2, OC)
    cnt = jnp.float32(n * OH * OW)
    mean = per_c[0] / cnt
    var = jnp.maximum(per_c[1] / cnt - mean * mean, 0.0)           # biased = torch train-mode BN
    scale = sp["gamma"] * jax.lax.rsqrt(var + eps)
    shift = sp["beta"] - mean * scale
    ss = jnp.stack([jnp.tile(scale, OW), jnp.tile(shift, OW)])     # (2, OW*OC)

    # Pass 2: cheap BN + relu + pool only (no conv recomputation), "parallel" batch axis.
    return pl.pallas_call(
        _bn_relu_pool_kernel,
        out_shape=jax.ShapeDtypeStruct((n, PH, PWOC), jnp.float32),
        grid=grid,
        in_specs=[y_spec,
                  pl.BlockSpec((2, OWOC), lambda i: (0, 0)),
                  pl.BlockSpec((PH, OH), lambda i: (0, 0)),
                  pl.BlockSpec((PH, OH), lambda i: (0, 0)),
                  pl.BlockSpec((OWOC, PWOC), lambda i: (0, 0)),
                  pl.BlockSpec((OWOC, PWOC), lambda i: (0, 0))],
        out_specs=pl.BlockSpec((tb, PH, PWOC), lambda i: (i, 0, 0)),
        compiler_params=pltpu.CompilerParams(dimension_semantics=("parallel",)),
    )(y, ss, sp["rse"], sp["rso"], sp["cse"], sp["cso"])


def fc_head(x, fp, *, eps=_EPS):
    n = x.shape[0]
    args = (x, fp["w1"], fp["b1"], fp["g1"], fp["be1"],
            fp["w2"], fp["b2"], fp["g2"], fp["be2"],
            fp["w3"], fp["b3"])
    out = pl.pallas_call(
        functools.partial(_fc_head_kernel, eps=eps),
        out_shape=jax.ShapeDtypeStruct((n, 128), jnp.float32),
        grid=(1,),
        in_specs=[_full_spec(a.shape) for a in args],
        out_specs=_full_spec((n, 128)),
        compiler_params=pltpu.CompilerParams(dimension_semantics=("arbitrary",)),
    )(*args)
    return out[:, :10]                                             # drop lane padding


# ------------------------------ params / forward -----------------------------

def init_params(key):
    """Torch-layout params with PyTorch-default U(-1/sqrt(fan_in), 1/sqrt(fan_in)) init."""
    ks = jax.random.split(key, 10)

    def u(k, shape, fan_in):
        bound = 1.0 / jnp.sqrt(jnp.float32(fan_in))
        return jax.random.uniform(k, shape, jnp.float32, -bound, bound)

    p = {}
    p["w1"], p["b1"] = u(ks[0], (6, 3, 5, 5), 75), u(ks[1], (6,), 75)
    p["g1"], p["be1"] = jnp.ones((6,), jnp.float32), jnp.zeros((6,), jnp.float32)
    p["w2"], p["b2"] = u(ks[2], (16, 6, 5, 5), 150), u(ks[3], (16,), 150)
    p["g2"], p["be2"] = jnp.ones((16,), jnp.float32), jnp.zeros((16,), jnp.float32)
    p["wf1"], p["bf1"] = u(ks[4], (120, 400), 400), u(ks[5], (120,), 400)
    p["gf1"], p["bef1"] = jnp.ones((120,), jnp.float32), jnp.zeros((120,), jnp.float32)
    p["wf2"], p["bf2"] = u(ks[6], (84, 120), 120), u(ks[7], (84,), 120)
    p["gf2"], p["bef2"] = jnp.ones((84,), jnp.float32), jnp.zeros((84,), jnp.float32)
    p["wf3"], p["bf3"] = u(ks[8], (10, 84), 84), u(ks[9], (10,), 84)
    return p


def _toeplitz_conv_weights(w_oihw, W):
    """torch (OC, C, K, K) -> K Toeplitz matrices (K, W*C, OW*OC), bf16 (host-side, once)."""
    w = np.asarray(w_oihw, dtype=np.float32)
    OC, C, K, _ = w.shape
    OW = W - K + 1
    T = np.zeros((K, W * C, OW * OC), dtype=np.float32)
    for kh in range(K):
        for kw in range(K):
            blk = w[:, :, kh, kw].T                                # (C, OC)
            for ow in range(OW):
                wc = ow + kw
                T[kh, wc * C:(wc + 1) * C, ow * OC:(ow + 1) * OC] = blk
    return jnp.asarray(T, dtype=jnp.bfloat16)


def _pool_selectors(OH, OW, OC):
    """0/1 selection matrices for 2x2/2 maxpool in the (OH, OW*OC) layout."""
    PH, PW = OH // 2, OW // 2
    rse = np.zeros((PH, OH), np.float32)
    rso = np.zeros((PH, OH), np.float32)
    rse[np.arange(PH), 2 * np.arange(PH)] = 1.0
    rso[np.arange(PH), 2 * np.arange(PH) + 1] = 1.0
    cse = np.zeros((OW * OC, PW * OC), np.float32)
    cso = np.zeros((OW * OC, PW * OC), np.float32)
    for s in range(PW):
        for c in range(OC):
            cse[(2 * s) * OC + c, s * OC + c] = 1.0
            cso[(2 * s + 1) * OC + c, s * OC + c] = 1.0
    bf = lambda a: jnp.asarray(a, jnp.bfloat16)
    return bf(rse), bf(rso), bf(cse), bf(cso)


def prepare_params(p):
    """One-time layout prep: Toeplitz conv weights, tiled biases, pool selectors, 128-lane
    padded FC weights.  The forward pass contains no weight reshapes/transposes."""
    def conv_params(w, b, g, be, H, W):
        OC, C, K, _ = w.shape
        OH, OW = H - K + 1, W - K + 1
        rse, rso, cse, cso = _pool_selectors(OH, OW, OC)
        return dict(
            T=_toeplitz_conv_weights(w, W),
            bias_t=jnp.tile(jnp.asarray(b, jnp.float32), OW).reshape(1, OW * OC),
            gamma=jnp.asarray(g, jnp.float32),
            beta=jnp.asarray(be, jnp.float32),
            rse=rse, rso=rso, cse=cse, cso=cso)

    q = {}
    q["c1"] = conv_params(p["w1"], p["b1"], p["g1"], p["be1"], 32, 32)
    q["c2"] = conv_params(p["w2"], p["b2"], p["g2"], p["be2"], 14, 14)

    def pad_row(a, cols):
        out = np.zeros((1, cols), np.float32)
        out[0, :a.shape[0]] = np.asarray(a, np.float32)
        return jnp.asarray(out)

    # fc1 rows permuted so our (N, 5, 5*16) flatten (h*80 + w*16 + c) matches torch's
    # NCHW flatten (c*25 + h*5 + w); all feature dims padded to 128 lanes with zeros
    # (gamma/beta on pad columns are 0, so BN/relu on padding is inert).
    wf1 = np.asarray(p["wf1"], np.float32).reshape(120, 16, 5, 5)      # (j, c, h, w)
    wf1 = np.transpose(wf1, (2, 3, 1, 0)).reshape(400, 120)            # rows: h*80+w*16+c
    w1 = np.zeros((400, 128), np.float32); w1[:, :120] = wf1
    w2 = np.zeros((128, 128), np.float32); w2[:120, :84] = np.asarray(p["wf2"], np.float32).T
    w3 = np.zeros((128, 128), np.float32); w3[:84, :10] = np.asarray(p["wf3"], np.float32).T

    q["fc"] = dict(
        w1=jnp.asarray(w1, jnp.bfloat16), b1=pad_row(p["bf1"], 128),
        g1=pad_row(p["gf1"], 128), be1=pad_row(p["bef1"], 128),
        w2=jnp.asarray(w2, jnp.bfloat16), b2=pad_row(p["bf2"], 128),
        g2=pad_row(p["gf2"], 128), be2=pad_row(p["bef2"], 128),
        w3=jnp.asarray(w3, jnp.bfloat16), b3=pad_row(p["bf3"], 128),
    )
    return q


def lenet_batch_forward(params, x_nchw):
    n, _, H, W = x_nchw.shape
    # NCHW -> lane-dense (N, H, W*C) glue (only input transpose in the whole forward).
    x = jnp.transpose(x_nchw, (0, 2, 3, 1)).reshape(n, H, W * 3).astype(jnp.float32)
    y = conv_stage(x, params["c1"])          # (N, 14, 14*6)
    y = conv_stage(y, params["c2"])          # (N, 5, 5*16)
    y = y.reshape(n, 400)                    # free flatten; fc1 rows already permuted
    return fc_head(y, params["fc"])          # (N, 10) raw logits (torch forward has no logSoftmax)


if __name__ == "__main__":
    key = jax.random.PRNGKey(0)
    pkey, xkey = jax.random.split(key)
    params = prepare_params(init_params(pkey))
    # LeNet geometry requires 3x32x32 inputs so that the flatten is 16*5*5 = 400.
    x = jax.random.normal(xkey, (4, 3, 32, 32), jnp.float32)

    fwd = jax.jit(lenet_batch_forward)
    out = jax.block_until_ready(fwd(params, x))
    assert out.shape == (4, 10) and bool(jnp.all(jnp.isfinite(out)))
    print("KERNEL_OK")
</pallas_src>

<mosaic_0001>
module attributes {stable_mosaic.version = 11 : i64} {
  func.func @_conv_bias_stats_kernel(%arg0: i32, %arg1: memref<4x32x96xf32, #tpu.memory_space<vmem>>, %arg2: memref<5x96x168xbf16, #tpu.memory_space<vmem>>, %arg3: memref<1x168xf32, #tpu.memory_space<vmem>>, %arg4: memref<4x28x168xf32, #tpu.memory_space<vmem>>, %arg5: memref<2x168xf32, #tpu.memory_space<vmem>>) attributes {dimension_semantics = [#tpu.dimension_semantics<arbitrary>], iteration_bounds = array<i64: 1>, scalar_prefetch = 0 : i64, scratch_operands = 0 : i64, tpu.core_type = #tpu.core_type<tc>, window_params = [{transform_indices = @transform_0, window_bounds = array<i64: 4, 32, 96>}, {pipeline_mode = #tpu.pipeline_mode<synchronous>, transform_indices = @transform_1, window_bounds = array<i64: 5, 96, 168>}, {pipeline_mode = #tpu.pipeline_mode<synchronous>, transform_indices = @transform_2, window_bounds = array<i64: 1, 168>}, {transform_indices = @transform_3, window_bounds = array<i64: 4, 28, 168>}, {pipeline_mode = #tpu.pipeline_mode<synchronous>, transform_indices = @transform_4, window_bounds = array<i64: 2, 168>}]} {
    %c0_i32 = arith.constant 0 : i32
    %0 = arith.cmpi eq, %arg0, %c0_i32 : i32
    %1 = arith.extui %0 : i1 to i32
    %c0_i32_0 = arith.constant 0 : i32
    %2 = arith.cmpi ne, %1, %c0_i32_0 : i32
    scf.if %2 {
      %cst_11 = arith.constant 0.000000e+00 : f32
      %13 = vector.broadcast %cst_11 : f32 to vector<2x168xf32>
      %c0_12 = arith.constant 0 : index
      %c0_13 = arith.constant 0 : index
      %14 = vector.load %arg5[%c0_12, %c0_13] : memref<2x168xf32, #tpu.memory_space<vmem>>, vector<2x168xf32>
      tpu.vector_store %arg5[%c0_12, %c0_13], %13 {strides = array<i32>} : memref<2x168xf32, #tpu.memory_space<vmem>>, vector<2x168xf32>,
    } else {
    }
    %c0 = arith.constant 0 : index
    %c0_1 = arith.constant 0 : index
    %3 = vector.load %arg3[%c0, %c0_1] : memref<1x168xf32, #tpu.memory_space<vmem>>, vector<1x168xf32>
    %cst = arith.constant 0.000000e+00 : f32
    %4 = vector.broadcast %cst : f32 to vector<1x168xf32>
    %c0_i32_2 = arith.constant 0 : i32
    %c4_i32 = arith.constant 4 : i32
    %5 = arith.addi %c0_i32_2, %c4_i32 : i32
    %c1_i32 = arith.constant 1 : i32
    %6:2 = scf.for %arg6 = %c0_i32_2 to %5 step %c1_i32 iter_args(%arg7 = %4, %arg8 = %4) -> (vector<1x168xf32>, vector<1x168xf32>)  : i32 {
      %13 = arith.index_cast %arg6 : i32 to index
      %c0_11 = arith.constant 0 : index
      %c0_12 = arith.constant 0 : index
      %14 = vector.load %arg1[%13, %c0_11, %c0_12] : memref<4x32x96xf32, #tpu.memory_space<vmem>>, vector<1x28x96xf32>
      %15 = vector.shape_cast %14 : vector<1x28x96xf32> to vector<28x96xf32>
      %16 = arith.truncf %15 : vector<28x96xf32> to vector<28x96xbf16>
      %c0_13 = arith.constant 0 : index
      %c0_14 = arith.constant 0 : index
      %c0_15 = arith.constant 0 : index
      %17 = vector.load %arg2[%c0_13, %c0_14, %c0_15] : memref<5x96x168xbf16, #tpu.memory_space<vmem>>, vector<1x96x168xbf16>
      %18 = vector.shape_cast %17 : vector<1x96x168xbf16> to vector<96x168xbf16>
      %cst_16 = arith.constant dense<0.000000e+00> : vector<28x168xf32>
      %19 = tpu.matmul %16, %18, %cst_16 {dimension_numbers = #tpu.dot_dimension_numbers<[1], [0], [0], [1], [0, 0, 1, 1], [], []>} : vector<28x96xbf16>, vector<96x168xbf16>, vector<28x168xf32> -> vector<28x168xf32>
      %20 = arith.index_cast %arg6 : i32 to index
      %c1_17 = arith.constant 1 : index
      %c0_18 = arith.constant 0 : index
      %21 = vector.load %arg1[%20, %c1_17, %c0_18] : memref<4x32x96xf32, #tpu.memory_space<vmem>>, vector<1x28x96xf32>
      %22 = vector.shape_cast %21 : vector<1x28x96xf32> to vector<28x96xf32>
      %23 = arith.truncf %22 : vector<28x96xf32> to vector<28x96xbf16>
      %c1_19 = arith.constant 1 : index
      %c0_20 = arith.constant 0 : index
      %c0_21 = arith.constant 0 : index
      %24 = vector.load %arg2[%c1_19, %c0_20, %c0_21] : memref<5x96x168xbf16, #tpu.memory_space<vmem>>, vector<1x96x168xbf16>
      %25 = vector.shape_cast %24 : vector<1x96x168xbf16> to vector<96x168xbf16>
      %cst_22 = arith.constant dense<0.000000e+00> : vector<28x168xf32>
      %26 = tpu.matmul %23, %25, %cst_22 {dimension_numbers = #tpu.dot_dimension_numbers<[1], [0], [0], [1], [0, 0, 1, 1], [], []>} : vector<28x96xbf16>, vector<96x168xbf16>, vector<28x168xf32> -> vector<28x168xf32>
      %27 = arith.addf %19, %26 : vector<28x168xf32>
      %28 = arith.index_cast %arg6 : i32 to index
      %c2 = arith.constant 2 : index
      %c0_23 = arith.constant 0 : index
      %29 = vector.load %arg1[%28, %c2, %c0_23] : memref<4x32x96xf32, #tpu.memory_space<vmem>>, vector<1x28x96xf32>
      %30 = vector.shape_cast %29 : vector<1x28x96xf32> to vector<28x96xf32>
      %31 = arith.truncf %30 : vector<28x96xf32> to vector<28x96xbf16>
      %c2_24 = arith.constant 2 : index
      %c0_25 = arith.constant 0 : index
      %c0_26 = arith.constant 0 : index
      %32 = vector.load %arg2[%c2_24, %c0_25, %c0_26] : memref<5x96x168xbf16, #tpu.memory_space<vmem>>, vector<1x96x168xbf16>
      %33 = vector.shape_cast %32 : vector<1x96x168xbf16> to vector<96x168xbf16>
      %cst_27 = arith.constant dense<0.000000e+00> : vector<28x168xf32>
      %34 = tpu.matmul %31, %33, %cst_27 {dimension_numbers = #tpu.dot_dimension_numbers<[1], [0], [0], [1], [0, 0, 1, 1], [], []>} : vector<28x96xbf16>, vector<96x168xbf16>, vector<28x168xf32> -> vector<28x168xf32>
      %35 = arith.addf %27, %34 : vector<28x168xf32>
      %36 = arith.index_cast %arg6 : i32 to index
      %c3 = arith.constant 3 : index
      %c0_28 = arith.constant 0 : index
      %37 = vector.load %arg1[%36, %c3, %c0_28] : memref<4x32x96xf32, #tpu.memory_space<vmem>>, vector<1x28x96xf32>
      %38 = vector.shape_cast %37 : vector<1x28x96xf32> to vector<28x96xf32>
      %39 = arith.truncf %38 : vector<28x96xf32> to vector<28x96xbf16>
      %c3_29 = arith.constant 3 : index
      %c0_30 = arith.constant 0 : index
      %c0_31 = arith.constant 0 : index
      %40 = vector.load %arg2[%c3_29, %c0_30, %c0_31] : memref<5x96x168xbf16, #tpu.memory_space<vmem>>, vector<1x96x168xbf16>
      %41 = vector.shape_cast %40 : vector<1x96x168xbf16> to vector<96x168xbf16>
      %cst_32 = arith.constant dense<0.000000e+00> : vector<28x168xf32>
      %42 = tpu.matmul %39, %41, %cst_32 {dimension_numbers = #tpu.dot_dimension_numbers<[1], [0], [0], [1], [0, 0, 1, 1], [], []>} : vector<28x96xbf16>, vector<96x168xbf16>, vector<28x168xf32> -> vector<28x168xf32>
      %43 = arith.addf %35, %42 : vector<28x168xf32>
      %44 = arith.index_cast %arg6 : i32 to index
      %c4 = arith.constant 4 : index
      %c0_33 = arith.constant 0 : index
      %45 = vector.load %arg1[%44, %c4, %c0_33] : memref<4x32x96xf32, #tpu.memory_space<vmem>>, vector<1x28x96xf32>
      %46 = vector.shape_cast %45 : vector<1x28x96xf32> to vector<28x96xf32>
      %47 = arith.truncf %46 : vector<28x96xf32> to vector<28x96xbf16>
      %c4_34 = arith.constant 4 : index
      %c0_35 = arith.constant 0 : index
      %c0_36 = arith.constant 0 : index
      %48 = vector.load %arg2[%c4_34, %c0_35, %c0_36] : memref<5x96x168xbf16, #tpu.memory_space<vmem>>, vector<1x96x168xbf16>
      %49 = vector.shape_cast %48 : vector<1x96x168xbf16> to vector<96x168xbf16>
      %cst_37 = arith.constant dense<0.000000e+00> : vector<28x168xf32>
      %50 = tpu.matmul %47, %49, %cst_37 {dimension_numbers = #tpu.dot_dimension_numbers<[1], [0], [0], [1], [0, 0, 1, 1], [], []>} : vector<28x96xbf16>, vector<96x168xbf16>, vector<28x168xf32> -> vector<28x168xf32>
      %51 = arith.addf %43, %50 : vector<28x168xf32>
      %52 = vector.broadcast %3 : vector<1x168xf32> to vector<28x168xf32>
      %53 = arith.addf %51, %52 : vector<28x168xf32>
      %54 = arith.index_cast %arg6 : i32 to index
      %c0_38 = arith.constant 0 : index
      %c0_39 = arith.constant 0 : index
      %55 = vector.load %arg4[%54, %c0_38, %c0_39] : memref<4x28x168xf32, #tpu.memory_space<vmem>>, vector<1x28x168xf32>
      %56 = vector.shape_cast %55 : vector<1x28x168xf32> to vector<28x168xf32>
      %57 = vector.shape_cast %53 : vector<28x168xf32> to vector<1x28x168xf32>
      tpu.vector_store %arg4[%54, %c0_38, %c0_39], %57 {strides = array<i32>} : memref<4x28x168xf32, #tpu.memory_space<vmem>>, vector<1x28x168xf32>,
      %cst_40 = arith.constant dense<0.000000e+00> : vector<168xf32>
      %58 = vector.multi_reduction <add>, %53, %cst_40 [0] : vector<28x168xf32> to vector<168xf32>
      %59 = vector.shape_cast %58 : vector<168xf32> to vector<1x168xf32>
      %60 = arith.addf %arg7, %59 : vector<1x168xf32>
      %61 = arith.mulf %53, %53 : vector<28x168xf32>
      %cst_41 = arith.constant dense<0.000000e+00> : vector<168xf32>
      %62 = vector.multi_reduction <add>, %61, %cst_41 [0] : vector<28x168xf32> to vector<168xf32>
      %63 = vector.shape_cast %62 : vector<168xf32> to vector<1x168xf32>
      %64 = arith.addf %arg8, %63 : vector<1x168xf32>
      scf.yield %60, %64 : vector<1x168xf32>, vector<1x168xf32>
    }
    %c4_i32_3 = arith.constant 4 : i32
    %c0_4 = arith.constant 0 : index
    %c0_5 = arith.constant 0 : index
    %7 = vector.load %arg5[%c0_4, %c0_5] : memref<2x168xf32, #tpu.memory_space<vmem>>, vector<1x168xf32>
    %8 = arith.addf %7, %6#0 : vector<1x168xf32>
    %c0_6 = arith.constant 0 : index
    %c0_7 = arith.constant 0 : index
    %9 = vector.load %arg5[%c0_6, %c0_7] : memref<2x168xf32, #tpu.memory_space<vmem>>, vector<1x168xf32>
    tpu.vector_store %arg5[%c0_6, %c0_7], %8 {strides = array<i32>} : memref<2x168xf32, #tpu.memory_space<vmem>>, vector<1x168xf32>,
    %c1 = arith.constant 1 : index
    %c0_8 = arith.constant 0 : index
    %10 = vector.load %arg5[%c1, %c0_8] : memref<2x168xf32, #tpu.memory_space<vmem>>, vector<1x168xf32>
    %11 = arith.addf %10, %6#1 : vector<1x168xf32>
    %c1_9 = arith.constant 1 : index
    %c0_10 = arith.constant 0 : index
    %12 = vector.load %arg5[%c1_9, %c0_10] : memref<2x168xf32, #tpu.memory_space<vmem>>, vector<1x168xf32>
    tpu.vector_store %arg5[%c1_9, %c0_10], %11 {strides = array<i32>} : memref<2x168xf32, #tpu.memory_space<vmem>>, vector<1x168xf32>,
    return
  }
  func.func @transform_0(%arg0: i32) -> (i32, i32, i32) {
    %c0_i32 = arith.constant 0 : i32
    %c0_i32_0 = arith.constant 0 : i32
    %c0_i32_1 = arith.constant 0 : i32
    return %arg0, %c0_i32, %c0_i32_0 : i32, i32, i32
  }
  func.func @transform_1(%arg0: i32) -> (i32, i32, i32) {
    %c0_i32 = arith.constant 0 : i32
    %c0_i32_0 = arith.constant 0 : i32
    %c0_i32_1 = arith.constant 0 : i32
    %c0_i32_2 = arith.constant 0 : i32
    return %c0_i32, %c0_i32_0, %c0_i32_1 : i32, i32, i32
  }
  func.func @transform_2(%arg0: i32) -> (i32, i32) {
    %c0_i32 = arith.constant 0 : i32
    %c0_i32_0 = arith.constant 0 : i32
    %c0_i32_1 = arith.constant 0 : i32
    return %c0_i32, %c0_i32_0 : i32, i32
  }
  func.func @transform_3(%arg0: i32) -> (i32, i32, i32) {
    %c0_i32 = arith.constant 0 : i32
    %c0_i32_0 = arith.constant 0 : i32
    %c0_i32_1 = arith.constant 0 : i32
    return %arg0, %c0_i32, %c0_i32_0 : i32, i32, i32
  }
  func.func @transform_4(%arg0: i32) -> (i32, i32) {
    %c0_i32 = arith.constant 0 : i32
    %c0_i32_0 = arith.constant 0 : i32
    %c0_i32_1 = arith.constant 0 : i32
    return %c0_i32, %c0_i32_0 : i32, i32
  }
}

module attributes {stable_mosaic.version = 11 : i64} {
  func.func @_bn_relu_pool_kernel(%arg0: i32, %arg1: memref<4x28x168xf32, #tpu.memory_space<vmem>>, %arg2: memref<2x168xf32, #tpu.memory_space<vmem>>, %arg3: memref<14x28xbf16, #tpu.memory_space<vmem>>, %arg4: memref<14x28xbf16, #tpu.memory_space<vmem>>, %arg5: memref<168x84xbf16, #tpu.memory_space<vmem>>, %arg6: memref<168x84xbf16, #tpu.memory_space<vmem>>, %arg7: memref<4x14x84xf32, #tpu.memory_space<vmem>>) attributes {dimension_semantics = [#tpu.dimension_semantics<parallel>], iteration_bounds = array<i64: 1>, scalar_prefetch = 0 : i64, scratch_operands = 0 : i64, tpu.core_type = #tpu.core_type<tc>, window_params = [{transform_indices = @transform_0, window_bounds = array<i64: 4, 28, 168>}, {pipeline_mode = #tpu.pipeline_mode<synchronous>, transform_indices = @transform_1, window_bounds = array<i64: 2, 168>}, {pipeline_mode = #tpu.pipeline_mode<synchronous>, transform_indices = @transform_2, window_bounds = array<i64: 14, 28>}, {pipeline_mode = #tpu.pipeline_mode<synchronous>, transform_indices = @transform_3, window_bounds = array<i64: 14, 28>}, {pipeline_mode = #tpu.pipeline_mode<synchronous>, transform_indices = @transform_4, window_bounds = array<i64: 168, 84>}, {pipeline_mode = #tpu.pipeline_mode<synchronous>, transform_indices = @transform_5, window_bounds = array<i64: 168, 84>}, {transform_indices = @transform_6, window_bounds = array<i64: 4, 14, 84>}]} {
    %c0 = arith.constant 0 : index
    %c0_0 = arith.constant 0 : index
    %0 = vector.load %arg2[%c0, %c0_0] : memref<2x168xf32, #tpu.memory_space<vmem>>, vector<2x168xf32>
    %1 = vector.extract_strided_slice %0 {offsets = [0, 0], sizes = [1, 168], strides = [1, 1]} : vector<2x168xf32> to vector<1x168xf32>
    %2 = vector.extract_strided_slice %0 {offsets = [1, 0], sizes = [1, 168], strides = [1, 1]} : vector<2x168xf32> to vector<1x168xf32>
    %c0_1 = arith.constant 0 : index
    %c0_2 = arith.constant 0 : index
    %3 = vector.load %arg3[%c0_1, %c0_2] : memref<14x28xbf16, #tpu.memory_space<vmem>>, vector<14x28xbf16>
    %c0_3 = arith.constant 0 : index
    %c0_4 = arith.constant 0 : index
    %4 = vector.load %arg4[%c0_3, %c0_4] : memref<14x28xbf16, #tpu.memory_space<vmem>>, vector<14x28xbf16>
    %c0_5 = arith.constant 0 : index
    %c0_6 = arith.constant 0 : index
    %5 = vector.load %arg5[%c0_5, %c0_6] : memref<168x84xbf16, #tpu.memory_space<vmem>>, vector<168x84xbf16>
    %c0_7 = arith.constant 0 : index
    %c0_8 = arith.constant 0 : index
    %6 = vector.load %arg6[%c0_7, %c0_8] : memref<168x84xbf16, #tpu.memory_space<vmem>>, vector<168x84xbf16>
    %c0_i32 = arith.constant 0 : i32
    %c4_i32 = arith.constant 4 : i32
    %7 = arith.addi %c0_i32, %c4_i32 : i32
    %c1_i32 = arith.constant 1 : i32
    scf.for %arg8 = %c0_i32 to %7 step %c1_i32  : i32 {
      %8 = arith.index_cast %arg8 : i32 to index
      %c0_10 = arith.constant 0 : index
      %c0_11 = arith.constant 0 : index
      %9 = vector.load %arg1[%8, %c0_10, %c0_11] : memref<4x28x168xf32, #tpu.memory_space<vmem>>, vector<1x28x168xf32>
      %10 = vector.shape_cast %9 : vector<1x28x168xf32> to vector<28x168xf32>
      %11 = vector.broadcast %1 : vector<1x168xf32> to vector<28x168xf32>
      %12 = arith.mulf %10, %11 : vector<28x168xf32>
      %13 = vector.broadcast %2 : vector<1x168xf32> to vector<28x168xf32>
      %14 = arith.addf %12, %13 : vector<28x168xf32>
      %cst = arith.constant 0.000000e+00 : f32
      %15 = vector.broadcast %cst : f32 to vector<28x168xf32>
      %16 = arith.maximumf %14, %15 : vector<28x168xf32>
      %17 = arith.truncf %16 : vector<28x168xf32> to vector<28x168xbf16>
      %cst_12 = arith.constant dense<0.000000e+00> : vector<14x168xf32>
      %18 = tpu.matmul %3, %17, %cst_12 {dimension_numbers = #tpu.dot_dimension_numbers<[1], [0], [0], [1], [0, 0, 1, 1], [], []>} : vector<14x28xbf16>, vector<28x168xbf16>, vector<14x168xf32> -> vector<14x168xf32>
      %cst_13 = arith.constant dense<0.000000e+00> : vector<14x168xf32>
      %19 = tpu.matmul %4, %17, %cst_13 {dimension_numbers = #tpu.dot_dimension_numbers<[1], [0], [0], [1], [0, 0, 1, 1], [], []>} : vector<14x28xbf16>, vector<28x168xbf16>, vector<14x168xf32> -> vector<14x168xf32>
      %20 = arith.maximumf %18, %19 : vector<14x168xf32>
      %21 = arith.truncf %20 : vector<14x168xf32> to vector<14x168xbf16>
      %cst_14 = arith.constant dense<0.000000e+00> : vector<14x84xf32>
      %22 = tpu.matmul %21, %5, %cst_14 {dimension_numbers = #tpu.dot_dimension_numbers<[1], [0], [0], [1], [0, 0, 1, 1], [], []>} : vector<14x168xbf16>, vector<168x84xbf16>, vector<14x84xf32> -> vector<14x84xf32>
      %cst_15 = arith.constant dense<0.000000e+00> : vector<14x84xf32>
      %23 = tpu.matmul %21, %6, %cst_15 {dimension_numbers = #tpu.dot_dimension_numbers<[1], [0], [0], [1], [0, 0, 1, 1], [], []>} : vector<14x168xbf16>, vector<168x84xbf16>, vector<14x84xf32> -> vector<14x84xf32>
      %24 = arith.maximumf %22, %23 : vector<14x84xf32>
      %25 = arith.index_cast %arg8 : i32 to index
      %c0_16 = arith.constant 0 : index
      %c0_17 = arith.constant 0 : index
      %26 = vector.load %arg7[%25, %c0_16, %c0_17] : memref<4x14x84xf32, #tpu.memory_space<vmem>>, vector<1x14x84xf32>
      %27 = vector.shape_cast %26 : vector<1x14x84xf32> to vector<14x84xf32>
      %28 = vector.shape_cast %24 : vector<14x84xf32> to vector<1x14x84xf32>
      tpu.vector_store %arg7[%25, %c0_16, %c0_17], %28 {strides = array<i32>} : memref<4x14x84xf32, #tpu.memory_space<vmem>>, vector<1x14x84xf32>,
    }
    %c4_i32_9 = arith.constant 4 : i32
    return
  }
  func.func @transform_0(%arg0: i32) -> (i32, i32, i32) {
    %c0_i32 = arith.constant 0 : i32
    %c0_i32_0 = arith.constant 0 : i32
    %c0_i32_1 = arith.constant 0 : i32
    return %arg0, %c0_i32, %c0_i32_0 : i32, i32, i32
  }
  func.func @transform_1(%arg0: i32) -> (i32, i32) {
    %c0_i32 = arith.constant 0 : i32
    %c0_i32_0 = arith.constant 0 : i32
    %c0_i32_1 = arith.constant 0 : i32
    return %c0_i32, %c0_i32_0 : i32, i32
  }
  func.func @transform_2(%arg0: i32) -> (i32, i32) {
    %c0_i32 = arith.constant 0 : i32
    %c0_i32_0 = arith.constant 0 : i32
    %c0_i32_1 = arith.constant 0 : i32
    return %c0_i32, %c0_i32_0 : i32, i32
  }
  func.func @transform_3(%arg0: i32) -> (i32, i32) {
    %c0_i32 = arith.constant 0 : i32
    %c0_i32_0 = arith.constant 0 : i32
    %c0_i32_1 = arith.constant 0 : i32
    return %c0_i32, %c0_i32_0 : i32, i32
  }
  func.func @transform_4(%arg0: i32) -> (i32, i32) {
    %c0_i32 = arith.constant 0 : i32
    %c0_i32_0 = arith.constant 0 : i32
    %c0_i32_1 = arith.constant 0 : i32
    return %c0_i32, %c0_i32_0 : i32, i32
  }
  func.func @transform_5(%arg0: i32) -> (i32, i32) {
    %c0_i32 = arith.constant 0 : i32
    %c0_i32_0 = arith.constant 0 : i32
    %c0_i32_1 = arith.constant 0 : i32
    return %c0_i32, %c0_i32_0 : i32, i32
  }
  func.func @transform_6(%arg0: i32) -> (i32, i32, i32) {
    %c0_i32 = arith.constant 0 : i32
    %c0_i32_0 = arith.constant 0 : i32
    %c0_i32_1 = arith.constant 0 : i32
    return %arg0, %c0_i32, %c0_i32_0 : i32, i32, i32
  }
}

module attributes {stable_mosaic.version = 11 : i64} {
  func.func @_conv_bias_stats_kernel(%arg0: i32, %arg1: memref<4x14x84xf32, #tpu.memory_space<vmem>>, %arg2: memref<5x84x160xbf16, #tpu.memory_space<vmem>>, %arg3: memref<1x160xf32, #tpu.memory_space<vmem>>, %arg4: memref<4x10x160xf32, #tpu.memory_space<vmem>>, %arg5: memref<2x160xf32, #tpu.memory_space<vmem>>) attributes {dimension_semantics = [#tpu.dimension_semantics<arbitrary>], iteration_bounds = array<i64: 1>, scalar_prefetch = 0 : i64, scratch_operands = 0 : i64, tpu.core_type = #tpu.core_type<tc>, window_params = [{transform_indices = @transform_0, window_bounds = array<i64: 4, 14, 84>}, {pipeline_mode = #tpu.pipeline_mode<synchronous>, transform_indices = @transform_1, window_bounds = array<i64: 5, 84, 160>}, {pipeline_mode = #tpu.pipeline_mode<synchronous>, transform_indices = @transform_2, window_bounds = array<i64: 1, 160>}, {transform_indices = @transform_3, window_bounds = array<i64: 4, 10, 160>}, {pipeline_mode = #tpu.pipeline_mode<synchronous>, transform_indices = @transform_4, window_bounds = array<i64: 2, 160>}]} {
    %c0_i32 = arith.constant 0 : i32
    %0 = arith.cmpi eq, %arg0, %c0_i32 : i32
    %1 = arith.extui %0 : i1 to i32
    %c0_i32_0 = arith.constant 0 : i32
    %2 = arith.cmpi ne, %1, %c0_i32_0 : i32
    scf.if %2 {
      %cst_11 = arith.constant 0.000000e+00 : f32
      %13 = vector.broadcast %cst_11 : f32 to vector<2x160xf32>
      %c0_12 = arith.constant 0 : index
      %c0_13 = arith.constant 0 : index
      %14 = vector.load %arg5[%c0_12, %c0_13] : memref<2x160xf32, #tpu.memory_space<vmem>>, vector<2x160xf32>
      tpu.vector_store %arg5[%c0_12, %c0_13], %13 {strides = array<i32>} : memref<2x160xf32, #tpu.memory_space<vmem>>, vector<2x160xf32>,
    } else {
    }
    %c0 = arith.constant 0 : index
    %c0_1 = arith.constant 0 : index
    %3 = vector.load %arg3[%c0, %c0_1] : memref<1x160xf32, #tpu.memory_space<vmem>>, vector<1x160xf32>
    %cst = arith.constant 0.000000e+00 : f32
    %4 = vector.broadcast %cst : f32 to vector<1x160xf32>
    %c0_i32_2 = arith.constant 0 : i32
    %c4_i32 = arith.constant 4 : i32
    %5 = arith.addi %c0_i32_2, %c4_i32 : i32
    %c1_i32 = arith.constant 1 : i32
    %6:2 = scf.for %arg6 = %c0_i32_2 to %5 step %c1_i32 iter_args(%arg7 = %4, %arg8 = %4) -> (vector<1x160xf32>, vector<1x160xf32>)  : i32 {
      %13 = arith.index_cast %arg6 : i32 to index
      %c0_11 = arith.constant 0 : index
      %c0_12 = arith.constant 0 : index
      %14 = vector.load %arg1[%13, %c0_11, %c0_12] : memref<4x14x84xf32, #tpu.memory_space<vmem>>, vector<1x10x84xf32>
      %15 = vector.shape_cast %14 : vector<1x10x84xf32> to vector<10x84xf32>
      %16 = arith.truncf %15 : vector<10x84xf32> to vector<10x84xbf16>
      %c0_13 = arith.constant 0 : index
      %c0_14 = arith.constant 0 : index
      %c0_15 = arith.constant 0 : index
      %17 = vector.load %arg2[%c0_13, %c0_14, %c0_15] : memref<5x84x160xbf16, #tpu.memory_space<vmem>>, vector<1x84x160xbf16>
      %18 = vector.shape_cast %17 : vector<1x84x160xbf16> to vector<84x160xbf16>
      %cst_16 = arith.constant dense<0.000000e+00> : vector<10x160xf32>
      %19 = tpu.matmul %16, %18, %cst_16 {dimension_numbers = #tpu.dot_dimension_numbers<[1], [0], [0], [1], [0, 0, 1, 1], [], []>} : vector<10x84xbf16>, vector<84x160xbf16>, vector<10x160xf32> -> vector<10x160xf32>
      %20 = arith.index_cast %arg6 : i32 to index
      %c1_17 = arith.constant 1 : index
      %c0_18 = arith.constant 0 : index
      %21 = vector.load %arg1[%20, %c1_17, %c0_18] : memref<4x14x84xf32, #tpu.memory_space<vmem>>, vector<1x10x84xf32>
      %22 = vector.shape_cast %21 : vector<1x10x84xf32> to vector<10x84xf32>
      %23 = arith.truncf %22 : vector<10x84xf32> to vector<10x84xbf16>
      %c1_19 = arith.constant 1 : index
      %c0_20 = arith.constant 0 : index
      %c0_21 = arith.constant 0 : index
      %24 = vector.load %arg2[%c1_19, %c0_20, %c0_21] : memref<5x84x160xbf16, #tpu.memory_space<vmem>>, vector<1x84x160xbf16>
      %25 = vector.shape_cast %24 : vector<1x84x160xbf16> to vector<84x160xbf16>
      %cst_22 = arith.constant dense<0.000000e+00> : vector<10x160xf32>
      %26 = tpu.matmul %23, %25, %cst_22 {dimension_numbers = #tpu.dot_dimension_numbers<[1], [0], [0], [1], [0, 0, 1, 1], [], []>} : vector<10x84xbf16>, vector<84x160xbf16>, vector<10x160xf32> -> vector<10x160xf32>
      %27 = arith.addf %19, %26 : vector<10x160xf32>
      %28 = arith.index_cast %arg6 : i32 to index
      %c2 = arith.constant 2 : index
      %c0_23 = arith.constant 0 : index
      %29 = vector.load %arg1[%28, %c2, %c0_23] : memref<4x14x84xf32, #tpu.memory_space<vmem>>, vector<1x10x84xf32>
      %30 = vector.shape_cast %29 : vector<1x10x84xf32> to vector<10x84xf32>
      %31 = arith.truncf %30 : vector<10x84xf32> to vector<10x84xbf16>
      %c2_24 = arith.constant 2 : index
      %c0_25 = arith.constant 0 : index
      %c0_26 = arith.constant 0 : index
      %32 = vector.load %arg2[%c2_24, %c0_25, %c0_26] : memref<5x84x160xbf16, #tpu.memory_space<vmem>>, vector<1x84x160xbf16>
      %33 = vector.shape_cast %32 : vector<1x84x160xbf16> to vector<84x160xbf16>
      %cst_27 = arith.constant dense<0.000000e+00> : vector<10x160xf32>
      %34 = tpu.matmul %31, %33, %cst_27 {dimension_numbers = #tpu.dot_dimension_numbers<[1], [0], [0], [1], [0, 0, 1, 1], [], []>} : vector<10x84xbf16>, vector<84x160xbf16>, vector<10x160xf32> -> vector<10x160xf32>
      %35 = arith.addf %27, %34 : vector<10x160xf32>
      %36 = arith.index_cast %arg6 : i32 to index
      %c3 = arith.constant 3 : index
      %c0_28 = arith.constant 0 : index
      %37 = vector.load %arg1[%36, %c3, %c0_28] : memref<4x14x84xf32, #tpu.memory_space<vmem>>, vector<1x10x84xf32>
      %38 = vector.shape_cast %37 : vector<1x10x84xf32> to vector<10x84xf32>
      %39 = arith.truncf %38 : vector<10x84xf32> to vector<10x84xbf16>
      %c3_29 = arith.constant 3 : index
      %c0_30 = arith.constant 0 : index
      %c0_31 = arith.constant 0 : index
      %40 = vector.load %arg2[%c3_29, %c0_30, %c0_31] : memref<5x84x160xbf16, #tpu.memory_space<vmem>>, vector<1x84x160xbf16>
      %41 = vector.shape_cast %40 : vector<1x84x160xbf16> to vector<84x160xbf16>
      %cst_32 = arith.constant dense<0.000000e+00> : vector<10x160xf32>
      %42 = tpu.matmul %39, %41, %cst_32 {dimension_numbers = #tpu.dot_dimension_numbers<[1], [0], [0], [1], [0, 0, 1, 1], [], []>} : vector<10x84xbf16>, vector<84x160xbf16>, vector<10x160xf32> -> vector<10x160xf32>
      %43 = arith.addf %35, %42 : vector<10x160xf32>
      %44 = arith.index_cast %arg6 : i32 to index
      %c4 = arith.constant 4 : index
      %c0_33 = arith.constant 0 : index
      %45 = vector.load %arg1[%44, %c4, %c0_33] : memref<4x14x84xf32, #tpu.memory_space<vmem>>, vector<1x10x84xf32>
      %46 = vector.shape_cast %45 : vector<1x10x84xf32> to vector<10x84xf32>
      %47 = arith.truncf %46 : vector<10x84xf32> to vector<10x84xbf16>
      %c4_34 = arith.constant 4 : index
      %c0_35 = arith.constant 0 : index
      %c0_36 = arith.constant 0 : index
      %48 = vector.load %arg2[%c4_34, %c0_35, %c0_36] : memref<5x84x160xbf16, #tpu.memory_space<vmem>>, vector<1x84x160xbf16>
      %49 = vector.shape_cast %48 : vector<1x84x160xbf16> to vector<84x160xbf16>
      %cst_37 = arith.constant dense<0.000000e+00> : vector<10x160xf32>
      %50 = tpu.matmul %47, %49, %cst_37 {dimension_numbers = #tpu.dot_dimension_numbers<[1], [0], [0], [1], [0, 0, 1, 1], [], []>} : vector<10x84xbf16>, vector<84x160xbf16>, vector<10x160xf32> -> vector<10x160xf32>
      %51 = arith.addf %43, %50 : vector<10x160xf32>
      %52 = vector.broadcast %3 : vector<1x160xf32> to vector<10x160xf32>
      %53 = arith.addf %51, %52 : vector<10x160xf32>
      %54 = arith.index_cast %arg6 : i32 to index
      %c0_38 = arith.constant 0 : index
      %c0_39 = arith.constant 0 : index
      %55 = vector.load %arg4[%54, %c0_38, %c0_39] : memref<4x10x160xf32, #tpu.memory_space<vmem>>, vector<1x10x160xf32>
      %56 = vector.shape_cast %55 : vector<1x10x160xf32> to vector<10x160xf32>
      %57 = vector.shape_cast %53 : vector<10x160xf32> to vector<1x10x160xf32>
      tpu.vector_store %arg4[%54, %c0_38, %c0_39], %57 {strides = array<i32>} : memref<4x10x160xf32, #tpu.memory_space<vmem>>, vector<1x10x160xf32>,
      %cst_40 = arith.constant dense<0.000000e+00> : vector<160xf32>
      %58 = vector.multi_reduction <add>, %53, %cst_40 [0] : vector<10x160xf32> to vector<160xf32>
      %59 = vector.shape_cast %58 : vector<160xf32> to vector<1x160xf32>
      %60 = arith.addf %arg7, %59 : vector<1x160xf32>
      %61 = arith.mulf %53, %53 : vector<10x160xf32>
      %cst_41 = arith.constant dense<0.000000e+00> : vector<160xf32>
      %62 = vector.multi_reduction <add>, %61, %cst_41 [0] : vector<10x160xf32> to vector<160xf32>
      %63 = vector.shape_cast %62 : vector<160xf32> to vector<1x160xf32>
      %64 = arith.addf %arg8, %63 : vector<1x160xf32>
      scf.yield %60, %64 : vector<1x160xf32>, vector<1x160xf32>
    }
    %c4_i32_3 = arith.constant 4 : i32
    %c0_4 = arith.constant 0 : index
    %c0_5 = arith.constant 0 : index
    %7 = vector.load %arg5[%c0_4, %c0_5] : memref<2x160xf32, #tpu.memory_space<vmem>>, vector<1x160xf32>
    %8 = arith.addf %7, %6#0 : vector<1x160xf32>
    %c0_6 = arith.constant 0 : index
    %c0_7 = arith.constant 0 : index
    %9 = vector.load %arg5[%c0_6, %c0_7] : memref<2x160xf32, #tpu.memory_space<vmem>>, vector<1x160xf32>
    tpu.vector_store %arg5[%c0_6, %c0_7], %8 {strides = array<i32>} : memref<2x160xf32, #tpu.memory_space<vmem>>, vector<1x160xf32>,
    %c1 = arith.constant 1 : index
    %c0_8 = arith.constant 0 : index
    %10 = vector.load %arg5[%c1, %c0_8] : memref<2x160xf32, #tpu.memory_space<vmem>>, vector<1x160xf32>
    %11 = arith.addf %10, %6#1 : vector<1x160xf32>
    %c1_9 = arith.constant 1 : index
    %c0_10 = arith.constant 0 : index
    %12 = vector.load %arg5[%c1_9, %c0_10] : memref<2x160xf32, #tpu.memory_space<vmem>>, vector<1x160xf32>
    tpu.vector_store %arg5[%c1_9, %c0_10], %11 {strides = array<i32>} : memref<2x160xf32, #tpu.memory_space<vmem>>, vector<1x160xf32>,
    return
  }
  func.func @transform_0(%arg0: i32) -> (i32, i32, i32) {
    %c0_i32 = arith.constant 0 : i32
    %c0_i32_0 = arith.constant 0 : i32
    %c0_i32_1 = arith.constant 0 : i32
    return %arg0, %c0_i32, %c0_i32_0 : i32, i32, i32
  }
  func.func @transform_1(%arg0: i32) -> (i32, i32, i32) {
    %c0_i32 = arith.constant 0 : i32
    %c0_i32_0 = arith.constant 0 : i32
    %c0_i32_1 = arith.constant 0 : i32
    %c0_i32_2 = arith.constant 0 : i32
    return %c0_i32, %c0_i32_0, %c0_i32_1 : i32, i32, i32
  }
  func.func @transform_2(%arg0: i32) -> (i32, i32) {
    %c0_i32 = arith.constant 0 : i32
    %c0_i32_0 = arith.constant 0 : i32
    %c0_i32_1 = arith.constant 0 : i32
    return %c0_i32, %c0_i32_0 : i32, i32
  }
  func.func @transform_3(%arg0: i32) -> (i32, i32, i32) {
    %c0_i32 = arith.constant 0 : i32
    %c0_i32_0 = arith.constant 0 : i32
    %c0_i32_1 = arith.constant 0 : i32
    return %arg0, %c0_i32, %c0_i32_0 : i32, i32, i32
  }
  func.func @transform_4(%arg0: i32) -> (i32, i32) {
    %c0_i32 = arith.constant 0 : i32
    %c0_i32_0 = arith.constant 0 : i32
    %c0_i32_1 = arith.constant 0 : i32
    return %c0_i32, %c0_i32_0 : i32, i32
  }
}

module attributes {stable_mosaic.version = 11 : i64} {
  func.func @_bn_relu_pool_kernel(%arg0: i32, %arg1: memref<4x10x160xf32, #tpu.memory_space<vmem>>, %arg2: memref<2x160xf32, #tpu.memory_space<vmem>>, %arg3: memref<5x10xbf16, #tpu.memory_space<vmem>>, %arg4: memref<5x10xbf16, #tpu.memory_space<vmem>>, %arg5: memref<160x80xbf16, #tpu.memory_space<vmem>>, %arg6: memref<160x80xbf16, #tpu.memory_space<vmem>>, %arg7: memref<4x5x80xf32, #tpu.memory_space<vmem>>) attributes {dimension_semantics = [#tpu.dimension_semantics<parallel>], iteration_bounds = array<i64: 1>, scalar_prefetch = 0 : i64, scratch_operands = 0 : i64, tpu.core_type = #tpu.core_type<tc>, window_params = [{transform_indices = @transform_0, window_bounds = array<i64: 4, 10, 160>}, {pipeline_mode = #tpu.pipeline_mode<synchronous>, transform_indices = @transform_1, window_bounds = array<i64: 2, 160>}, {pipeline_mode = #tpu.pipeline_mode<synchronous>, transform_indices = @transform_2, window_bounds = array<i64: 5, 10>}, {pipeline_mode = #tpu.pipeline_mode<synchronous>, transform_indices = @transform_3, window_bounds = array<i64: 5, 10>}, {pipeline_mode = #tpu.pipeline_mode<synchronous>, transform_indices = @transform_4, window_bounds = array<i64: 160, 80>}, {pipeline_mode = #tpu.pipeline_mode<synchronous>, transform_indices = @transform_5, window_bounds = array<i64: 160, 80>}, {transform_indices = @transform_6, window_bounds = array<i64: 4, 5, 80>}]} {
    %c0 = arith.constant 0 : index
    %c0_0 = arith.constant 0 : index
    %0 = vector.load %arg2[%c0, %c0_0] : memref<2x160xf32, #tpu.memory_space<vmem>>, vector<2x160xf32>
    %1 = vector.extract_strided_slice %0 {offsets = [0, 0], sizes = [1, 160], strides = [1, 1]} : vector<2x160xf32> to vector<1x160xf32>
    %2 = vector.extract_strided_slice %0 {offsets = [1, 0], sizes = [1, 160], strides = [1, 1]} : vector<2x160xf32> to vector<1x160xf32>
    %c0_1 = arith.constant 0 : index
    %c0_2 = arith.constant 0 : index
    %3 = vector.load %arg3[%c0_1, %c0_2] : memref<5x10xbf16, #tpu.memory_space<vmem>>, vector<5x10xbf16>
    %c0_3 = arith.constant 0 : index
    %c0_4 = arith.constant 0 : index
    %4 = vector.load %arg4[%c0_3, %c0_4] : memref<5x10xbf16, #tpu.memory_space<vmem>>, vector<5x10xbf16>
    %c0_5 = arith.constant 0 : index
    %c0_6 = arith.constant 0 : index
    %5 = vector.load %arg5[%c0_5, %c0_6] : memref<160x80xbf16, #tpu.memory_space<vmem>>, vector<160x80xbf16>
    %c0_7 = arith.constant 0 : index
    %c0_8 = arith.constant 0 : index
    %6 = vector.load %arg6[%c0_7, %c0_8] : memref<160x80xbf16, #tpu.memory_space<vmem>>, vector<160x80xbf16>
    %c0_i32 = arith.constant 0 : i32
    %c4_i32 = arith.constant 4 : i32
    %7 = arith.addi %c0_i32, %c4_i32 : i32
    %c1_i32 = arith.constant 1 : i32
    scf.for %arg8 = %c0_i32 to %7 step %c1_i32  : i32 {
      %8 = arith.index_cast %arg8 : i32 to index
      %c0_10 = arith.constant 0 : index
      %c0_11 = arith.constant 0 : index
      %9 = vector.load %arg1[%8, %c0_10, %c0_11] : memref<4x10x160xf32, #tpu.memory_space<vmem>>, vector<1x10x160xf32>
      %10 = vector.shape_cast %9 : vector<1x10x160xf32> to vector<10x160xf32>
      %11 = vector.broadcast %1 : vector<1x160xf32> to vector<10x160xf32>
      %12 = arith.mulf %10, %11 : vector<10x160xf32>
      %13 = vector.broadcast %2 : vector<1x160xf32> to vector<10x160xf32>
      %14 = arith.addf %12, %13 : vector<10x160xf32>
      %cst = arith.constant 0.000000e+00 : f32
      %15 = vector.broadcast %cst : f32 to vector<10x160xf32>
      %16 = arith.maximumf %14, %15 : vector<10x160xf32>
      %17 = arith.truncf %16 : vector<10x160xf32> to vector<10x160xbf16>
      %cst_12 = arith.constant dense<0.000000e+00> : vector<5x160xf32>
      %18 = tpu.matmul %3, %17, %cst_12 {dimension_numbers = #tpu.dot_dimension_numbers<[1], [0], [0], [1], [0, 0, 1, 1], [], []>} : vector<5x10xbf16>, vector<10x160xbf16>, vector<5x160xf32> -> vector<5x160xf32>
      %cst_13 = arith.constant dense<0.000000e+00> : vector<5x160xf32>
      %19 = tpu.matmul %4, %17, %cst_13 {dimension_numbers = #tpu.dot_dimension_numbers<[1], [0], [0], [1], [0, 0, 1, 1], [], []>} : vector<5x10xbf16>, vector<10x160xbf16>, vector<5x160xf32> -> vector<5x160xf32>
      %20 = arith.maximumf %18, %19 : vector<5x160xf32>
      %21 = arith.truncf %20 : vector<5x160xf32> to vector<5x160xbf16>
      %cst_14 = arith.constant dense<0.000000e+00> : vector<5x80xf32>
      %22 = tpu.matmul %21, %5, %cst_14 {dimension_numbers = #tpu.dot_dimension_numbers<[1], [0], [0], [1], [0, 0, 1, 1], [], []>} : vector<5x160xbf16>, vector<160x80xbf16>, vector<5x80xf32> -> vector<5x80xf32>
      %cst_15 = arith.constant dense<0.000000e+00> : vector<5x80xf32>
      %23 = tpu.matmul %21, %6, %cst_15 {dimension_numbers = #tpu.dot_dimension_numbers<[1], [0], [0], [1], [0, 0, 1, 1], [], []>} : vector<5x160xbf16>, vector<160x80xbf16>, vector<5x80xf32> -> vector<5x80xf32>
      %24 = arith.maximumf %22, %23 : vector<5x80xf32>
      %25 = arith.index_cast %arg8 : i32 to index
      %c0_16 = arith.constant 0 : index
      %c0_17 = arith.constant 0 : index
      %26 = vector.load %arg7[%25, %c0_16, %c0_17] : memref<4x5x80xf32, #tpu.memory_space<vmem>>, vector<1x5x80xf32>
      %27 = vector.shape_cast %26 : vector<1x5x80xf32> to vector<5x80xf32>
      %28 = vector.shape_cast %24 : vector<5x80xf32> to vector<1x5x80xf32>
      tpu.vector_store %arg7[%25, %c0_16, %c0_17], %28 {strides = array<i32>} : memref<4x5x80xf32, #tpu.memory_space<vmem>>, vector<1x5x80xf32>,
    }
    %c4_i32_9 = arith.constant 4 : i32
    return
  }
  func.func @transform_0(%arg0: i32) -> (i32, i32, i32) {
    %c0_i32 = arith.constant 0 : i32
    %c0_i32_0 = arith.constant 0 : i32
    %c0_i32_1 = arith.constant 0 : i32
    return %arg0, %c0_i32, %c0_i32_0 : i32, i32, i32
  }
  func.func @transform_1(%arg0: i32) -> (i32, i32) {
    %c0_i32 = arith.constant 0 : i32
    %c0_i32_0 = arith.constant 0 : i32
    %c0_i32_1 = arith.constant 0 : i32
    return %c0_i32, %c0_i32_0 : i32, i32
  }
  func.func @transform_2(%arg0: i32) -> (i32, i32) {
    %c0_i32 = arith.constant 0 : i32
    %c0_i32_0 = arith.constant 0 : i32
    %c0_i32_1 = arith.constant 0 : i32
    return %c0_i32, %c0_i32_0 : i32, i32
  }
  func.func @transform_3(%arg0: i32) -> (i32, i32) {
    %c0_i32 = arith.constant 0 : i32
    %c0_i32_0 = arith.constant 0 : i32
    %c0_i32_1 = arith.constant 0 : i32
    return %c0_i32, %c0_i32_0 : i32, i32
  }
  func.func @transform_4(%arg0: i32) -> (i32, i32) {
    %c0_i32 = arith.constant 0 : i32
    %c0_i32_0 = arith.constant 0 : i32
    %c0_i32_1 = arith.constant 0 : i32
    return %c0_i32, %c0_i32_0 : i32, i32
  }
  func.func @transform_5(%arg0: i32) -> (i32, i32) {
    %c0_i32 = arith.constant 0 : i32
    %c0_i32_0 = arith.constant 0 : i32
    %c0_i32_1 = arith.constant 0 : i32
    return %c0_i32, %c0_i32_0 : i32, i32
  }
  func.func @transform_6(%arg0: i32) -> (i32, i32, i32) {
    %c0_i32 = arith.constant 0 : i32
    %c0_i32_0 = arith.constant 0 : i32
    %c0_i32_1 = arith.constant 0 : i32
    return %arg0, %c0_i32, %c0_i32_0 : i32, i32, i32
  }
}

module attributes {stable_mosaic.version = 11 : i64} {
  func.func @_fc_head_kernel(%arg0: i32, %arg1: memref<4x400xf32, #tpu.memory_space<vmem>>, %arg2: memref<400x128xbf16, #tpu.memory_space<vmem>>, %arg3: memref<1x128xf32, #tpu.memory_space<vmem>>, %arg4: memref<1x128xf32, #tpu.memory_space<vmem>>, %arg5: memref<1x128xf32, #tpu.memory_space<vmem>>, %arg6: memref<128x128xbf16, #tpu.memory_space<vmem>>, %arg7: memref<1x128xf32, #tpu.memory_space<vmem>>, %arg8: memref<1x128xf32, #tpu.memory_space<vmem>>, %arg9: memref<1x128xf32, #tpu.memory_space<vmem>>, %arg10: memref<128x128xbf16, #tpu.memory_space<vmem>>, %arg11: memref<1x128xf32, #tpu.memory_space<vmem>>, %arg12: memref<4x128xf32, #tpu.memory_space<vmem>>) attributes {dimension_semantics = [#tpu.dimension_semantics<arbitrary>], iteration_bounds = array<i64: 1>, scalar_prefetch = 0 : i64, scratch_operands = 0 : i64, tpu.core_type = #tpu.core_type<tc>, window_params = [{pipeline_mode = #tpu.pipeline_mode<synchronous>, transform_indices = @transform_0, window_bounds = array<i64: 4, 400>}, {pipeline_mode = #tpu.pipeline_mode<synchronous>, transform_indices = @transform_1, window_bounds = array<i64: 400, 128>}, {pipeline_mode = #tpu.pipeline_mode<synchronous>, transform_indices = @transform_2, window_bounds = array<i64: 1, 128>}, {pipeline_mode = #tpu.pipeline_mode<synchronous>, transform_indices = @transform_3, window_bounds = array<i64: 1, 128>}, {pipeline_mode = #tpu.pipeline_mode<synchronous>, transform_indices = @transform_4, window_bounds = array<i64: 1, 128>}, {pipeline_mode = #tpu.pipeline_mode<synchronous>, transform_indices = @transform_5, window_bounds = array<i64: 128, 128>}, {pipeline_mode = #tpu.pipeline_mode<synchronous>, transform_indices = @transform_6, window_bounds = array<i64: 1, 128>}, {pipeline_mode = #tpu.pipeline_mode<synchronous>, transform_indices = @transform_7, window_bounds = array<i64: 1, 128>}, {pipeline_mode = #tpu.pipeline_mode<synchronous>, transform_indices = @transform_8, window_bounds = array<i64: 1, 128>}, {pipeline_mode = #tpu.pipeline_mode<synchronous>, transform_indices = @transform_9, window_bounds = array<i64: 128, 128>}, {pipeline_mode = #tpu.pipeline_mode<synchronous>, transform_indices = @transform_10, window_bounds = array<i64: 1, 128>}, {pipeline_mode = #tpu.pipeline_mode<synchronous>, transform_indices = @transform_11, window_bounds = array<i64: 4, 128>}]} {
    %c0 = arith.constant 0 : index
    %c0_0 = arith.constant 0 : index
    %0 = vector.load %arg1[%c0, %c0_0] : memref<4x400xf32, #tpu.memory_space<vmem>>, vector<4x400xf32>
    %1 = arith.truncf %0 : vector<4x400xf32> to vector<4x400xbf16>
    %c0_1 = arith.constant 0 : index
    %c0_2 = arith.constant 0 : index
    %2 = vector.load %arg2[%c0_1, %c0_2] : memref<400x128xbf16, #tpu.memory_space<vmem>>, vector<400x128xbf16>
    %cst = arith.constant dense<0.000000e+00> : vector<4x128xf32>
    %3 = tpu.matmul %1, %2, %cst {dimension_numbers = #tpu.dot_dimension_numbers<[1], [0], [0], [1], [0, 0, 1, 1], [], []>} : vector<4x400xbf16>, vector<400x128xbf16>, vector<4x128xf32> -> vector<4x128xf32>
    %c0_3 = arith.constant 0 : index
    %c0_4 = arith.constant 0 : index
    %4 = vector.load %arg3[%c0_3, %c0_4] : memref<1x128xf32, #tpu.memory_space<vmem>>, vector<1x128xf32>
    %5 = vector.broadcast %4 : vector<1x128xf32> to vector<4x128xf32>
    %6 = arith.addf %3, %5 : vector<4x128xf32>
    %c0_5 = arith.constant 0 : index
    %c0_6 = arith.constant 0 : index
    %7 = vector.load %arg4[%c0_5, %c0_6] : memref<1x128xf32, #tpu.memory_space<vmem>>, vector<1x128xf32>
    %c0_7 = arith.constant 0 : index
    %c0_8 = arith.constant 0 : index
    %8 = vector.load %arg5[%c0_7, %c0_8] : memref<1x128xf32, #tpu.memory_space<vmem>>, vector<1x128xf32>
    %cst_9 = arith.constant dense<0.000000e+00> : vector<128xf32>
    %9 = vector.multi_reduction <add>, %6, %cst_9 [0] : vector<4x128xf32> to vector<128xf32>
    %10 = vector.shape_cast %9 : vector<128xf32> to vector<1x128xf32>
    %cst_10 = arith.constant 4.000000e+00 : f32
    %11 = vector.broadcast %cst_10 : f32 to vector<1x128xf32>
    %12 = arith.divf %10, %11 : vector<1x128xf32>
    %13 = arith.mulf %6, %6 : vector<4x128xf32>
    %cst_11 = arith.constant dense<0.000000e+00> : vector<128xf32>
    %14 = vector.multi_reduction <add>, %13, %cst_11 [0] : vector<4x128xf32> to vector<128xf32>
    %15 = vector.shape_cast %14 : vector<128xf32> to vector<1x128xf32>
    %cst_12 = arith.constant 4.000000e+00 : f32
    %16 = vector.broadcast %cst_12 : f32 to vector<1x128xf32>
    %17 = arith.divf %15, %16 : vector<1x128xf32>
    %18 = arith.mulf %12, %12 : vector<1x128xf32>
    %19 = arith.subf %17, %18 : vector<1x128xf32>
    %cst_13 = arith.constant 0.000000e+00 : f32
    %20 = vector.broadcast %cst_13 : f32 to vector<1x128xf32>
    %21 = arith.maximumf %19, %20 : vector<1x128xf32>
    %22 = vector.broadcast %12 : vector<1x128xf32> to vector<4x128xf32>
    %23 = arith.subf %6, %22 : vector<4x128xf32>
    %cst_14 = arith.constant 9.99999974E-6 : f32
    %24 = vector.broadcast %cst_14 : f32 to vector<1x128xf32>
    %25 = arith.addf %21, %24 : vector<1x128xf32>
    %26 = math.rsqrt %25 : vector<1x128xf32>
    %27 = vector.broadcast %26 : vector<1x128xf32> to vector<4x128xf32>
    %28 = arith.mulf %23, %27 : vector<4x128xf32>
    %29 = vector.broadcast %7 : vector<1x128xf32> to vector<4x128xf32>
    %30 = arith.mulf %28, %29 : vector<4x128xf32>
    %31 = vector.broadcast %8 : vector<1x128xf32> to vector<4x128xf32>
    %32 = arith.addf %30, %31 : vector<4x128xf32>
    %cst_15 = arith.constant 0.000000e+00 : f32
    %33 = vector.broadcast %cst_15 : f32 to vector<4x128xf32>
    %34 = arith.maximumf %32, %33 : vector<4x128xf32>
    %35 = arith.truncf %34 : vector<4x128xf32> to vector<4x128xbf16>
    %c0_16 = arith.constant 0 : index
    %c0_17 = arith.constant 0 : index
    %36 = vector.load %arg6[%c0_16, %c0_17] : memref<128x128xbf16, #tpu.memory_space<vmem>>, vector<128x128xbf16>
    %cst_18 = arith.constant dense<0.000000e+00> : vector<4x128xf32>
    %37 = tpu.matmul %35, %36, %cst_18 {dimension_numbers = #tpu.dot_dimension_numbers<[1], [0], [0], [1], [0, 0, 1, 1], [], []>} : vector<4x128xbf16>, vector<128x128xbf16>, vector<4x128xf32> -> vector<4x128xf32>
    %c0_19 = arith.constant 0 : index
    %c0_20 = arith.constant 0 : index
    %38 = vector.load %arg7[%c0_19, %c0_20] : memref<1x128xf32, #tpu.memory_space<vmem>>, vector<1x128xf32>
    %39 = vector.broadcast %38 : vector<1x128xf32> to vector<4x128xf32>
    %40 = arith.addf %37, %39 : vector<4x128xf32>
    %c0_21 = arith.constant 0 : index
    %c0_22 = arith.constant 0 : index
    %41 = vector.load %arg8[%c0_21, %c0_22] : memref<1x128xf32, #tpu.memory_space<vmem>>, vector<1x128xf32>
    %c0_23 = arith.constant 0 : index
    %c0_24 = arith.constant 0 : index
    %42 = vector.load %arg9[%c0_23, %c0_24] : memref<1x128xf32, #tpu.memory_space<vmem>>, vector<1x128xf32>
    %cst_25 = arith.constant dense<0.000000e+00> : vector<128xf32>
    %43 = vector.multi_reduction <add>, %40, %cst_25 [0] : vector<4x128xf32> to vector<128xf32>
    %44 = vector.shape_cast %43 : vector<128xf32> to vector<1x128xf32>
    %cst_26 = arith.constant 4.000000e+00 : f32
    %45 = vector.broadcast %cst_26 : f32 to vector<1x128xf32>
    %46 = arith.divf %44, %45 : vector<1x128xf32>
    %47 = arith.mulf %40, %40 : vector<4x128xf32>
    %cst_27 = arith.constant dense<0.000000e+00> : vector<128xf32>
    %48 = vector.multi_reduction <add>, %47, %cst_27 [0] : vector<4x128xf32> to vector<128xf32>
    %49 = vector.shape_cast %48 : vector<128xf32> to vector<1x128xf32>
    %cst_28 = arith.constant 4.000000e+00 : f32
    %50 = vector.broadcast %cst_28 : f32 to vector<1x128xf32>
    %51 = arith.divf %49, %50 : vector<1x128xf32>
    %52 = arith.mulf %46, %46 : vector<1x128xf32>
    %53 = arith.subf %51, %52 : vector<1x128xf32>
    %cst_29 = arith.constant 0.000000e+00 : f32
    %54 = vector.broadcast %cst_29 : f32 to vector<1x128xf32>
    %55 = arith.maximumf %53, %54 : vector<1x128xf32>
    %56 = vector.broadcast %46 : vector<1x128xf32> to vector<4x128xf32>
    %57 = arith.subf %40, %56 : vector<4x128xf32>
    %cst_30 = arith.constant 9.99999974E-6 : f32
    %58 = vector.broadcast %cst_30 : f32 to vector<1x128xf32>
    %59 = arith.addf %55, %58 : vector<1x128xf32>
    %60 = math.rsqrt %59 : vector<1x128xf32>
    %61 = vector.broadcast %60 : vector<1x128xf32> to vector<4x128xf32>
    %62 = arith.mulf %57, %61 : vector<4x128xf32>
    %63 = vector.broadcast %41 : vector<1x128xf32> to vector<4x128xf32>
    %64 = arith.mulf %62, %63 : vector<4x128xf32>
    %65 = vector.broadcast %42 : vector<1x128xf32> to vector<4x128xf32>
    %66 = arith.addf %64, %65 : vector<4x128xf32>
    %cst_31 = arith.constant 0.000000e+00 : f32
    %67 = vector.broadcast %cst_31 : f32 to vector<4x128xf32>
    %68 = arith.maximumf %66, %67 : vector<4x128xf32>
    %69 = arith.truncf %68 : vector<4x128xf32> to vector<4x128xbf16>
    %c0_32 = arith.constant 0 : index
    %c0_33 = arith.constant 0 : index
    %70 = vector.load %arg10[%c0_32, %c0_33] : memref<128x128xbf16, #tpu.memory_space<vmem>>, vector<128x128xbf16>
    %cst_34 = arith.constant dense<0.000000e+00> : vector<4x128xf32>
    %71 = tpu.matmul %69, %70, %cst_34 {dimension_numbers = #tpu.dot_dimension_numbers<[1], [0], [0], [1], [0, 0, 1, 1], [], []>} : vector<4x128xbf16>, vector<128x128xbf16>, vector<4x128xf32> -> vector<4x128xf32>
    %c0_35 = arith.constant 0 : index
    %c0_36 = arith.constant 0 : index
    %72 = vector.load %arg11[%c0_35, %c0_36] : memref<1x128xf32, #tpu.memory_space<vmem>>, vector<1x128xf32>
    %73 = vector.broadcast %72 : vector<1x128xf32> to vector<4x128xf32>
    %74 = arith.addf %71, %73 : vector<4x128xf32>
    %c0_37 = arith.constant 0 : index
    %c0_38 = arith.constant 0 : index
    %75 = vector.load %arg12[%c0_37, %c0_38] : memref<4x128xf32, #tpu.memory_space<vmem>>, vector<4x128xf32>
    tpu.vector_store %arg12[%c0_37, %c0_38], %74 {strides = array<i32>} : memref<4x128xf32, #tpu.memory_space<vmem>>, vector<4x128xf32>,
    return
  }
  func.func @transform_0(%arg0: i32) -> (i32, i32) {
    %c0_i32 = arith.constant 0 : i32
    %c0_i32_0 = arith.constant 0 : i32
    %c0_i32_1 = arith.constant 0 : i32
    return %c0_i32, %c0_i32_0 : i32, i32
  }
  func.func @transform_1(%arg0: i32) -> (i32, i32) {
    %c0_i32 = arith.constant 0 : i32
    %c0_i32_0 = arith.constant 0 : i32
    %c0_i32_1 = arith.constant 0 : i32
    return %c0_i32, %c0_i32_0 : i32, i32
  }
  func.func @transform_2(%arg0: i32) -> (i32, i32) {
    %c0_i32 = arith.constant 0 : i32
    %c0_i32_0 = arith.constant 0 : i32
    %c0_i32_1 = arith.constant 0 : i32
    return %c0_i32, %c0_i32_0 : i32, i32
  }
  func.func @transform_3(%arg0: i32) -> (i32, i32) {
    %c0_i32 = arith.constant 0 : i32
    %c0_i32_0 = arith.constant 0 : i32
    %c0_i32_1 = arith.constant 0 : i32
    return %c0_i32, %c0_i32_0 : i32, i32
  }
  func.func @transform_4(%arg0: i32) -> (i32, i32) {
    %c0_i32 = arith.constant 0 : i32
    %c0_i32_0 = arith.constant 0 : i32
    %c0_i32_1 = arith.constant 0 : i32
    return %c0_i32, %c0_i32_0 : i32, i32
  }
  func.func @transform_5(%arg0: i32) -> (i32, i32) {
    %c0_i32 = arith.constant 0 : i32
    %c0_i32_0 = arith.constant 0 : i32
    %c0_i32_1 = arith.constant 0 : i32
    return %c0_i32, %c0_i32_0 : i32, i32
  }
  func.func @transform_6(%arg0: i32) -> (i32, i32) {
    %c0_i32 = arith.constant 0 : i32
    %c0_i32_0 = arith.constant 0 : i32
    %c0_i32_1 = arith.constant 0 : i32
    return %c0_i32, %c0_i32_0 : i32, i32
  }
  func.func @transform_7(%arg0: i32) -> (i32, i32) {
    %c0_i32 = arith.constant 0 : i32
    %c0_i32_0 = arith.constant 0 : i32
    %c0_i32_1 = arith.constant 0 : i32
    return %c0_i32, %c0_i32_0 : i32, i32
  }
  func.func @transform_8(%arg0: i32) -> (i32, i32) {
    %c0_i32 = arith.constant 0 : i32
    %c0_i32_0 = arith.constant 0 : i32
    %c0_i32_1 = arith.constant 0 : i32
    return %c0_i32, %c0_i32_0 : i32, i32
  }
  func.func @transform_9(%arg0: i32) -> (i32, i32) {
    %c0_i32 = arith.constant 0 : i32
    %c0_i32_0 = arith.constant 0 : i32
    %c0_i32_1 = arith.constant 0 : i32
    return %c0_i32, %c0_i32_0 : i32, i32
  }
  func.func @transform_10(%arg0: i32) -> (i32, i32) {
    %c0_i32 = arith.constant 0 : i32
    %c0_i32_0 = arith.constant 0 : i32
    %c0_i32_1 = arith.constant 0 : i32
    return %c0_i32, %c0_i32_0 : i32, i32
  }
  func.func @transform_11(%arg0: i32) -> (i32, i32) {
    %c0_i32 = arith.constant 0 : i32
    %c0_i32_0 = arith.constant 0 : i32
    %c0_i32_1 = arith.constant 0 : i32
    return %c0_i32, %c0_i32_0 : i32, i32
  }
}

</mosaic_0001>

<bundles_post_ra>
// kernel: tile.23
= control target key start
LH: loop header
LB: loop body
LE: loop exit
PB: predicated region body
PF: predicated region fallthrough
CT: control target
= control target key end

     0   :  { %s40_s0 = inlined_call_operand.vmem [shape: f32[6], index: 0, kind: input, shape index: {}]   ;;  %s41_s1 = inlined_call_operand.vmem [shape: f32[28,6], index: 1, kind: output, shape index: {}]  }
   0x1   :  { %v4_v0 = vld [vmem:[%s40_s0] ss:$0 sm:$0xff] }
   0x2   :  { %5 = vst [vmem:[%s41_s1] sm:$0xff] %v4_v0 }
   0x3   :  { %12 = vst [vmem:[%s41_s1 + $0x8] sm:$0xff] %v4_v0 }
   0x4   :  { %13 = vst [vmem:[%s41_s1 + $0x10] sm:$0xff] %v4_v0 }
   0x5   :  { %14 = vst [vmem:[%s41_s1 + $0x18] sm:$0xff] %v4_v0 }

// kernel: tile.28
= control target key start
LH: loop header
LB: loop body
LE: loop exit
PB: predicated region body
PF: predicated region fallthrough
CT: control target
= control target key end

     0   :  { %vm9_vm0 = vcmask 15360   ;;  %s248_s12 = smov 126   ;;  %s249_s13 = smov 114   ;;  %vm3_vm1 = vcmask 48128   ;;  %vm13_vm2 = vcmask 31744   ;;  %vm16_vm3 = vcmask 1048560   ;;  %s378_s0 = inlined_call_operand.vmem [shape: f32[28,6], index: 0, kind: input, shape index: {}]   ;;  %s379_s1 = inlined_call_operand.vmem [shape: f32[1,168], index: 1, kind: output, shape index: {}]  }
   0x1   :  { %v192_v0 = vld [vmem:[%s378_s0 + $0x15] sm:$0x1]   ;;  %v195_v3 = vld [vmem:[%s378_s0 + $0x13] sm:$0x1]   ;;  %v197_v4 = vld [vmem:[%s378_s0 + $0x11] sm:$0x1]  }
   0x2   :  { %v193_v1 = vld [vmem:[%s378_s0 + $0x15] sm:$0x1]   ;;  %26 = vrot.lane.b32.xlu1 %v195_v3, %s249_s13  ;;  %s250_s16 = smov 102   ;;  %v194_v5 = vld [vmem:[%s378_s0 + $0x14] sm:$0x1]   ;;  %s251_s21 = smov 120  }
   0x3   :  { %v10_v2 = vsel %vm9_vm0, %v193_v1, %v192_v0  ;;  %38 = vrot.lane.b32.xlu2 %v197_v4, %s250_s16  ;;  %v196_v6 = vld [vmem:[%s378_s0 + $0x12] sm:$0x1]   ;;  %s252_s22 = smov 108   ;;  %v198_v7 = vld [vmem:[%s378_s0 + $0x10] sm:$0x1]   ;;  %s253_s25 = smov 96  }
   0x4   :  { %11 = vrot.lane.b32.xlu0 %v10_v2, %s248_s12  ;;  %v199_v8 = vld [vmem:[%s378_s0 + $0xf] sm:$0x1]   ;;  %v200_v9 = vld [vmem:[%s378_s0 + $0xe] sm:$0x1]   ;;  %s254_s30 = smov 90   ;;  %s255_s2 = smov 84  }
   0x5   :  { %v201_v10 = vld [vmem:[%s378_s0 + $0xd] sm:$0x1]   ;;  %s256_s5 = smov 78   ;;  %v202_v11 = vld [vmem:[%s378_s0 + $0xc] sm:$0x1]   ;;  %s257_s10 = smov 72  }
   0x6   :  { %v203_v12 = vld [vmem:[%s378_s0 + $0xb] sm:$0x1]   ;;  %s258_s11 = smov 66   ;;  %v204_v13 = vld [vmem:[%s378_s0 + $0xa] sm:$0x1]   ;;  %s259_s14 = smov 60  }
   0x7   :  { %v205_v14 = vld [vmem:[%s378_s0 + $0x9] sm:$0x1]   ;;  %v206_v15 = vld [vmem:[%s378_s0 + $0x8] sm:$0x1]   ;;  %s260_s19 = smov 54   ;;  %s261_s20 = smov 48  }
   0x8   :  { %v207_v16 = vld [vmem:[%s378_s0 + $0x7] sm:$0x1]   ;;  %s262_s23 = smov 42   ;;  %v208_v17 = vld [vmem:[%s378_s0 + $0x6] sm:$0x1]   ;;  %s263_s28 = smov 36  }
   0x9   :  { %v209_v18 = vld [vmem:[%s378_s0 + $0x1b] sm:$0x1]   ;;  %s264_s29 = smov 34   ;;  %v210_v19 = vld [vmem:[%s378_s0 + $0x5] sm:$0x1]   ;;  %s265_s3 = smov 30  }
   0xa   :  { %32 = vrot.lane.b32.xlu1 %v196_v6, %s252_s22  ;;  %v211_v20 = vld [vmem:[%s378_s0 + $0x1a] sm:$0x1]   ;;  %v212_v21 = vld [vmem:[%s378_s0 + $0x4] sm:$0x1]   ;;  %s266_s8 = smov 28   ;;  %s267_s9 = smov 24  }
   0xb   :  { %44 = vrot.lane.b32.xlu2 %v198_v7, %s253_s25  ;;  %v213_v22 = vld [vmem:[%s378_s0 + $0x19] sm:$0x1]   ;;  %s268_s12 = smov 22   ;;  %v214_v23 = vld [vmem:[%s378_s0 + $0x3] sm:$0x1]   ;;  %s269_s17 = smov 18  }
   0xc   :  { %20 = vrot.lane.b32.xlu0 %v194_v5, %s251_s21  ;;  %v215_v24 = vld [vmem:[%s378_s0 + $0x18] sm:$0x1]   ;;  %s270_s18 = smov 16   ;;  %v216_v25 = vld [vmem:[%s378_s0 + $0x2] sm:$0x1]   ;;  %s271_s21 = smov 12  }
   0xd   :  { %v217_v26 = vld [vmem:[%s378_s0 + $0x17] sm:$0x1]   ;;  %v218_v27 = vld [vmem:[%s378_s0 + $0x1] sm:$0x1]   ;;  %s272_s26 = smov 10   ;;  %s273_s27 = smov 6  }
   0xe   :  { %v219_v28 = vld [vmem:[%s378_s0 + $0x16] sm:$0x1]   ;;  %v2_v29 = vld [vmem:[%s378_s0] sm:$0x1]   ;;  %vm22_vm4 = vcmask 1032128   ;;  %vm28_vm5 = vcmask 982928  }
   0xf   :  { %4 = vst.msk [vmem:[#allocation0] sm:$0x1] %vm3_vm1, %v2_v29   ;;  %vm34_vm6 = vcmask 933728   ;;  %vm40_vm7 = vcmask 884528   ;;  %vm46_vm8 = vcmask 835328   ;;  %vm52_vm9 = vcmask 786128  }
  0x10   :  { %vm58_vm10 = vcmask 736928   ;;  %vm64_vm11 = vcmask 687728   ;;  %vm70_vm12 = vcmask 638528   ;;  %vm76_vm13 = vcmask 589328  }
  0x11   :  { %vm82_vm14 = vcmask 540128   ;;  %vm88_vm15 = vcmask 490928   ;;  %vm94_vm0 = vcmask 441728   ;;  %vm100_vm1 = vcmask 392528  }
  0x12   :  { %56 = vrot.lane.b32.xlu1 %v200_v9, %s255_s2 }
  0x13   :  { %62 = vrot.lane.b32.xlu2 %v201_v10, %s256_s5 }
  0x14   :  { %50 = vrot.lane.b32.xlu0 %v199_v8, %s254_s30  ;;  %s274_s30 = smov 4  }
  0x1a   :  { %74 = vrot.lane.b32.xlu1 %v203_v12, %s258_s11 }
  0x1b   :  { %80 = vrot.lane.b32.xlu2 %v204_v13, %s259_s14 }
  0x1c   :  { %68 = vrot.lane.b32.xlu0 %v202_v11, %s257_s10 }
  0x22   :  { %92 = vrot.lane.b32.xlu1 %v206_v15, %s261_s20 }
  0x23   :  { %98 = vrot.lane.b32.xlu2 %v207_v16, %s262_s23 }
  0x24   :  { %86 = vrot.lane.b32.xlu0 %v205_v14, %s260_s19 }
  0x2a   :  { %110 = vrot.lane.b32.xlu1 %v209_v18, %s264_s29 }
  0x2b   :  { %117 = vrot.lane.b32.xlu2 %v210_v19, %s265_s3 }
  0x2c   :  { %104 = vrot.lane.b32.xlu0 %v208_v17, %s263_s28 }
  0x32   :  { %130 = vrot.lane.b32.xlu1 %v212_v21, %s267_s9 }
  0x33   :  { %136 = vrot.lane.b32.xlu2 %v213_v22, %s268_s12 }
  0x34   :  { %123 = vrot.lane.b32.xlu0 %v211_v20, %s266_s8 }
  0x3a   :  { %149 = vrot.lane.b32.xlu1 %v215_v24, %s270_s18 }
  0x3b   :  { %156 = vrot.lane.b32.xlu2 %v216_v25, %s271_s21 }
  0x3c   :  { %143 = vrot.lane.b32.xlu0 %v214_v23, %s269_s17 }
  0x42   :  { %169 = vrot.lane.b32.xlu1 %v218_v27, %s273_s27 }
  0x43   :  { %175 = vrot.lane.b32.xlu2 %v219_v28, %s274_s30 }
  0x44   :  { %162 = vrot.lane.b32.xlu0 %v217_v26, %s272_s26 }
  0x5d   :  { %v39_v30 = vpop.permute.xlu2 %38  }
  0x65   :  { %v45_v31 = vpop.permute.xlu2 %44  }
  0x6d   :  { %v63_v32 = vpop.permute.xlu2 %62  }
  0x74   :  { %v27_v34 = vpop.permute.xlu1 %26  }
  0x75   :  { %v81_v35 = vpop.permute.xlu2 %80  }
  0x76   :  { %v12_v33 = vpop.permute.xlu0 %11  }
  0x77   :  { %15 = vst.msk [vmem:[#allocation0 + $0x8] sm:$0x1] %vm13_vm2, %v12_v33   ;;  %vm106_vm2 = vcmask 343328  }
  0x78   :  { %17 = vst.msk [vmem:[#allocation0] sm:$0x1] %vm16_vm3, %v12_v33   ;;  %vm119_vm3 = vcmask 294128  }
  0x7c   :  { %v33_v37 = vpop.permute.xlu1 %32  }
  0x7d   :  { %v99_v38 = vpop.permute.xlu2 %98  }
  0x7e   :  { %v21_v36 = vpop.permute.xlu0 %20  }
  0x7f   :  { %23 = vst.msk [vmem:[#allocation0] sm:$0x1] %vm22_vm4, %v21_v36   ;;  %vm112_vm4 = vcmask 326928  }
  0x80   :  { %29 = vst.msk [vmem:[#allocation0] sm:$0x1] %vm28_vm5, %v27_v34   ;;  %vm125_vm5 = vcmask 277728  }
  0x81   :  { %35 = vst.msk [vmem:[#allocation0] sm:$0x1] %vm34_vm6, %v33_v37   ;;  %vm138_vm6 = vcmask 228528  }
  0x82   :  { %41 = vst.msk [vmem:[#allocation0] sm:$0x1] %vm40_vm7, %v39_v30   ;;  %vm132_vm7 = vcmask 244928  }
  0x83   :  { %47 = vst.msk [vmem:[#allocation0] sm:$0x1] %vm46_vm8, %v45_v31   ;;  %vm145_vm8 = vcmask 195728  }
  0x84   :  { %v57_v40 = vpop.permute.xlu1 %56  }
  0x85   :  { %v118_v41 = vpop.permute.xlu2 %117  }
  0x86   :  { %v51_v39 = vpop.permute.xlu0 %50  }
  0x87   :  { %53 = vst.msk [vmem:[#allocation0] sm:$0x1] %vm52_vm9, %v51_v39   ;;  %vm158_vm9 = vcmask 146528  }
  0x88   :  { %59 = vst.msk [vmem:[#allocation0] sm:$0x1] %vm58_vm10, %v57_v40   ;;  %vm151_vm10 = vcmask 179328  }
  0x89   :  { %65 = vst.msk [vmem:[#allocation0] sm:$0x1] %vm64_vm11, %v63_v32   ;;  %vm164_vm11 = vcmask 130128  }
  0x8c   :  { %v75_v43 = vpop.permute.xlu1 %74  }
  0x8d   :  { %v137_v44 = vpop.permute.xlu2 %136  }
  0x8e   :  { %v69_v42 = vpop.permute.xlu0 %68  }
  0x8f   :  { %71 = vst.msk [vmem:[#allocation0] sm:$0x1] %vm70_vm12, %v69_v42   ;;  %vm177_vm12 = vcmask 80928  }
  0x90   :  { %77 = vst.msk [vmem:[#allocation0] sm:$0x1] %vm76_vm13, %v75_v43   ;;  %vm171_vm13 = vcmask 97328  }
  0x91   :  { %83 = vst.msk [vmem:[#allocation0] sm:$0x1] %vm82_vm14, %v81_v35  }
  0x94   :  { %v93_v46 = vpop.permute.xlu1 %92  }
  0x95   :  { %v157_v47 = vpop.permute.xlu2 %156  }
  0x96   :  { %v87_v45 = vpop.permute.xlu0 %86  }
  0x97   :  { %89 = vst.msk [vmem:[#allocation0] sm:$0x1] %vm88_vm15, %v87_v45  }
  0x98   :  { %95 = vst.msk [vmem:[#allocation0] sm:$0x1] %vm94_vm0, %v93_v46  }
  0x99   :  { %101 = vst.msk [vmem:[#allocation0] sm:$0x1] %vm100_vm1, %v99_v38  }
  0x9c   :  { %v111_v49 = vpop.permute.xlu1 %110  }
  0x9d   :  { %114 = vst.msk [vmem:[#allocation0 + $0x8] sm:$0x1] %vm112_vm4, %v111_v49   ;;  %v176_v50 = vpop.permute.xlu2 %175  }
  0x9e   :  { %v105_v48 = vpop.permute.xlu0 %104  }
  0x9f   :  { %107 = vst.msk [vmem:[#allocation0] sm:$0x1] %vm106_vm2, %v105_v48  }
  0xa0   :  { %120 = vst.msk [vmem:[#allocation0] sm:$0x1] %vm119_vm3, %v118_v41  }
  0xa4   :  { %v131_v52 = vpop.permute.xlu1 %130  }
  0xa5   :  { %133 = vst.msk [vmem:[#allocation0] sm:$0x1] %vm132_vm7, %v131_v52  }
  0xa6   :  { %v124_v51 = vpop.permute.xlu0 %123  }
  0xa7   :  { %127 = vst.msk [vmem:[#allocation0 + $0x8] sm:$0x1] %vm125_vm5, %v124_v51  }
  0xa8   :  { %140 = vst.msk [vmem:[#allocation0 + $0x8] sm:$0x1] %vm138_vm6, %v137_v44  }
  0xac   :  { %v150_v54 = vpop.permute.xlu1 %149  }
  0xad   :  { %153 = vst.msk [vmem:[#allocation0 + $0x8] sm:$0x1] %vm151_vm10, %v150_v54  }
  0xae   :  { %v144_v53 = vpop.permute.xlu0 %143  }
  0xaf   :  { %146 = vst.msk [vmem:[#allocation0] sm:$0x1] %vm145_vm8, %v144_v53  }
  0xb0   :  { %159 = vst.msk [vmem:[#allocation0] sm:$0x1] %vm158_vm9, %v157_v47  }
  0xb4   :  { %v170_v56 = vpop.permute.xlu1 %169  }
  0xb5   :  { %172 = vst.msk [vmem:[#allocation0] sm:$0x1] %vm171_vm13, %v170_v56  }
  0xb6   :  { %v163_v55 = vpop.permute.xlu0 %162  }
  0xb7   :  { %166 = vst.msk [vmem:[#allocation0 + $0x8] sm:$0x1] %vm164_vm11, %v163_v55  }
  0xb8   :  { %179 = vst.msk [vmem:[#allocation0 + $0x8] sm:$0x1] %vm177_vm12, %v176_v50  }
  0xbc   :  { %v182_v58 = vld [vmem:[#allocation0] sm:$0x1] }
  0xbd   :  { %185 = vst [vmem:[%s379_s1] sm:$0x1] %v182_v58 }
  0xbf   :  { %v187_v57 = vld [vmem:[#allocation0 + $0x8] sm:$0x1] }
  0xc0   :  { %220 = vst [vmem:[%s379_s1 + $0x1] sm:$0x1] %v187_v57 }

// kernel: lenet_batch_forward.5
= control target key start
LH: loop header
LB: loop body
LE: loop exit
PB: predicated region body
PF: predicated region fallthrough
CT: control target
= control target key end

     0   :  { %vm21_vm0 = vcmask 1041408   ;;  %vm22_vm1 = vcmask 322562   ;;  %v1280_v1 = vmov 0.0   ;;  %v1314_v2 = vmov 0.0   ;;  %s1322_s19 = smov 0   ;;  %s1814_s0 = inlined_call_operand.vmem [shape: f32[4,32,96], index: 0, kind: input, shape index: {}]   ;;  %s1815_s1 = inlined_call_operand.vmem [shape: bf16[5,96,168], index: 1, kind: input, shape index: {}]   ;;  %s1816_s2 = inlined_call_operand.vmem [shape: f32[1,168], index: 2, kind: input, shape index: {}]   ;;  %s1817_s3 = inlined_call_operand.vmem [shape: f32[4,28,168], index: 3, kind: output, shape index: {0}]   ;;  %s1818_s4 = inlined_call_operand.vmem [shape: f32[2,168], index: 4, kind: output, shape index: {1}]  }
   0x1   :  { %vm23_vm2 = vmor %vm22_vm1, %vm21_vm0  ;;  %v1309_v0 = vld [vmem:[%s1816_s2] sm:$0x3]  ;;  %v1316_v3 = vmov 0.0   ;;  %v1318_v4 = vmov 0.0   ;;  %v1320_v5 = vmov 0.0  }
   0x2   :  { %24 = vst.msk [vmem:[%s1818_s4] sm:$0xf] %vm23_vm2, %v1280_v1 }
   0x3 LB: > { %v868_v6 = vld [vmem:[%s1815_s1 + $0xb0] sm:$0xf]  ;;  %v1149_v7 = vld [vmem:[%s1815_s1 + $0xb4] sm:$0xf0]  ;;  %v1148_v8 = vld [vmem:[%s1815_s1 + $0xb4] sm:$0xf]  ;;  %s1278_s19 = sphi %s1322_s19, %s31_s19   ;;  %v1274_v5 = vphi %v1320_v5, %v1822_v5   ;;  %v1270_v4 = vphi %v1318_v4, %v1821_v4   ;;  %v1266_v3 = vphi %v1316_v3, %v1820_v3   ;;  %v1262_v2 = vphi %v1314_v2, %v1819_v2  }
   0x4   : > { %v869_v9 = vor.u32 %v1149_v7, %v868_v6  ;;  %v870_v10 = vld [vmem:[%s1815_s1 + $0xb8] sm:$0xf0]  ;;  %v920_v11 = vld [vmem:[%s1815_s1 + $0x50] sm:$0xf]  ;;  %v1137_v12 = vld [vmem:[%s1815_s1 + $0x54] sm:$0xf0] }
   0x5   : > { %v873_v13 = vor.u32 %v1148_v8, %v870_v10  ;;  %v921_v14 = vor.u32 %v1137_v12, %v920_v11  ;;  %v1136_v15 = vld [vmem:[%s1815_s1 + $0x54] sm:$0xf]  ;;  %v922_v16 = vld [vmem:[%s1815_s1 + $0x58] sm:$0xf0]  ;;  %v860_v17 = vld [vmem:[%s1815_s1 + $0xa0] sm:$0xf] }
   0x6   : > { %144 = vmatpush.bf16.msra.mxu0 %v869_v9  ;;  %v925_v18 = vor.u32 %v1136_v15, %v922_v16  ;;  %v1147_v19 = vld [vmem:[%s1815_s1 + $0xa4] sm:$0xf0]  ;;  %v1146_v20 = vld [vmem:[%s1815_s1 + $0xa4] sm:$0xf]  ;;  %v862_v21 = vld [vmem:[%s1815_s1 + $0xa8] sm:$0xf0] }
   0x7   : > { %163 = vmatpush.bf16.msra.mxu1 %v873_v13  ;;  %248 = vmatpush.bf16.msra.mxu2 %v921_v14  ;;  %v861_v22 = vor.u32 %v1147_v19, %v860_v17  ;;  %v865_v23 = vor.u32 %v1146_v20, %v862_v21  ;;  %v912_v24 = vld [vmem:[%s1815_s1 + $0x40] sm:$0xf]  ;;  %v1135_v25 = vld [vmem:[%s1815_s1 + $0x44] sm:$0xf0]  ;;  %v1134_v26 = vld [vmem:[%s1815_s1 + $0x44] sm:$0xf] }
   0x8   : > { %267 = vmatpush.bf16.msra.mxu3 %v925_v18  ;;  %v913_v27 = vor.u32 %v1135_v25, %v912_v24  ;;  %v914_v28 = vld [vmem:[%s1815_s1 + $0x48] sm:$0xf0]  ;;  %v852_v29 = vld [vmem:[%s1815_s1 + $0x90] sm:$0xf]  ;;  %v1145_v30 = vld [vmem:[%s1815_s1 + $0x94] sm:$0xf0] }
   0x9   : > { %v917_v31 = vor.u32 %v1134_v26, %v914_v28  ;;  %v1144_v32 = vld [vmem:[%s1815_s1 + $0x94] sm:$0xf]  ;;  %v854_v33 = vld [vmem:[%s1815_s1 + $0x98] sm:$0xf0]  ;;  %v904_v34 = vld [vmem:[%s1815_s1 + $0x30] sm:$0xf]  ;;  %v853_v35 = vor.u32 %v1145_v30, %v852_v29 }
   0xa   : > { %145 = vmatpush.bf16.msra.mxu0 %v861_v22  ;;  %v1133_v36 = vld [vmem:[%s1815_s1 + $0x34] sm:$0xf0]  ;;  %v1132_v37 = vld [vmem:[%s1815_s1 + $0x34] sm:$0xf]  ;;  %v906_v38 = vld [vmem:[%s1815_s1 + $0x38] sm:$0xf0]  ;;  %v857_v39 = vor.u32 %v1144_v32, %v854_v33 }
   0xb   : > { %164 = vmatpush.bf16.msra.mxu1 %v865_v23  ;;  %249 = vmatpush.bf16.msra.mxu2 %v913_v27  ;;  %v905_v40 = vor.u32 %v1133_v36, %v904_v34  ;;  %v844_v41 = vld [vmem:[%s1815_s1 + $0x80] sm:$0xf]  ;;  %v1143_v42 = vld [vmem:[%s1815_s1 + $0x84] sm:$0xf0]  ;;  %v1142_v43 = vld [vmem:[%s1815_s1 + $0x84] sm:$0xf]  ;;  %v909_v44 = vor.u32 %v1132_v37, %v906_v38 }
   0xc   : > { %268 = vmatpush.bf16.msra.mxu3 %v917_v31  ;;  %v846_v45 = vld [vmem:[%s1815_s1 + $0x88] sm:$0xf0]  ;;  %v896_v46 = vld [vmem:[%s1815_s1 + $0x20] sm:$0xf]  ;;  %v1131_v47 = vld [vmem:[%s1815_s1 + $0x24] sm:$0xf0]  ;;  %v845_v50 = vor.u32 %v1143_v42, %v844_v41 }
   0xd   : > { %v1130_v48 = vld [vmem:[%s1815_s1 + $0x24] sm:$0xf]  ;;  %v898_v49 = vld [vmem:[%s1815_s1 + $0x28] sm:$0xf0]  ;;  %v849_v51 = vor.u32 %v1142_v43, %v846_v45  ;;  %v897_v52 = vor.u32 %v1131_v47, %v896_v46  ;;  %v836_v53 = vld [vmem:[%s1815_s1 + $0x70] sm:$0xf] }
   0xe   : > { %146 = vmatpush.bf16.msra.mxu0 %v853_v35  ;;  %v1141_v54 = vld [vmem:[%s1815_s1 + $0x74] sm:$0xf0]  ;;  %v1140_v55 = vld [vmem:[%s1815_s1 + $0x74] sm:$0xf]  ;;  %v901_v56 = vor.u32 %v1130_v48, %v898_v49  ;;  %v838_v57 = vld [vmem:[%s1815_s1 + $0x78] sm:$0xf0] }
   0xf   : > { %165 = vmatpush.bf16.msra.mxu1 %v857_v39  ;;  %250 = vmatpush.bf16.msra.mxu2 %v905_v40  ;;  %v888_v58 = vld [vmem:[%s1815_s1 + $0x10] sm:$0xf]  ;;  %v1129_v59 = vld [vmem:[%s1815_s1 + $0x14] sm:$0xf0]  ;;  %v1128_v60 = vld [vmem:[%s1815_s1 + $0x14] sm:$0xf]  ;;  %v837_v62 = vor.u32 %v1141_v54, %v836_v53  ;;  %v841_v7 = vor.u32 %v1140_v55, %v838_v57 }
  0x10   : > { %269 = vmatpush.bf16.msra.mxu3 %v909_v44  ;;  %v890_v61 = vld [vmem:[%s1815_s1 + $0x18] sm:$0xf0]  ;;  %v828_v63 = vld [vmem:[%s1815_s1 + $0x60] sm:$0xf]  ;;  %v1139_v1 = vld [vmem:[%s1815_s1 + $0x64] sm:$0xf0]  ;;  %v889_v8 = vor.u32 %v1129_v59, %v888_v58 }
  0x11   : > { %v1138_v6 = vld [vmem:[%s1815_s1 + $0x64] sm:$0xf]  ;;  %v830_v9 = vld [vmem:[%s1815_s1 + $0x68] sm:$0xf0]  ;;  %v880_v10 = vld [vmem:[%s1815_s1] sm:$0xf]  ;;  %v893_v11 = vor.u32 %v1128_v60, %v890_v61  ;;  %v829_v18 = vor.u32 %v1139_v1, %v828_v63 }
  0x12   : > { %147 = vmatpush.bf16.msra.mxu0 %v845_v50  ;;  %s813_s5 = sshll.u32 %s1278_s19, 5  ;;  %v1127_v12 = vld [vmem:[%s1815_s1 + $0x4] sm:$0xf0]  ;;  %v1126_v13 = vld [vmem:[%s1815_s1 + $0x4] sm:$0xf]  ;;  %v833_v22 = vor.u32 %v1138_v6, %v830_v9  ;;  %vm135_vm3 = vcmask 785408  }
  0x13   : > { %166 = vmatpush.bf16.msra.mxu1 %v849_v51  ;;  %251 = vmatpush.bf16.msra.mxu2 %v897_v52  ;;  %v882_v14 = vld [vmem:[%s1815_s1 + $0x8] sm:$0xf0]  ;;  %s1487_s14 = scalar_lea.vmem %s1814_s0, %s813_s5  ;;  %v1048_v15 = vld [vmem:[%s1815_s1 + $0x170] sm:$0xf]  ;;  %v1173_v16 = vld [vmem:[%s1815_s1 + $0x174] sm:$0xf0]  ;;  %v881_v23 = vor.u32 %v1127_v12, %v880_v10 }
  0x14   : > { %270 = vmatpush.bf16.msra.mxu3 %v901_v56  ;;  %v1172_v17 = vld [vmem:[%s1815_s1 + $0x174] sm:$0xf]  ;;  %v56_v19 = vld [vmem:[%s1487_s14 + $0x1] sm:$0xff]  ;;  %v57_v20 = vld [vmem:[%s1487_s14 + $0x9] sm:$0xff]  ;;  %v885_v26 = vor.u32 %v1126_v13, %v882_v14  ;;  %v1049_v27 = vor.u32 %v1173_v16, %v1048_v15  ;;  %vm694_vm4 = vcmask 326656   ;;  %vm705_vm5 = vcmask 1043456  }
  0x15   : > { %v1050_v21 = vld [vmem:[%s1815_s1 + $0x178] sm:$0xf0]  ;;  %v38_v24 = vld [vmem:[%s1487_s14] sm:$0xff]  ;;  %v39_v25 = vld [vmem:[%s1487_s14 + $0x8] sm:$0xff]  ;;  %v60_v31 = vpack.c.bf16 %v57_v20, %v56_v19  ;;  %vm701_vm6 = vcmask 322560  }
  0x16   : > { %148 = vmatpush.bf16.msra.mxu0 %v837_v62  ;;  %v1160_v28 = vld [vmem:[%s1815_s1 + $0x114] sm:$0xf]  ;;  %v986_v29 = vld [vmem:[%s1815_s1 + $0x118] sm:$0xf0]  ;;  %v984_v30 = vld [vmem:[%s1815_s1 + $0x110] sm:$0xf]  ;;  %v1053_v32 = vor.u32 %v1172_v17, %v1050_v21  ;;  %v42_v36 = vpack.c.bf16 %v39_v25, %v38_v24 }
  0x17   : > { %167 = vmatpush.bf16.msra.mxu1 %v841_v7  ;;  %252 = vmatpush.bf16.msra.mxu2 %v889_v8  ;;  %v1161_v33 = vld [vmem:[%s1815_s1 + $0x114] sm:$0xf0]  ;;  %v1040_v34 = vld [vmem:[%s1815_s1 + $0x160] sm:$0xf]  ;;  %v1171_v35 = vld [vmem:[%s1815_s1 + $0x164] sm:$0xf0]  ;;  %v989_v39 = vor.u32 %v1160_v28, %v986_v29 }
  0x18   : > { %271 = vmatpush.bf16.msra.mxu3 %v893_v11  ;;  %v1170_v37 = vld [vmem:[%s1815_s1 + $0x164] sm:$0xf]  ;;  %v1042_v38 = vld [vmem:[%s1815_s1 + $0x168] sm:$0xf0]  ;;  %v985_v40 = vor.u32 %v1161_v33, %v984_v30  ;;  %v1041_v41 = vor.u32 %v1171_v35, %v1040_v34  ;;  %v976_v44 = vld [vmem:[%s1815_s1 + $0x100] sm:$0xf] }
  0x19   : > { %v1158_v42 = vld [vmem:[%s1815_s1 + $0x104] sm:$0xf]  ;;  %v978_v43 = vld [vmem:[%s1815_s1 + $0x108] sm:$0xf0]  ;;  %v1045_v45 = vor.u32 %v1170_v37, %v1042_v38  ;;  %v1159_v46 = vld [vmem:[%s1815_s1 + $0x104] sm:$0xf0] }
  0x1a   : > { %149 = vmatpush.bf16.msra.mxu0 %v829_v18  ;;  %v1032_v47 = vld [vmem:[%s1815_s1 + $0x150] sm:$0xf]  ;;  %v1169_v48 = vld [vmem:[%s1815_s1 + $0x154] sm:$0xf0]  ;;  %v1168_v49 = vld [vmem:[%s1815_s1 + $0x154] sm:$0xf]  ;;  %v981_v51 = vor.u32 %v1158_v42, %v978_v43  ;;  %v977_v52 = vor.u32 %v1159_v46, %v976_v44 }
  0x1b   : > { %168 = vmatpush.bf16.msra.mxu1 %v833_v22  ;;  %253 = vmatpush.bf16.msra.mxu2 %v881_v23  ;;  %v1034_v50 = vld [vmem:[%s1815_s1 + $0x158] sm:$0xf0]  ;;  %v1033_v53 = vor.u32 %v1169_v48, %v1032_v47  ;;  %v1156_v54 = vld [vmem:[%s1815_s1 + $0xf4] sm:$0xf]  ;;  %v968_v56 = vld [vmem:[%s1815_s1 + $0xf0] sm:$0xf] }
  0x1c   : > { %272 = vmatpush.bf16.msra.mxu3 %v885_v26  ;;  %v970_v55 = vld [vmem:[%s1815_s1 + $0xf8] sm:$0xf0]  ;;  %v1037_v57 = vor.u32 %v1168_v49, %v1034_v50  ;;  %v1157_v58 = vld [vmem:[%s1815_s1 + $0xf4] sm:$0xf0]  ;;  %v1024_v59 = vld [vmem:[%s1815_s1 + $0x140] sm:$0xf] }
  0x1d   : > { %874 = vmatmul.msk.bf16.vlgmr.msra.gmra.mxu0 %vm135_vm3, %v60_v31  ;;  %v1167_v60 = vld [vmem:[%s1815_s1 + $0x144] sm:$0xf0]  ;;  %v1166_v61 = vld [vmem:[%s1815_s1 + $0x144] sm:$0xf]  ;;  %v1026_v62 = vld [vmem:[%s1815_s1 + $0x148] sm:$0xf0]  ;;  %v973_v63 = vor.u32 %v1156_v54, %v970_v55  ;;  %v969_v1 = vor.u32 %v1157_v58, %v968_v56 }
  0x1e   : > { %876 = vmatmul.msk.bf16.vlgmr.msra.gmra.mxu1 %vm135_vm3, %v60_v31  ;;  %926 = vmatmul.msk.bf16.vlgmr.msra.gmra.mxu2 %vm135_vm3, %v42_v36  ;;  %v58_v6 = vld [vmem:[%s1487_s14 + $0x11] sm:$0xff]  ;;  %v1025_v7 = vor.u32 %v1167_v60, %v1024_v59  ;;  %v1154_v8 = vld [vmem:[%s1815_s1 + $0xe4] sm:$0xf]  ;;  %v962_v9 = vld [vmem:[%s1815_s1 + $0xe8] sm:$0xf0]  ;;  %v1029_v11 = vor.u32 %v1166_v61, %v1026_v62 }
  0x1f   : > { %502 = vmatpush.bf16.msrb.mxu2 %v1049_v27  ;;  %928 = vmatmul.msk.bf16.vlgmr.msra.gmra.mxu3 %vm135_vm3, %v42_v36  ;;  %v960_v10 = vld [vmem:[%s1815_s1 + $0xe0] sm:$0xf]  ;;  %v1155_v12 = vld [vmem:[%s1815_s1 + $0xe4] sm:$0xf0]  ;;  %v1016_v13 = vld [vmem:[%s1815_s1 + $0x130] sm:$0xf]  ;;  %v965_v20 = vor.u32 %v1154_v8, %v962_v9 }
  0x20   : > { %521 = vmatpush.bf16.msrb.mxu3 %v1053_v32  ;;  %390 = vmatpush.bf16.msrb.mxu1 %v989_v39  ;;  %v1165_v14 = vld [vmem:[%s1815_s1 + $0x134] sm:$0xf0]  ;;  %v1164_v16 = vld [vmem:[%s1815_s1 + $0x134] sm:$0xf]  ;;  %v1018_v17 = vld [vmem:[%s1815_s1 + $0x138] sm:$0xf0]  ;;  %v961_v22 = vor.u32 %v1155_v12, %v960_v10 }
  0x21   : > { %371 = vmatpush.bf16.msrb.mxu0 %v985_v40  ;;  %v59_v15 = vld [vmem:[%s1487_s14 + $0x19] sm:$0xf]  ;;  %v40_v18 = vld [vmem:[%s1487_s14 + $0x10] sm:$0xff]  ;;  %v1017_v23 = vor.u32 %v1165_v14, %v1016_v13  ;;  %v1021_v28 = vor.u32 %v1164_v16, %v1018_v17  ;;  %v1008_v29 = vld [vmem:[%s1815_s1 + $0x120] sm:$0xf] }
  0x22   : > { %v41_v19 = vld [vmem:[%s1487_s14 + $0x18] sm:$0xf]  ;;  %v1152_v21 = vld [vmem:[%s1815_s1 + $0xd4] sm:$0xf]  ;;  %v954_v24 = vld [vmem:[%s1815_s1 + $0xd8] sm:$0xf0]  ;;  %v61_v27 = vpack.c.bf16 %v59_v15, %v58_v6 }
  0x23   : > { %503 = vmatpush.bf16.msrb.mxu2 %v1041_v41  ;;  %v952_v25 = vld [vmem:[%s1815_s1 + $0xd0] sm:$0xf]  ;;  %v1153_v26 = vld [vmem:[%s1815_s1 + $0xd4] sm:$0xf0]  ;;  %v1163_v30 = vld [vmem:[%s1815_s1 + $0x124] sm:$0xf0]  ;;  %v43_v32 = vpack.c.bf16 %v41_v19, %v40_v18  ;;  %v957_v36 = vor.u32 %v1152_v21, %v954_v24 }
  0x24   : > { %522 = vmatpush.bf16.msrb.mxu3 %v1045_v45  ;;  %391 = vmatpush.bf16.msrb.mxu1 %v981_v51  ;;  %v1162_v31 = vld [vmem:[%s1815_s1 + $0x124] sm:$0xf]  ;;  %v1010_v33 = vld [vmem:[%s1815_s1 + $0x128] sm:$0xf0]  ;;  %v1112_v34 = vld [vmem:[%s1815_s1 + $0x1d0] sm:$0xf]  ;;  %v953_v39 = vor.u32 %v1153_v26, %v952_v25  ;;  %v1009_v40 = vor.u32 %v1163_v30, %v1008_v29 }
  0x25   : > { %372 = vmatpush.bf16.msrb.mxu0 %v977_v52  ;;  %v1185_v35 = vld [vmem:[%s1815_s1 + $0x1d4] sm:$0xf0]  ;;  %v1184_v37 = vld [vmem:[%s1815_s1 + $0x1d4] sm:$0xf]  ;;  %v1114_v38 = vld [vmem:[%s1815_s1 + $0x1d8] sm:$0xf0]  ;;  %v1013_v43 = vor.u32 %v1162_v31, %v1010_v33 }
  0x26   : > { %v1150_v41 = vld [vmem:[%s1815_s1 + $0xc4] sm:$0xf]  ;;  %v946_v42 = vld [vmem:[%s1815_s1 + $0xc8] sm:$0xf0]  ;;  %v944_v44 = vld [vmem:[%s1815_s1 + $0xc0] sm:$0xf]  ;;  %v1113_v46 = vor.u32 %v1185_v35, %v1112_v34  ;;  %v1117_v47 = vor.u32 %v1184_v37, %v1114_v38 }
  0x27   : > { %504 = vmatpush.bf16.msrb.mxu2 %v1033_v53  ;;  %v1151_v45 = vld [vmem:[%s1815_s1 + $0xc4] sm:$0xf0]  ;;  %v1104_v48 = vld [vmem:[%s1815_s1 + $0x1c0] sm:$0xf]  ;;  %v949_v50 = vor.u32 %v1150_v41, %v946_v42  ;;  %v1182_v51 = vld [vmem:[%s1815_s1 + $0x1c4] sm:$0xf] }
  0x28   : > { %523 = vmatpush.bf16.msrb.mxu3 %v1037_v57  ;;  %392 = vmatpush.bf16.msrb.mxu1 %v973_v63  ;;  %v1183_v49 = vld [vmem:[%s1815_s1 + $0x1c4] sm:$0xf0]  ;;  %v1106_v52 = vld [vmem:[%s1815_s1 + $0x1c8] sm:$0xf0]  ;;  %v945_v53 = vor.u32 %v1151_v45, %v944_v44  ;;  %v1096_v56 = vld [vmem:[%s1815_s1 + $0x1b0] sm:$0xf] }
  0x29   : > { %373 = vmatpush.bf16.msrb.mxu0 %v969_v1  ;;  %v1105_v54 = vor.u32 %v1183_v49, %v1104_v48  ;;  %v1109_v55 = vor.u32 %v1182_v51, %v1106_v52  ;;  %v1181_v57 = vld [vmem:[%s1815_s1 + $0x1b4] sm:$0xf0]  ;;  %v1180_v58 = vld [vmem:[%s1815_s1 + $0x1b4] sm:$0xf]  ;;  %v1098_v59 = vld [vmem:[%s1815_s1 + $0x1b8] sm:$0xf0] }
  0x2a   : > { %v284_v60 = vld [vmem:[%s1487_s14 + $0x2] sm:$0xff]  ;;  %v1097_v61 = vor.u32 %v1181_v57, %v1096_v56  ;;  %v285_v62 = vld [vmem:[%s1487_s14 + $0xa] sm:$0xff]  ;;  %v1101_v63 = vor.u32 %v1180_v58, %v1098_v59  ;;  %v1177_v15 = vld [vmem:[%s1815_s1 + $0x194] sm:$0xf0] }
  0x2b   : > { %505 = vmatpush.bf16.msrb.mxu2 %v1025_v7  ;;  %v1088_v1 = vld [vmem:[%s1815_s1 + $0x1a0] sm:$0xf]  ;;  %v1179_v6 = vld [vmem:[%s1815_s1 + $0x1a4] sm:$0xf0]  ;;  %v288_v9 = vpack.c.bf16 %v285_v62, %v284_v60  ;;  %v1090_v12 = vld [vmem:[%s1815_s1 + $0x1a8] sm:$0xf0] }
  0x2c   : > { %524 = vmatpush.bf16.msrb.mxu3 %v1029_v11  ;;  %393 = vmatpush.bf16.msrb.mxu1 %v965_v20  ;;  %v415_v7 = vld [vmem:[%s1487_s14 + $0x3] sm:$0xff]  ;;  %v416_v8 = vld [vmem:[%s1487_s14 + $0xb] sm:$0xff]  ;;  %v1089_v10 = vor.u32 %v1179_v6, %v1088_v1  ;;  %v1176_v18 = vld [vmem:[%s1815_s1 + $0x194] sm:$0xf] }
  0x2d   : > { %374 = vmatpush.bf16.msrb.mxu0 %v961_v22  ;;  %v1178_v11 = vld [vmem:[%s1815_s1 + $0x1a4] sm:$0xf]  ;;  %v419_v13 = vpack.c.bf16 %v416_v8, %v415_v7  ;;  %v1080_v14 = vld [vmem:[%s1815_s1 + $0x190] sm:$0xf]  ;;  %v1082_v19 = vld [vmem:[%s1815_s1 + $0x198] sm:$0xf0] }
  0x2e   : > { %875 = vmatmul.msk.bf16.gmra.mxu0 %vm135_vm3, %v61_v27  ;;  %877 = vmatmul.msk.bf16.gmra.mxu1 %vm135_vm3, %v61_v27  ;;  %v1093_v16 = vor.u32 %v1178_v11, %v1090_v12  ;;  %v1081_v17 = vor.u32 %v1177_v15, %v1080_v14  ;;  %v1072_v20 = vld [vmem:[%s1815_s1 + $0x180] sm:$0xf]  ;;  %v1175_v21 = vld [vmem:[%s1815_s1 + $0x184] sm:$0xf0]  ;;  %v1085_v22 = vor.u32 %v1176_v18, %v1082_v19  ;;  %v1174_v24 = vld [vmem:[%s1815_s1 + $0x184] sm:$0xf] }
  0x2f   : > { %506 = vmatpush.bf16.msrb.mxu2 %v1017_v23  ;;  %929 = vmatmul.msk.bf16.gmra.mxu3 %vm135_vm3, %v43_v32  ;;  %v1073_v23 = vor.u32 %v1175_v21, %v1072_v20  ;;  %v1074_v25 = vld [vmem:[%s1815_s1 + $0x188] sm:$0xf0]  ;;  %v286_v27 = vld [vmem:[%s1487_s14 + $0x12] sm:$0xff]  ;;  %v418_v30 = vld [vmem:[%s1487_s14 + $0x1b] sm:$0xf]  ;;  %v1750_v20 = vperm.slane %v1309_v0, 1 }
  0x30   : > { %525 = vmatpush.bf16.msrb.mxu3 %v1021_v28  ;;  %927 = vmatmul.msk.bf16.gmra.mxu2 %vm135_vm3, %v43_v32  ;;  %v1077_v26 = vor.u32 %v1174_v24, %v1074_v25  ;;  %v287_v28 = vld [vmem:[%s1487_s14 + $0x1a] sm:$0xf]  ;;  %v546_v33 = vld [vmem:[%s1487_s14 + $0x4] sm:$0xff]  ;;  %v547_v34 = vld [vmem:[%s1487_s14 + $0xc] sm:$0xff] }
  0x31   : > { %394 = vmatpush.bf16.msrb.mxu1 %v957_v36  ;;  %375 = vmatpush.bf16.msrb.mxu0 %v953_v39  ;;  %v417_v29 = vld [vmem:[%s1487_s14 + $0x13] sm:$0xff]  ;;  %v289_v31 = vpack.c.bf16 %v287_v28, %v286_v27  ;;  %v549_v36 = vld [vmem:[%s1487_s14 + $0x1c] sm:$0xf]  ;;  %v550_v37 = vpack.c.bf16 %v547_v34, %v546_v33 }
  0x32   : > { %v420_v32 = vpack.c.bf16 %v418_v30, %v417_v29  ;;  %v548_v35 = vld [vmem:[%s1487_s14 + $0x14] sm:$0xff]  ;;  %s1186_s14 = sshll.u32 %s1278_s19, 6  ;;  %s31_s19 = sadd.s32 1, %s1278_s19  }
  0x33   : > { %507 = vmatpush.bf16.msrb.mxu2 %v1009_v40  ;;  %v551_v38 = vpack.c.bf16 %v549_v36, %v548_v35  ;;  %s1755_s10 = scalar_lea.vmem %s1817_s3, %s1186_s14  ;;  %p28_p0 = scmp.ge.s32.totalorder %s31_s19, 4  }
  0x34   : > { %526 = vmatpush.bf16.msrb.mxu3 %v1013_v43  ;;  %vm766_vm7 = vcmask (%p28_p0), 1040384  }
  0x35   : > { %395 = vmatpush.bf16.msrb.mxu1 %v949_v50  ;;  %376 = vmatpush.bf16.msrb.mxu0 %v945_v53 }
  0x37   : > { %1187 = vmatpush.bf16.msra.mxu2 %v1113_v46 }
  0x38   : > { %1193 = vmatpush.bf16.msra.mxu3 %v1117_v47 }
  0x39   : > { %652 = vmatpush.bf16.msra.mxu1 %v1117_v47  ;;  %633 = vmatpush.bf16.msra.mxu0 %v1113_v46 }
  0x3b   : > { %1188 = vmatpush.bf16.msra.mxu2 %v1105_v54 }
  0x3c   : > { %1194 = vmatpush.bf16.msra.mxu3 %v1109_v55 }
  0x3d   : > { %653 = vmatpush.bf16.msra.mxu1 %v1109_v55  ;;  %634 = vmatpush.bf16.msra.mxu0 %v1105_v54 }
  0x3e   : > { %990 = vmatmul.msk.bf16.vlgmr.msrb.gmra.mxu0 %vm135_vm3, %v288_v9  ;;  %992 = vmatmul.msk.bf16.vlgmr.msrb.gmra.mxu1 %vm135_vm3, %v288_v9 }
  0x3f   : > { %1189 = vmatpush.bf16.msra.mxu2 %v1097_v61  ;;  %1056 = vmatmul.msk.bf16.vlgmr.msrb.gmra.mxu3 %vm135_vm3, %v419_v13 }
  0x40   : > { %1195 = vmatpush.bf16.msra.mxu3 %v1101_v63  ;;  %1054 = vmatmul.msk.bf16.vlgmr.msrb.gmra.mxu2 %vm135_vm3, %v419_v13 }
  0x41   : > { %654 = vmatpush.bf16.msra.mxu1 %v1101_v63  ;;  %635 = vmatpush.bf16.msra.mxu0 %v1097_v61 }
  0x43   : > { %1190 = vmatpush.bf16.msra.mxu2 %v1089_v10 }
  0x44   : > { %1196 = vmatpush.bf16.msra.mxu3 %v1093_v16 }
  0x45   : > { %655 = vmatpush.bf16.msra.mxu1 %v1093_v16  ;;  %636 = vmatpush.bf16.msra.mxu0 %v1089_v10  ;;  %v1746_v16 = vperm.slane %v1309_v0, 0 }
  0x47   : > { %1191 = vmatpush.bf16.msra.mxu2 %v1081_v17 }
  0x48   : > { %1197 = vmatpush.bf16.msra.mxu3 %v1085_v22 }
  0x49   : > { %656 = vmatpush.bf16.msra.mxu1 %v1085_v22  ;;  %637 = vmatpush.bf16.msra.mxu0 %v1081_v17 }
  0x4b   : > { %1192 = vmatpush.bf16.msra.mxu2 %v1073_v23 }
  0x4c   : > { %1198 = vmatpush.bf16.msra.mxu3 %v1077_v26 }
  0x4d   : > { %657 = vmatpush.bf16.msra.mxu1 %v1077_v26  ;;  %638 = vmatpush.bf16.msra.mxu0 %v1073_v23 }
  0x4e   : > { %991 = vmatmul.msk.bf16.gmra.mxu0 %vm135_vm3, %v289_v31  ;;  %993 = vmatmul.msk.bf16.gmra.mxu1 %vm135_vm3, %v289_v31 }
  0x4f   : > { %1057 = vmatmul.msk.bf16.gmra.mxu3 %vm135_vm3, %v420_v32 }
  0x50   : > { %1055 = vmatmul.msk.bf16.gmra.mxu2 %vm135_vm3, %v420_v32 }
  0x5e   : > { %1118 = vmatmul.msk.bf16.vlgmr.msra.gmra.mxu0 %vm135_vm3, %v550_v37  ;;  %1120 = vmatmul.msk.bf16.vlgmr.msra.gmra.mxu1 %vm135_vm3, %v550_v37 }
  0x5f   : > { %1121 = vmatmul.msk.bf16.vlgmr.msra.gmra.mxu3 %vm135_vm3, %v551_v38 }
  0x60   : > { %1119 = vmatmul.msk.bf16.vlgmr.msra.gmra.mxu2 %vm135_vm3, %v551_v38 }
  0x9a   : > { %v151_v39 = vpop.f32.mrf.mxu0 }
  0x9b   : > { %v170_v40 = vpop.f32.mrf.mxu1 }
  0xa1   : > { %v255_v41 = vpop.f32.mrf.mxu2 }
  0xa2   : > { %v274_v42 = vpop.f32.mrf.mxu3  ;;  %v153_v43 = vpop.f32.mrf.mxu0  ;;  %v256_v10 = vadd.f32 %v255_v41, %v151_v39 }
  0xa3   : > { %v172_v44 = vpop.f32.mrf.mxu1  ;;  %v275_v11 = vadd.f32 %v274_v42, %v170_v40 }
  0xa9   : > { %v257_v45 = vpop.f32.mrf.mxu2 }
  0xaa   : > { %v276_v46 = vpop.f32.mrf.mxu3  ;;  %v258_v25 = vadd.f32 %v257_v45, %v153_v43 }
  0xab   : > { %v156_v47 = vpop.f32.mrf.mxu0  ;;  %v175_v48 = vpop.f32.mrf.mxu1  ;;  %v277_v28 = vadd.f32 %v276_v46, %v172_v44 }
  0xb2   : > { %v279_v50 = vpop.f32.mrf.mxu3 }
  0xb3   : > { %v260_v49 = vpop.f32.mrf.mxu2  ;;  %v158_v51 = vpop.f32.mrf.mxu0  ;;  %v280_v26 = vadd.f32 %v279_v50, %v175_v48 }
  0xb4   : > { %v177_v52 = vpop.f32.mrf.mxu1  ;;  %v261_v23 = vadd.f32 %v260_v49, %v156_v47 }
  0xba   : > { %v281_v54 = vpop.f32.mrf.mxu3 }
  0xbb   : > { %v262_v53 = vpop.f32.mrf.mxu2  ;;  %v378_v55 = vpop.f32.mrf.mxu0  ;;  %v282_v48 = vadd.f32 %v281_v54, %v177_v52 }
  0xbc   : > { %v397_v56 = vpop.f32.mrf.mxu1  ;;  %v407_v12 = vadd.f32 %v378_v55, %v256_v10  ;;  %v263_v45 = vadd.f32 %v262_v53, %v158_v51 }
  0xbd   : > { %v408_v13 = vadd.f32 %v397_v56, %v275_v11 }
  0xc2   : > { %v528_v58 = vpop.f32.mrf.mxu3 }
  0xc3   : > { %v509_v57 = vpop.f32.mrf.mxu2  ;;  %v380_v59 = vpop.f32.mrf.mxu0  ;;  %v539_v17 = vadd.f32 %v528_v58, %v408_v13 }
  0xc4   : > { %v399_v60 = vpop.f32.mrf.mxu1  ;;  %v538_v14 = vadd.f32 %v509_v57, %v407_v12  ;;  %v409_v31 = vadd.f32 %v380_v59, %v258_v25 }
  0xc5   : > { %v410_v33 = vadd.f32 %v399_v60, %v277_v28 }
  0xca   : > { %v530_v62 = vpop.f32.mrf.mxu3 }
  0xcb   : > { %v511_v61 = vpop.f32.mrf.mxu2  ;;  %v383_v63 = vpop.f32.mrf.mxu0  ;;  %v541_v38 = vadd.f32 %v530_v62, %v410_v33 }
  0xcc   : > { %v402_v1 = vpop.f32.mrf.mxu1  ;;  %v411_v29 = vadd.f32 %v383_v63, %v261_v23  ;;  %v540_v35 = vadd.f32 %v511_v61, %v409_v31 }
  0xcd   : > { %v412_v32 = vadd.f32 %v402_v1, %v280_v26 }
  0xd2   : > { %v533_v7 = vpop.f32.mrf.mxu3 }
  0xd3   : > { %v514_v6 = vpop.f32.mrf.mxu2  ;;  %v385_v8 = vpop.f32.mrf.mxu0  ;;  %v543_v36 = vadd.f32 %v533_v7, %v412_v32 }
  0xd4   : > { %v404_v9 = vpop.f32.mrf.mxu1  ;;  %v542_v34 = vadd.f32 %v514_v6, %v411_v29  ;;  %v413_v55 = vadd.f32 %v385_v8, %v263_v45 }
  0xd5   : > { %v414_v57 = vadd.f32 %v404_v9, %v282_v48 }
  0xda   : > { %v535_v18 = vpop.f32.mrf.mxu3 }
  0xdb   : > { %v516_v15 = vpop.f32.mrf.mxu2  ;;  %v640_v19 = vpop.f32.mrf.mxu0  ;;  %v545_v52 = vadd.f32 %v535_v18, %v414_v57 }
  0xdc   : > { %v669_v21 = vadd.f32 %v640_v19, %v538_v14  ;;  %v659_v22 = vpop.f32.mrf.mxu1  ;;  %v544_v60 = vadd.f32 %v516_v15, %v413_v55 }
  0xdd   : > { %v670_v24 = vadd.f32 %v659_v22, %v539_v17 }
  0xde   : > { %v682_v27 = vadd.f32 %v1746_v16, %v669_v21 }
  0xdf   : > { %v683_v30 = vadd.f32 %v1750_v20, %v670_v24 }
  0xe0   : > { %693 = vst [vmem:[%s1755_s10] sm:$0xff] %v682_v27  ;;  %v729_v54 = vmul.f32 %v682_v27, %v682_v27 }
  0xe1   : > { %695 = vst.msk [vmem:[%s1755_s10 + $0x8] sm:$0xff] %vm694_vm4, %v683_v30  ;;  %v730_v58 = vmul.f32 %v683_v30, %v683_v30  ;;  %v714_v61 = vsel %vm694_vm4, %v683_v30, 0.0 }
  0xe2   : > { %v664_v40 = vpop.f32.mrf.mxu3 }
  0xe3   : > { %v645_v37 = vpop.f32.mrf.mxu2  ;;  %v642_v41 = vpop.f32.mrf.mxu0  ;;  %v674_v42 = vadd.f32 %v664_v40, %v543_v36  ;;  %v747_v10 = vsel %vm694_vm4, %v730_v58, 0.0 }
  0xe4   : > { %v673_v39 = vadd.f32 %v645_v37, %v542_v34  ;;  %v671_v43 = vadd.f32 %v642_v41, %v540_v35  ;;  %v661_v44 = vpop.f32.mrf.mxu1 }
  0xe5   : > { %v672_v47 = vadd.f32 %v661_v44, %v541_v38  ;;  %v687_v49 = vadd.f32 %v1750_v20, %v674_v42 }
  0xe6   : > { %v686_v46 = vadd.f32 %v1746_v16, %v673_v39  ;;  %v684_v50 = vadd.f32 %v1746_v16, %v671_v43 }
  0xe7   : > { %v685_v56 = vadd.f32 %v1750_v20, %v672_v47  ;;  %699 = vst.msk [vmem:[%s1755_s10 + $0x28] sm:$0xff] %vm694_vm4, %v687_v49  ;;  %v734_v1 = vmul.f32 %v687_v49, %v687_v49  ;;  %v717_v17 = vsel %vm694_vm4, %v687_v49, 0.0 }
  0xe8   : > { %698 = vst [vmem:[%s1755_s10 + $0x20] sm:$0xff] %v686_v46  ;;  %v731_v59 = vmul.f32 %v684_v50, %v684_v50  ;;  %v703_v62 = vadd.f32 %v684_v50, %v682_v27  ;;  %v733_v15 = vmul.f32 %v686_v46, %v686_v46 }
  0xe9   : > { %696 = vst [vmem:[%s1755_s10 + $0x10] sm:$0xff] %v684_v50  ;;  %v715_v51 = vsel %vm694_vm4, %v685_v56, 0.0  ;;  %v732_v53 = vmul.f32 %v685_v56, %v685_v56  ;;  %v750_v21 = vsel %vm694_vm4, %v734_v1, 0.0  ;;  %v1124_v1 = vld [vmem:[%s1818_s4 + $0x1] ss:$2 sm:$0x3] (%p28_p0) }
  0xea   : > { %697 = vst.msk [vmem:[%s1755_s10 + $0x18] sm:$0xff] %vm694_vm4, %v685_v56  ;;  %v716_v6 = vadd.f32 %v715_v51, %v714_v61  ;;  %v666_v9 = vpop.f32.mrf.mxu3  ;;  %v737_v11 = vadd.f32 %v731_v59, %v729_v54  ;;  %v704_v18 = vadd.f32 %v703_v62, %v686_v46  ;;  %v770_v62 = vlaneseq (%p28_p0) }
  0xeb   : > { %v647_v63 = vpop.f32.mrf.mxu2  ;;  %v748_v7 = vsel %vm694_vm4, %v732_v53, 0.0  ;;  %v676_v12 = vadd.f32 %v666_v9, %v545_v52 }
  0xec   : > { %v675_v8 = vadd.f32 %v647_v63, %v544_v60  ;;  %v749_v13 = vadd.f32 %v748_v7, %v747_v10  ;;  %v718_v24 = vadd.f32 %v717_v17, %v716_v6  ;;  %v738_v25 = vadd.f32 %v737_v11, %v733_v15 }
  0xed   : > { %v689_v19 = vadd.f32 %v1750_v20, %v676_v12  ;;  %vm772_vm8 = vcmp.lt.s32.totalorder (%p28_p0), %v770_v62, 168 }
  0xee   : > { %v688_v14 = vadd.f32 %v1746_v16, %v675_v8  ;;  %v751_v30 = vadd.f32 %v750_v21, %v749_v13 }
  0xef   : > { %702 = vst.msk [vmem:[%s1755_s10 + $0x38] sm:$0xf] %vm701_vm6, %v689_v19  ;;  %v719_v16 = vsel %vm701_vm6, %v689_v19, 0.0  ;;  %v736_v27 = vmul.f32 %v689_v19, %v689_v19 }
  0xf0   : > { %700 = vst [vmem:[%s1755_s10 + $0x30] sm:$0xf] %v688_v14  ;;  %v706_v22 = vsel %vm705_vm5, %v688_v14, 0.0  ;;  %v735_v23 = vmul.f32 %v688_v14, %v688_v14  ;;  %v720_v29 = vadd.f32 %v719_v16, %v718_v24 }
  0xf1   : > { %v707_v26 = vadd.f32 %v706_v22, %v704_v18  ;;  %v752_v32 = vsel %vm701_vm6, %v736_v27, 0.0 }
  0xf2   : > { %v739_v28 = vsel %vm705_vm5, %v735_v23, 0.0  ;;  %v721_v33 = vrot.slane %v720_v29, 4  ;;  %v753_v34 = vadd.f32 %v752_v32, %v751_v30 }
  0xf3   : > { %v708_v31 = vrot.slane %v707_v26, 4  ;;  %v740_v20 = vadd.f32 %v739_v28, %v738_v25 }
  0xf4   : > { %v722_v37 = vadd.f32 %v721_v33, %v720_v29  ;;  %v754_v38 = vrot.slane %v753_v34, 4 }
  0xf5   : > { %v709_v35 = vadd.f32 %v708_v31, %v707_v26  ;;  %v741_v36 = vrot.slane %v740_v20, 4 }
  0xf6   : > { %v723_v41 = vrot.slane %v722_v37, 2  ;;  %v755_v42 = vadd.f32 %v754_v38, %v753_v34 }
  0xf7   : > { %v710_v39 = vrot.slane %v709_v35, 2  ;;  %v742_v40 = vadd.f32 %v741_v36, %v740_v20 }
  0xf8   : > { %v724_v45 = vadd.f32 %v723_v41, %v722_v37  ;;  %v756_v46 = vrot.slane %v755_v42, 2 }
  0xf9   : > { %v711_v43 = vadd.f32 %v710_v39, %v709_v35  ;;  %v743_v44 = vrot.slane %v742_v40, 2 }
  0xfa   : > { %v725_v49 = vrot.slane %v724_v45, 1  ;;  %v757_v50 = vadd.f32 %v756_v46, %v755_v42 }
  0xfb   : > { %v712_v47 = vrot.slane %v711_v43, 1  ;;  %v744_v48 = vadd.f32 %v743_v44, %v742_v40 }
  0xfc   : > { %v726_v57 = vadd.f32 %v725_v49, %v724_v45  ;;  %v758_v58 = vrot.slane %v757_v50, 1 }
  0xfd   : > { %v713_v55 = vadd.f32 %v712_v47, %v711_v43  ;;  %v745_v56 = vrot.slane %v744_v48, 1 }
  0xfe   : > { %v728_v51 = vadd.f32 %v1270_v4, %v726_v57   ;;  %v759_v53 = vadd.f32 %v758_v58, %v757_v50 }
  0xff   : > { %v727_v59 = vadd.f32 %v1274_v5, %v713_v55   ;;  %v746_v60 = vadd.f32 %v745_v56, %v744_v48  ;;  %30 = sbr.rel (!%p28_p0) target bundleno = 3 (0x3), region = 58 }
 0x100   : > { %v761_v54 = vadd.f32 %v1262_v2, %v759_v53   ;;  %v1821_v4 = vmov %v728_v51  ;;  %v765_v61 = vrot.slane (%p28_p0), %v728_v51, 7 }
 0x101   : > { %v760_v52 = vadd.f32 %v1266_v3, %v746_v60   ;;  %v1822_v5 = vmov %v727_v59 }
 0x102   : > { %v1819_v2 = vmov %v761_v54  ;;  %v762_v5 = vld [vmem:[%s1818_s4] ss:$2 sm:$0x3] (%p28_p0)  ;;  %v779_v63 = vrot.slane (%p28_p0), %v761_v54, 7  ;;  %v767_v6 = vsel (%p28_p0), %vm766_vm7, %v727_v59, %v765_v61 }
 0x103   : > { %v1820_v3 = vmov %v760_v52  ;;  %v769_v8 = vadd.f32 (%p28_p0), %v767_v6, %v762_v5 }
 0x104   :  { %v780_v7 = vsel %vm766_vm7, %v760_v52, %v779_v63 }
 0x105   :  { %v782_v9 = vadd.f32 %v1124_v1, %v780_v7  ;;  %774 = vst.msk [vmem:[%s1818_s4] ss:$2 sm:$0x3] %vm772_vm8, %v769_v8 }
 0x107   :  { %1125 = vst.msk [vmem:[%s1818_s4 + $0x1] ss:$2 sm:$0x3] %vm772_vm8, %v782_v9 }

// kernel: lenet_batch_forward.6
= control target key start
LH: loop header
LB: loop body
LE: loop exit
PB: predicated region body
PF: predicated region fallthrough
CT: control target
= control target key end

     0   :  { %s835_s7 = smov 0   ;;  %s903_s0 = inlined_call_operand.vmem [shape: f32[4,28,168], index: 0, kind: input, shape index: {}]   ;;  %s904_s1 = inlined_call_operand.vmem [shape: f32[2,168], index: 1, kind: input, shape index: {}]   ;;  %s905_s2 = inlined_call_operand.vmem [shape: bf16[14,28], index: 2, kind: input, shape index: {}]   ;;  %s906_s3 = inlined_call_operand.vmem [shape: bf16[14,28], index: 3, kind: input, shape index: {}]   ;;  %s907_s4 = inlined_call_operand.vmem [shape: bf16[168,84], index: 4, kind: input, shape index: {}]   ;;  %s908_s6 = inlined_call_operand.vmem [shape: f32[4,14,84], index: 6, kind: output, shape index: {}]   ;;  %s909_s5 = inlined_call_operand.vmem [shape: bf16[168,84], index: 5, kind: input, shape index: {}]  }
   0x1   :  { %v603_v0 = vld [vmem:[%s904_s1] sm:$0xf]  ;;  %v613_v2 = vld [vmem:[%s905_s2] sm:$0x70]  ;;  %v638_v7 = vld [vmem:[%s907_s4 + $0x8] sm:$0xf] }
   0x2   :  { %911 = vst [vmem:[#allocation2_spill] sm:$0xff] %v603_v0  ;;  %v608_v1 = vld [vmem:[%s905_s2] sm:$0xf]  ;;  %v623_v4 = vld [vmem:[%s906_s3] sm:$0x70] }
   0x3   :  { %v618_v3 = vld [vmem:[%s906_s3] sm:$0xf]  ;;  %v633_v6 = vld [vmem:[%s907_s4] sm:$0xf0]  ;;  %v643_v8 = vld [vmem:[%s907_s4 + $0x8] sm:$0xf0] }
   0x4   :  { %v628_v5 = vld [vmem:[%s907_s4] sm:$0xf]  ;;  %913 = vst [vmem:[#allocation4_spill] sm:$0xff] %v633_v6  ;;  %v648_v9 = vld [vmem:[%s907_s4 + $0x10] sm:$0xf] }
   0x5   :  { %912 = vst [vmem:[#allocation3_spill] sm:$0xff] %v628_v5  ;;  %v653_v10 = vld [vmem:[%s907_s4 + $0x10] sm:$0xf0]  ;;  %v658_v11 = vld [vmem:[%s907_s4 + $0x18] sm:$0xf] }
   0x6   :  { %914 = vst [vmem:[#allocation5_spill] sm:$0xff] %v643_v8  ;;  %v663_v12 = vld [vmem:[%s907_s4 + $0x18] sm:$0xf0]  ;;  %v668_v13 = vld [vmem:[%s907_s4 + $0x20] sm:$0xf] }
   0x7   :  { %v673_v14 = vld [vmem:[%s907_s4 + $0x20] sm:$0xf0]  ;;  %v678_v15 = vld [vmem:[%s907_s4 + $0x28] sm:$0xf]  ;;  %v683_v16 = vld [vmem:[%s907_s4 + $0x28] sm:$0xf0] }
   0x8   :  { %v688_v17 = vld [vmem:[%s907_s4 + $0x30] sm:$0xf]  ;;  %v693_v18 = vld [vmem:[%s907_s4 + $0x30] sm:$0xf0]  ;;  %v698_v19 = vld [vmem:[%s907_s4 + $0x38] sm:$0xf] }
   0x9   :  { %v703_v20 = vld [vmem:[%s907_s4 + $0x38] sm:$0xf0]  ;;  %v708_v21 = vld [vmem:[%s907_s4 + $0x40] sm:$0xf]  ;;  %v713_v22 = vld [vmem:[%s907_s4 + $0x40] sm:$0xf0] }
   0xa   :  { %915 = vst [vmem:[#allocation6_spill] sm:$0xff] %v708_v21  ;;  %v718_v23 = vld [vmem:[%s907_s4 + $0x48] sm:$0xf]  ;;  %v723_v24 = vld [vmem:[%s907_s4 + $0x48] sm:$0xf0] }
   0xb   :  { %916 = vst [vmem:[#allocation7_spill] sm:$0xff] %v713_v22  ;;  %v728_v25 = vld [vmem:[%s907_s4 + $0x50] sm:$0xf]  ;;  %v733_v26 = vld [vmem:[%s909_s5] sm:$0xf] }
   0xc   :  { %917 = vst [vmem:[#allocation8_spill] sm:$0xff] %v718_v23  ;;  %v738_v27 = vld [vmem:[%s909_s5] sm:$0xf0]  ;;  %v743_v28 = vld [vmem:[%s909_s5 + $0x8] sm:$0xf] }
   0xd   :  { %918 = vst [vmem:[#allocation9_spill] sm:$0xff] %v723_v24  ;;  %v748_v29 = vld [vmem:[%s909_s5 + $0x8] sm:$0xf0]  ;;  %v753_v30 = vld [vmem:[%s909_s5 + $0x10] sm:$0xf] }
   0xe   :  { %919 = vst [vmem:[#allocation10_spill] sm:$0xff] %v733_v26  ;;  %v758_v31 = vld [vmem:[%s909_s5 + $0x10] sm:$0xf0]  ;;  %v763_v32 = vld [vmem:[%s909_s5 + $0x18] sm:$0xf] }
   0xf   :  { %920 = vst [vmem:[#allocation11_spill] sm:$0xff] %v738_v27  ;;  %v768_v33 = vld [vmem:[%s909_s5 + $0x18] sm:$0xf0]  ;;  %v773_v34 = vld [vmem:[%s909_s5 + $0x20] sm:$0xf] }
  0x10   :  { %921 = vst [vmem:[#allocation12_spill] sm:$0xff] %v743_v28  ;;  %v778_v35 = vld [vmem:[%s909_s5 + $0x20] sm:$0xf0]  ;;  %v783_v36 = vld [vmem:[%s909_s5 + $0x28] sm:$0xf] }
  0x11   :  { %922 = vst [vmem:[#allocation13_spill] sm:$0xff] %v748_v29  ;;  %v788_v37 = vld [vmem:[%s909_s5 + $0x28] sm:$0xf0]  ;;  %v793_v38 = vld [vmem:[%s909_s5 + $0x30] sm:$0xf] }
  0x12   :  { %v798_v39 = vld [vmem:[%s909_s5 + $0x30] sm:$0xf0]  ;;  %v803_v40 = vld [vmem:[%s909_s5 + $0x38] sm:$0xf]  ;;  %v808_v41 = vld [vmem:[%s909_s5 + $0x38] sm:$0xf0] }
  0x13   :  { %v813_v42 = vld [vmem:[%s909_s5 + $0x40] sm:$0xf]  ;;  %v818_v43 = vld [vmem:[%s909_s5 + $0x40] sm:$0xf0]  ;;  %v823_v44 = vld [vmem:[%s909_s5 + $0x48] sm:$0xf] }
  0x14   :  { %923 = vst [vmem:[#allocation14_spill] sm:$0xff] %v813_v42  ;;  %v828_v45 = vld [vmem:[%s909_s5 + $0x48] sm:$0xf0]  ;;  %v833_v46 = vld [vmem:[%s909_s5 + $0x50] sm:$0xf] }
  0x15   :  { %924 = vst [vmem:[#allocation15_spill] sm:$0xff] %v818_v43 }
  0x16 LB: > { %v925_v0 = vld [vmem:[#allocation2_spill] sm:$0xff]  ;;  %s548_s8 = sshll.u32 %s563_s7, 6  ;;  %vm138_vm0 = vcmask 1045504   ;;  %vm134_vm1 = vcmask 228352   ;;  %vm282_vm2 = vcmask 1043456   ;;  %vm278_vm3 = vcmask 326656   ;;  %s563_s7 = sphi %s835_s7, %s76_s7  }
  0x17   : > { %v89_v47 = vperm.slane %v925_v0, 0  ;;  %v103_v48 = vperm.slane %v925_v0, 1  ;;  %v90_v49 = vperm.slane %v925_v0, 2  ;;  %v104_v50 = vperm.slane %v925_v0, 3  ;;  %s79_s2 = scalar_lea.vmem %s903_s0, %s548_s8  ;;  %s525_s10 = sshll.u32 %s563_s7, 4 }
  0x18   : > { %v84_v55 = vld [vmem:[%s79_s2 + $0x20] sm:$0xff]  ;;  %v86_v56 = vld [vmem:[%s79_s2 + $0x30] sm:$0xf]  ;;  %v85_v57 = vld [vmem:[%s79_s2 + $0x28] sm:$0xff]  ;;  %s411_s3 = scalar_lea.vmem %s908_s6, %s525_s10  ;;  %vm412_vm4 = vcmask 687104   ;;  %vm414_vm5 = vcmask 685056  }
  0x19   : > { %v93_v51 = vperm.slane %v89_v47, 0  ;;  %v94_v52 = vperm.slane %v90_v49, 0  ;;  %v107_v53 = vperm.slane %v103_v48, 1  ;;  %v108_v54 = vperm.slane %v104_v50, 1  ;;  %v87_v60 = vld [vmem:[%s79_s2 + $0x38] sm:$0xf] }
  0x1a   : > { %v80_v62 = vld [vmem:[%s79_s2] sm:$0xff]  ;;  %v82_v63 = vld [vmem:[%s79_s2 + $0x10] sm:$0xff]  ;;  %v81_v49 = vld [vmem:[%s79_s2 + $0x8] sm:$0xff]  ;;  %s76_s7 = sadd.s32 1, %s563_s7  }
  0x1b   : > { %v99_v58 = vmul.f32 %v93_v51, %v84_v55  ;;  %v101_v59 = vmul.f32 %v93_v51, %v86_v56  ;;  %v100_v61 = vmul.f32 %v94_v52, %v85_v57  ;;  %v102_v0 = vmul.f32 %v94_v52, %v87_v60  ;;  %v83_v26 = vld [vmem:[%s79_s2 + $0x18] sm:$0xff]  ;;  %p73_p0 = scmp.ge.s32.totalorder %s76_s7, 4  }
  0x1c   : > { %v95_v27 = vmul.f32 %v93_v51, %v80_v62  ;;  %v97_v47 = vmul.f32 %v93_v51, %v82_v63  ;;  %v96_v48 = vmul.f32 %v94_v52, %v81_v49  ;;  %v98_v42 = vmul.f32 %v94_v52, %v83_v26 }
  0x1d   : > { %v113_v22 = vadd.f32 %v107_v53, %v99_v58  ;;  %v115_v21 = vadd.f32 %v107_v53, %v101_v59  ;;  %v114_v6 = vadd.f32 %v108_v54, %v100_v61  ;;  %v116_v50 = vadd.f32 %v108_v54, %v102_v0 }
  0x1e   : > { %v109_v5 = vadd.f32 %v107_v53, %v95_v27  ;;  %v111_v43 = vadd.f32 %v107_v53, %v97_v47  ;;  %v110_v57 = vadd.f32 %v108_v54, %v96_v48  ;;  %v112_v60 = vadd.f32 %v108_v54, %v98_v42 }
  0x1f   : > { %v121_v55 = vmax.f32 %v113_v22, 0.0  ;;  %v123_v56 = vmax.f32 %v115_v21, 0.0  ;;  %v122_v29 = vmax.f32 %v114_v6, 0.0  ;;  %v124_v28 = vmax.f32 %v116_v50, 0.0 }
  0x20   : > { %v117_v24 = vmax.f32 %v109_v5, 0.0  ;;  %v119_v23 = vmax.f32 %v111_v43, 0.0  ;;  %v118_v51 = vmax.f32 %v110_v57, 0.0  ;;  %v120_v8 = vmax.f32 %v112_v60, 0.0  ;;  %v927_v60 = vld [vmem:[#allocation8_spill] sm:$0xff] }
  0x21   : > { %v127_v62 = vpack.c.bf16 %v123_v56, %v121_v55  ;;  %v128_v63 = vpack.c.bf16 %v124_v28, %v122_v29  ;;  %v474_v6 = vor.u32 %v703_v20, %v698_v19  ;;  %v515_v5 = vor.u32 %v808_v41, %v803_v40  ;;  %v926_v56 = vld [vmem:[#allocation5_spill] sm:$0xff] }
  0x22   : > { %v125_v27 = vpack.c.bf16 %v119_v23, %v117_v24  ;;  %v126_v21 = vpack.c.bf16 %v120_v8, %v118_v51  ;;  %v434_v22 = vor.u32 %v613_v2, %v608_v1  ;;  %v440_v26 = vor.u32 %v623_v4, %v618_v3 }
  0x23   : > { %v140_v58 = vsel %vm138_vm0, %v127_v62, 0  ;;  %v143_v0 = vsel %vm138_vm0, %v128_v63, 0  ;;  %v470_v8 = vor.u32 %v693_v18, %v688_v17  ;;  %v511_v23 = vor.u32 %v798_v39, %v793_v38  ;;  %v928_v62 = vld [vmem:[#allocation9_spill] sm:$0xff]  ;;  %v929_v63 = vld [vmem:[#allocation12_spill] sm:$0xff] }
  0x24   : > { %151 = vmatpush.bf16.msra.mxu0 %v140_v58  ;;  %187 = vmatpush.bf16.msra.mxu2 %v140_v58  ;;  %v466_v24 = vor.u32 %v683_v16, %v678_v15  ;;  %v507_v28 = vor.u32 %v788_v37, %v783_v36  ;;  %v462_v29 = vor.u32 %v673_v14, %v668_v13  ;;  %v355_v43 = vunpack.c.l.b16 %v833_v46  ;;  %v930_v58 = vld [vmem:[#allocation13_spill] sm:$0xff] }
  0x25   : > { %165 = vmatpush.bf16.msra.mxu1 %v143_v0  ;;  %201 = vmatpush.bf16.msra.mxu3 %v143_v0  ;;  %v503_v42 = vor.u32 %v778_v35, %v773_v34  ;;  %v458_v52 = vor.u32 %v663_v12, %v658_v11  ;;  %v499_v53 = vor.u32 %v768_v33, %v763_v32  ;;  %v256_v59 = vunpack.c.l.b16 %v728_v25 }
  0x26   : > { %v366_v54 = vpack.c.b16 %v355_v43, %v355_v43  ;;  %v454_v49 = vor.u32 %v653_v10, %v648_v9  ;;  %v495_v48 = vor.u32 %v758_v31, %v753_v30  ;;  %v523_v55 = vor.u32 %v828_v45, %v823_v44 }
  0x27   : > { %v267_v47 = vpack.c.b16 %v256_v59, %v256_v59  ;;  %v450_v57 = vor.u32 %v926_v56, %v638_v7  ;;  %v482_v51 = vor.u32 %v928_v62, %v927_v60  ;;  %v491_v0 = vor.u32 %v930_v58, %v929_v63 }
  0x28   : > { %152 = vmatpush.bf16.msra.mxu0 %v125_v27  ;;  %188 = vmatpush.bf16.msra.mxu2 %v125_v27  ;;  %v378_v61 = vsel %vm282_vm2, %v366_v54, 0  ;;  %v931_v27 = vld [vmem:[#allocation14_spill] sm:$0xff] }
  0x29   : > { %166 = vmatpush.bf16.msra.mxu1 %v126_v21  ;;  %202 = vmatpush.bf16.msra.mxu3 %v126_v21  ;;  %v284_v50 = vsel %vm282_vm2, %v267_v47, 0  ;;  %v932_v21 = vld [vmem:[#allocation15_spill] sm:$0xff] }
  0x2b   : > { %435 = vmatmul.msk.bf16.vlgmr.msra.gmra.mxu0 %vm134_vm1, %v434_v22  ;;  %441 = vmatmul.msk.bf16.vlgmr.msra.gmra.mxu2 %vm134_vm1, %v440_v26 }
  0x2c   : > { %286 = vmatpush.bf16.msrb.mxu0 %v474_v6  ;;  %380 = vmatpush.bf16.msrb.mxu2 %v515_v5  ;;  %v519_v6 = vor.u32 %v932_v21, %v931_v27  ;;  %v933_v5 = vld [vmem:[#allocation3_spill] sm:$0xff] }
  0x2d   : > { %436 = vmatmul.msk.bf16.vlgmr.msra.gmra.mxu1 %vm134_vm1, %v434_v22  ;;  %442 = vmatmul.msk.bf16.vlgmr.msra.gmra.mxu3 %vm134_vm1, %v440_v26  ;;  %v934_v22 = vld [vmem:[#allocation4_spill] sm:$0xff] }
  0x2e   : > { %399 = vmatpush.bf16.msrb.mxu3 %v378_v61  ;;  %305 = vmatpush.bf16.msrb.mxu1 %v284_v50  ;;  %v446_v26 = vor.u32 %v934_v22, %v933_v5 }
  0x30   : > { %287 = vmatpush.bf16.msrb.mxu0 %v470_v8  ;;  %381 = vmatpush.bf16.msrb.mxu2 %v511_v23  ;;  %v935_v8 = vld [vmem:[#allocation6_spill] sm:$0xff]  ;;  %v936_v23 = vld [vmem:[#allocation7_spill] sm:$0xff] }
  0x32   : > { %400 = vmatpush.bf16.msrb.mxu3 %v523_v55  ;;  %306 = vmatpush.bf16.msrb.mxu1 %v482_v51 }
  0x34   : > { %288 = vmatpush.bf16.msrb.mxu0 %v466_v24  ;;  %382 = vmatpush.bf16.msrb.mxu2 %v507_v28  ;;  %v478_v24 = vor.u32 %v936_v23, %v935_v8  ;;  %v937_v28 = vld [vmem:[#allocation10_spill] sm:$0xff] }
  0x36   : > { %401 = vmatpush.bf16.msrb.mxu3 %v519_v6  ;;  %307 = vmatpush.bf16.msrb.mxu1 %v478_v24 }
  0x38   : > { %289 = vmatpush.bf16.msrb.mxu0 %v462_v29  ;;  %383 = vmatpush.bf16.msrb.mxu2 %v503_v42  ;;  %v938_v29 = vld [vmem:[#allocation11_spill] sm:$0xff] }
  0x39   : > { %v487_v42 = vor.u32 %v938_v29, %v937_v28 }
  0x3c   : > { %290 = vmatpush.bf16.msrb.mxu0 %v458_v52  ;;  %384 = vmatpush.bf16.msrb.mxu2 %v499_v53 }
  0x40   : > { %291 = vmatpush.bf16.msrb.mxu0 %v454_v49  ;;  %385 = vmatpush.bf16.msrb.mxu2 %v495_v48 }
  0x44   : > { %292 = vmatpush.bf16.msrb.mxu0 %v450_v57  ;;  %386 = vmatpush.bf16.msrb.mxu2 %v491_v0 }
  0x48   : > { %293 = vmatpush.bf16.msrb.mxu0 %v446_v26  ;;  %387 = vmatpush.bf16.msrb.mxu2 %v487_v42 }
  0xa8   : > { %v154_v43 = vpop.f32.mrf.mxu0 }
  0xaa   : > { %v168_v52 = vpop.f32.mrf.mxu1 }
  0xae   : > { %v190_v53 = vpop.f32.mrf.mxu2 }
  0xaf   : > { %v209_v47 = vmax.f32 %v154_v43, %v190_v53 }
  0xb0   : > { %v204_v54 = vpop.f32.mrf.mxu3  ;;  %v156_v59 = vpop.f32.mrf.mxu0 }
  0xb1   : > { %v210_v55 = vmax.f32 %v168_v52, %v204_v54 }
  0xb2   : > { %v170_v49 = vpop.f32.mrf.mxu1 }
  0xb6   : > { %v192_v61 = vpop.f32.mrf.mxu2 }
  0xb7   : > { %v211_v48 = vmax.f32 %v156_v59, %v192_v61 }
  0xb8   : > { %v206_v50 = vpop.f32.mrf.mxu3 }
  0xb9   : > { %v212_v56 = vmax.f32 %v170_v49, %v206_v50  ;;  %v213_v57 = vpack.c.bf16 %v211_v48, %v209_v47 }
  0xbb   : > { %v214_v60 = vpack.c.bf16 %v212_v56, %v210_v55  ;;  %294 = vmatmul.bf16.vlgmr.msrb.gmra.mxu0 %v213_v57  ;;  %388 = vmatmul.bf16.vlgmr.msrb.gmra.mxu2 %v213_v57 }
  0xbd   : > { %483 = vmatmul.msk.bf16.vlgmr.msrb.gmra.mxu1 %vm278_vm3, %v214_v60  ;;  %524 = vmatmul.msk.bf16.vlgmr.msrb.gmra.mxu3 %vm278_vm3, %v214_v60 }
 0x138   : > { %v295_v62 = vpop.f32.mrf.mxu0 }
 0x13a   : > { %v309_v51 = vpop.f32.mrf.mxu1 }
 0x13b   : > { %v310_v0 = vadd.f32 %v309_v51, %v295_v62 }
 0x13e   : > { %v389_v63 = vpop.f32.mrf.mxu2 }
 0x140   : > { %v403_v58 = vpop.f32.mrf.mxu3  ;;  %v297_v6 = vpop.f32.mrf.mxu0 }
 0x141   : > { %v404_v27 = vadd.f32 %v403_v58, %v389_v63 }
 0x142   : > { %v311_v5 = vpop.f32.mrf.mxu1 }
 0x143   : > { %v408_v21 = vmax.f32 %v310_v0, %v404_v27  ;;  %v312_v8 = vadd.f32 %v311_v5, %v297_v6 }
 0x145   : > { %413 = vst.msk [vmem:[%s411_s3] sm:$0xff] %vm412_vm4, %v408_v21 }
 0x146   : > { %v391_v22 = vpop.f32.mrf.mxu2 }
 0x148   : > { %v405_v26 = vpop.f32.mrf.mxu3 }
 0x149   : > { %v406_v23 = vadd.f32 %v405_v26, %v391_v22  ;;  %75 = sbr.rel (!%p73_p0) target bundleno = 22 (0x16), region = 53 }
 0x14b   : > { %v409_v24 = vmax.f32 %v312_v8, %v406_v23 }
 0x14d   : > { %415 = vst.msk [vmem:[%s411_s3 + $0x8] sm:$0x3f] %vm414_vm5, %v409_v24 }

// kernel: tile.33
= control target key start
LH: loop header
LB: loop body
LE: loop exit
PB: predicated region body
PF: predicated region fallthrough
CT: control target
= control target key end

     0   :  { %s28_s0 = inlined_call_operand.vmem [shape: f32[16], index: 0, kind: input, shape index: {}]   ;;  %s29_s1 = inlined_call_operand.vmem [shape: f32[10,16], index: 1, kind: output, shape index: {}]  }
   0x1   :  { %v4_v0 = vld [vmem:[%s28_s0] ss:$0 sm:$0xff] }
   0x2   :  { %5 = vst [vmem:[%s29_s1] sm:$0xff] %v4_v0 }
   0x3   :  { %8 = vst [vmem:[%s29_s1 + $0x8] sm:$0xff] %v4_v0 }

// kernel: tile.38
= control target key start
LH: loop header
LB: loop body
LE: loop exit
PB: predicated region body
PF: predicated region fallthrough
CT: control target
= control target key end

     0   :  { %s76_s10 = smov 112   ;;  %s77_s11 = smov 80   ;;  %vm4_vm0 = vcmask 130048   ;;  %vm10_vm1 = vcmask 1048448   ;;  %vm16_vm2 = vcmask 917248   ;;  %vm22_vm3 = vcmask 786048   ;;  %s123_s0 = inlined_call_operand.vmem [shape: f32[10,16], index: 0, kind: input, shape index: {}]   ;;  %s124_s1 = inlined_call_operand.vmem [shape: f32[1,160], index: 1, kind: output, shape index: {}]  }
   0x1   :  { %v61_v0 = vld [vmem:[%s123_s0 + $0x7] sm:$0x1]   ;;  %v63_v1 = vld [vmem:[%s123_s0 + $0x5] sm:$0x1]   ;;  %v65_v2 = vld [vmem:[%s123_s0 + $0x3] sm:$0x1]  }
   0x2   :  { %8 = vrot.lane.b32.xlu0 %v61_v0, %s76_s10  ;;  %20 = vrot.lane.b32.xlu1 %v63_v1, %s77_s11  ;;  %s78_s14 = smov 48   ;;  %v62_v3 = vld [vmem:[%s123_s0 + $0x6] sm:$0x1]   ;;  %v64_v4 = vld [vmem:[%s123_s0 + $0x4] sm:$0x1]   ;;  %s79_s19 = smov 96  }
   0x3   :  { %32 = vrot.lane.b32.xlu2 %v65_v2, %s78_s14  ;;  %s80_s20 = smov 64   ;;  %v66_v5 = vld [vmem:[%s123_s0 + $0x2] sm:$0x1]   ;;  %s43_s23 = smov 3  ;;  %vm28_vm4 = vcmask 654848   ;;  %vm34_vm5 = vcmask 523648  }
   0x4   :  { %s81_s24 = smov 32   ;;  %v67_v6 = vld [vmem:[%s123_s0 + $0x1] ss:$8 sm:%s43_s23]   ;;  %s82_s27 = smov 16   ;;  %vm40_vm6 = vcmask 392448   ;;  %vm47_vm7 = vcmask 261248  }
   0x5   :  { %s2_s28 = smov 3 }
   0x6   :  { %v3_v7 = vld [vmem:[%s123_s0] ss:$8 sm:%s2_s28]  }
   0x7   :  { %5 = vst.msk [vmem:[#allocation0] ss:$8 sm:$0x3] %vm4_vm0, %v3_v7  }
   0xa   :  { %14 = vrot.lane.b32.xlu0 %v62_v3, %s79_s19  ;;  %26 = vrot.lane.b32.xlu1 %v64_v4, %s80_s20 }
   0xb   :  { %38 = vrot.lane.b32.xlu2 %v66_v5, %s81_s24 }
  0x12   :  { %45 = vrot.lane.b32.xlu0 %v67_v6, %s82_s27 }
  0x5d   :  { %v33_v8 = vpop.permute.xlu2 %32  }
  0x65   :  { %v39_v9 = vpop.permute.xlu2 %38  }
  0x74   :  { %v9_v10 = vpop.permute.xlu0 %8   ;;  %v21_v11 = vpop.permute.xlu1 %20  }
  0x75   :  { %11 = vst.msk [vmem:[#allocation0] sm:$0x1] %vm10_vm1, %v9_v10  }
  0x7c   :  { %v15_v12 = vpop.permute.xlu0 %14   ;;  %v27_v13 = vpop.permute.xlu1 %26  }
  0x7d   :  { %17 = vst.msk [vmem:[#allocation0] sm:$0x1] %vm16_vm2, %v15_v12  }
  0x7e   :  { %23 = vst.msk [vmem:[#allocation0] sm:$0x1] %vm22_vm3, %v21_v11  }
  0x7f   :  { %29 = vst.msk [vmem:[#allocation0] sm:$0x1] %vm28_vm4, %v27_v13  }
  0x80   :  { %35 = vst.msk [vmem:[#allocation0] sm:$0x1] %vm34_vm5, %v33_v8  }
  0x81   :  { %41 = vst.msk [vmem:[#allocation0] sm:$0x1] %vm40_vm6, %v39_v9  }
  0x84   :  { %v46_v14 = vpop.permute.xlu0 %45  }
  0x85   :  { %48 = vst.msk [vmem:[#allocation0] ss:$8 sm:$0x3] %vm47_vm7, %v46_v14  }
  0x8c   :  { %v51_v15 = vld [vmem:[#allocation0] sm:$0x1]  ;;  %v56_v16 = vld [vmem:[#allocation0 + $0x8] sm:$0x1] }
  0x8d   :  { %54 = vst [vmem:[%s124_s1] sm:$0x1] %v51_v15 }
  0x8e   :  { %68 = vst [vmem:[%s124_s1 + $0x1] sm:$0x1] %v56_v16 }

// kernel: lenet_batch_forward.7
= control target key start
LH: loop header
LB: loop body
LE: loop exit
PB: predicated region body
PF: predicated region fallthrough
CT: control target
= control target key end

     0   :  { %vm21_vm0 = vcmask 1041408   ;;  %vm22_vm1 = vcmask 257026   ;;  %v1088_v1 = vmov 0.0   ;;  %v1123_v2 = vmov 0.0   ;;  %s1131_s19 = smov 0   ;;  %s1540_s0 = inlined_call_operand.vmem [shape: f32[4,14,84], index: 0, kind: input, shape index: {}]   ;;  %s1541_s1 = inlined_call_operand.vmem [shape: bf16[5,84,160], index: 1, kind: input, shape index: {}]   ;;  %s1542_s2 = inlined_call_operand.vmem [shape: f32[1,160], index: 2, kind: input, shape index: {}]   ;;  %s1543_s3 = inlined_call_operand.vmem [shape: f32[4,10,160], index: 3, kind: output, shape index: {0}]   ;;  %s1544_s4 = inlined_call_operand.vmem [shape: f32[2,160], index: 4, kind: output, shape index: {1}]  }
   0x1   :  { %vm23_vm2 = vmor %vm22_vm1, %vm21_vm0  ;;  %v1118_v0 = vld [vmem:[%s1542_s2] sm:$0x3]  ;;  %v1125_v3 = vmov 0.0   ;;  %v1127_v4 = vmov 0.0   ;;  %v1129_v5 = vmov 0.0  }
   0x2   :  { %24 = vst.msk [vmem:[%s1544_s4] sm:$0xf] %vm23_vm2, %v1088_v1 }
   0x3 LB: > { %v708_v6 = vld [vmem:[%s1541_s1 + $0xa8] sm:$0x33]  ;;  %v51_v7 = vld [vmem:[%s1541_s1 + $0x50] sm:$0x33]  ;;  %v743_v12 = vld [vmem:[%s1541_s1 + $0x98] sm:$0xf]  ;;  %s1086_s19 = sphi %s1131_s19, %s31_s19   ;;  %v1082_v5 = vphi %v1129_v5, %v1548_v5   ;;  %v1078_v4 = vphi %v1127_v4, %v1547_v4   ;;  %v1074_v3 = vphi %v1125_v3, %v1546_v3   ;;  %v1070_v2 = vphi %v1123_v2, %v1545_v2  }
   0x4   : > { %v98_v8 = vunpack.c.l.b16 %v708_v6  ;;  %v99_v9 = vunpack.c.h.b16 %v708_v6  ;;  %v192_v10 = vunpack.c.l.b16 %v51_v7  ;;  %v193_v11 = vunpack.c.h.b16 %v51_v7  ;;  %v975_v13 = vld [vmem:[%s1541_s1 + $0x9c] sm:$0xf0]  ;;  %v974_v18 = vld [vmem:[%s1541_s1 + $0x9c] sm:$0xf]  ;;  %v745_v19 = vld [vmem:[%s1541_s1 + $0xa0] sm:$0xf0] }
   0x5   : > { %v785_v20 = vld [vmem:[%s1541_s1 + $0x40] sm:$0xf]  ;;  %v965_v21 = vld [vmem:[%s1541_s1 + $0x44] sm:$0xf0]  ;;  %v964_v22 = vld [vmem:[%s1541_s1 + $0x44] sm:$0xf]  ;;  %v744_v28 = vor.u32 %v975_v13, %v743_v12  ;;  %v748_v29 = vor.u32 %v974_v18, %v745_v19 }
   0x6   : > { %v110_v14 = vpack.c.b16 %v98_v8, %v98_v8  ;;  %v111_v15 = vpack.c.b16 %v99_v9, %v99_v9  ;;  %v204_v16 = vpack.c.b16 %v192_v10, %v192_v10  ;;  %v205_v17 = vpack.c.b16 %v193_v11, %v193_v11  ;;  %v787_v23 = vld [vmem:[%s1541_s1 + $0x48] sm:$0xf0]  ;;  %v735_v30 = vld [vmem:[%s1541_s1 + $0x88] sm:$0xf]  ;;  %v973_v31 = vld [vmem:[%s1541_s1 + $0x8c] sm:$0xf0] }
   0x7   : > { %v786_v32 = vor.u32 %v965_v21, %v785_v20  ;;  %v790_v33 = vor.u32 %v964_v22, %v787_v23  ;;  %v972_v34 = vld [vmem:[%s1541_s1 + $0x8c] sm:$0xf]  ;;  %v737_v35 = vld [vmem:[%s1541_s1 + $0x90] sm:$0xf0]  ;;  %v777_v36 = vld [vmem:[%s1541_s1 + $0x30] sm:$0xf]  ;;  %v736_v40 = vor.u32 %v973_v31, %v735_v30 }
   0x8   : > { %v128_v24 = vsel %vm21_vm0, %v110_v14, 0  ;;  %v131_v25 = vsel %vm21_vm0, %v111_v15, 0  ;;  %v220_v26 = vsel %vm21_vm0, %v204_v16, 0  ;;  %v223_v27 = vsel %vm21_vm0, %v205_v17, 0  ;;  %v963_v37 = vld [vmem:[%s1541_s1 + $0x34] sm:$0xf0] }
   0x9   : > { %135 = vmatpush.bf16.msra.mxu0 %v128_v24  ;;  %149 = vmatpush.bf16.msra.mxu1 %v131_v25  ;;  %v962_v38 = vld [vmem:[%s1541_s1 + $0x34] sm:$0xf]  ;;  %v779_v39 = vld [vmem:[%s1541_s1 + $0x38] sm:$0xf0]  ;;  %v740_v41 = vor.u32 %v972_v34, %v737_v35  ;;  %v727_v42 = vld [vmem:[%s1541_s1 + $0x78] sm:$0xf]  ;;  %v778_v44 = vor.u32 %v963_v37, %v777_v36 }
   0xa   : > { %227 = vmatpush.bf16.msra.mxu2 %v220_v26  ;;  %241 = vmatpush.bf16.msra.mxu3 %v223_v27  ;;  %v971_v43 = vld [vmem:[%s1541_s1 + $0x7c] sm:$0xf0]  ;;  %v782_v45 = vor.u32 %v962_v38, %v779_v39  ;;  %v970_v46 = vld [vmem:[%s1541_s1 + $0x7c] sm:$0xf]  ;;  %v729_v47 = vld [vmem:[%s1541_s1 + $0x80] sm:$0xf0] }
   0xb   : > { %v769_v48 = vld [vmem:[%s1541_s1 + $0x20] sm:$0xf]  ;;  %v961_v49 = vld [vmem:[%s1541_s1 + $0x24] sm:$0xf0]  ;;  %v960_v50 = vld [vmem:[%s1541_s1 + $0x24] sm:$0xf]  ;;  %v728_v53 = vor.u32 %v971_v43, %v727_v42  ;;  %v732_v54 = vor.u32 %v970_v46, %v729_v47 }
   0xc   : > { %v771_v51 = vld [vmem:[%s1541_s1 + $0x28] sm:$0xf0]  ;;  %v719_v52 = vld [vmem:[%s1541_s1 + $0x68] sm:$0xf]  ;;  %v969_v55 = vld [vmem:[%s1541_s1 + $0x6c] sm:$0xf0]  ;;  %v770_v58 = vor.u32 %v961_v49, %v769_v48 }
   0xd   : > { %136 = vmatpush.bf16.msra.mxu0 %v744_v28  ;;  %150 = vmatpush.bf16.msra.mxu1 %v748_v29  ;;  %v968_v56 = vld [vmem:[%s1541_s1 + $0x6c] sm:$0xf]  ;;  %v803_v57 = vld [vmem:[%s1541_s1 + $0x100] sm:$0x33]  ;;  %v774_v59 = vor.u32 %v960_v50, %v771_v51  ;;  %v721_v60 = vld [vmem:[%s1541_s1 + $0x70] sm:$0xf0]  ;;  %v720_v9 = vor.u32 %v969_v55, %v719_v52 }
   0xe   : > { %228 = vmatpush.bf16.msra.mxu2 %v786_v32  ;;  %242 = vmatpush.bf16.msra.mxu3 %v790_v33  ;;  %v761_v61 = vld [vmem:[%s1541_s1 + $0x10] sm:$0xf]  ;;  %v856_v62 = vld [vmem:[%s1541_s1 + $0x158] sm:$0x33]  ;;  %v958_v1 = vld [vmem:[%s1541_s1 + $0x14] sm:$0xf]  ;;  %v299_v7 = vunpack.c.l.b16 %v803_v57  ;;  %v300_v8 = vunpack.c.h.b16 %v803_v57  ;;  %v724_v10 = vor.u32 %v968_v56, %v721_v60 }
   0xf   : > { %v959_v63 = vld [vmem:[%s1541_s1 + $0x14] sm:$0xf0]  ;;  %v763_v6 = vld [vmem:[%s1541_s1 + $0x18] sm:$0xf0]  ;;  %s697_s13 = sshll.u32 %s1086_s19, 4  ;;  %v410_v13 = vunpack.c.l.b16 %v856_v62  ;;  %v411_v14 = vunpack.c.h.b16 %v856_v62  ;;  %vm122_vm3 = vcmask 687104  }
  0x10   : > { %v711_v11 = vld [vmem:[%s1541_s1 + $0x58] sm:$0xf]  ;;  %v967_v12 = vld [vmem:[%s1541_s1 + $0x5c] sm:$0xf0]  ;;  %v762_v15 = vor.u32 %v959_v63, %v761_v61  ;;  %v766_v16 = vor.u32 %v958_v1, %v763_v6  ;;  %v966_v17 = vld [vmem:[%s1541_s1 + $0x5c] sm:$0xf]  ;;  %s1288_s6 = scalar_lea.vmem %s1540_s0, %s697_s13  ;;  %v311_v24 = vpack.c.b16 %v299_v7, %v299_v7  ;;  %v312_v25 = vpack.c.b16 %v300_v8, %v300_v8 }
  0x11   : > { %137 = vmatpush.bf16.msra.mxu0 %v736_v40  ;;  %151 = vmatpush.bf16.msra.mxu1 %v740_v41  ;;  %v713_v18 = vld [vmem:[%s1541_s1 + $0x60] sm:$0xf0]  ;;  %v753_v19 = vld [vmem:[%s1541_s1] sm:$0xf]  ;;  %v957_v20 = vld [vmem:[%s1541_s1 + $0x4] sm:$0xf0]  ;;  %v712_v23 = vor.u32 %v967_v12, %v711_v11  ;;  %v422_v27 = vpack.c.b16 %v410_v13, %v410_v13  ;;  %v423_v28 = vpack.c.b16 %v411_v14, %v411_v14 }
  0x12   : > { %229 = vmatpush.bf16.msra.mxu2 %v778_v44  ;;  %243 = vmatpush.bf16.msra.mxu3 %v782_v45  ;;  %v956_v21 = vld [vmem:[%s1541_s1 + $0x4] sm:$0xf]  ;;  %v755_v22 = vld [vmem:[%s1541_s1 + $0x8] sm:$0xf0]  ;;  %v716_v26 = vor.u32 %v966_v17, %v713_v18  ;;  %v754_v29 = vor.u32 %v957_v20, %v753_v19  ;;  %v39_v32 = vld [vmem:[%s1288_s6 + $0x8] sm:$0x3] }
  0x13   : > { %v758_v30 = vor.u32 %v956_v21, %v755_v22  ;;  %v38_v31 = vld [vmem:[%s1288_s6] sm:$0xff]  ;;  %v838_v33 = vld [vmem:[%s1541_s1 + $0xf0] sm:$0xf]  ;;  %v985_v34 = vld [vmem:[%s1541_s1 + $0xf4] sm:$0xf0]  ;;  %v327_v39 = vsel %vm21_vm0, %v311_v24, 0 }
  0x14   : > { %v984_v35 = vld [vmem:[%s1541_s1 + $0xf4] sm:$0xf]  ;;  %v52_v36 = vld [vmem:[%s1288_s6 + $0x1] sm:$0xff]  ;;  %v53_v37 = vld [vmem:[%s1288_s6 + $0x9] sm:$0x3]  ;;  %v330_v40 = vsel %vm21_vm0, %v312_v25, 0  ;;  %v40_v45 = vpack.c.bf16 %v39_v32, %v38_v31  ;;  %v839_v49 = vor.u32 %v985_v34, %v838_v33 }
  0x15   : > { %138 = vmatpush.bf16.msra.mxu0 %v728_v53  ;;  %152 = vmatpush.bf16.msra.mxu1 %v732_v54  ;;  %v840_v38 = vld [vmem:[%s1541_s1 + $0xf8] sm:$0xf0]  ;;  %v891_v41 = vld [vmem:[%s1541_s1 + $0x148] sm:$0xf]  ;;  %v995_v42 = vld [vmem:[%s1541_s1 + $0x14c] sm:$0xf0]  ;;  %v54_v48 = vpack.c.bf16 %v53_v37, %v52_v36 }
  0x16   : > { %230 = vmatpush.bf16.msra.mxu2 %v770_v58  ;;  %244 = vmatpush.bf16.msra.mxu3 %v774_v59  ;;  %v438_v43 = vsel %vm21_vm0, %v422_v27, 0  ;;  %v441_v44 = vsel %vm21_vm0, %v423_v28, 0  ;;  %v994_v46 = vld [vmem:[%s1541_s1 + $0x14c] sm:$0xf]  ;;  %v893_v47 = vld [vmem:[%s1541_s1 + $0x150] sm:$0xf0]  ;;  %v843_v50 = vor.u32 %v984_v35, %v840_v38  ;;  %v892_v53 = vor.u32 %v995_v42, %v891_v41 }
  0x17   : > { %v830_v51 = vld [vmem:[%s1541_s1 + $0xe0] sm:$0xf]  ;;  %v983_v52 = vld [vmem:[%s1541_s1 + $0xe4] sm:$0xf0]  ;;  %v896_v54 = vor.u32 %v994_v46, %v893_v47  ;;  %v982_v55 = vld [vmem:[%s1541_s1 + $0xe4] sm:$0xf] }
  0x18   : > { %v832_v56 = vld [vmem:[%s1541_s1 + $0xe8] sm:$0xf0]  ;;  %v883_v57 = vld [vmem:[%s1541_s1 + $0x138] sm:$0xf]  ;;  %v993_v58 = vld [vmem:[%s1541_s1 + $0x13c] sm:$0xf0]  ;;  %v831_v61 = vor.u32 %v983_v52, %v830_v51 }
  0x19   : > { %139 = vmatpush.bf16.msra.mxu0 %v720_v9  ;;  %153 = vmatpush.bf16.msra.mxu1 %v724_v10  ;;  %v992_v59 = vld [vmem:[%s1541_s1 + $0x13c] sm:$0xf]  ;;  %v885_v60 = vld [vmem:[%s1541_s1 + $0x140] sm:$0xf0]  ;;  %v835_v62 = vor.u32 %v982_v55, %v832_v56  ;;  %v822_v63 = vld [vmem:[%s1541_s1 + $0xd0] sm:$0xf]  ;;  %v884_v6 = vor.u32 %v993_v58, %v883_v57 }
  0x1a   : > { %231 = vmatpush.bf16.msra.mxu2 %v762_v15  ;;  %245 = vmatpush.bf16.msra.mxu3 %v766_v16  ;;  %v981_v1 = vld [vmem:[%s1541_s1 + $0xd4] sm:$0xf0]  ;;  %v888_v7 = vor.u32 %v992_v59, %v885_v60  ;;  %v980_v8 = vld [vmem:[%s1541_s1 + $0xd4] sm:$0xf]  ;;  %v824_v9 = vld [vmem:[%s1541_s1 + $0xd8] sm:$0xf0] }
  0x1b   : > { %v875_v10 = vld [vmem:[%s1541_s1 + $0x128] sm:$0xf]  ;;  %v991_v11 = vld [vmem:[%s1541_s1 + $0x12c] sm:$0xf0]  ;;  %v990_v12 = vld [vmem:[%s1541_s1 + $0x12c] sm:$0xf]  ;;  %v823_v14 = vor.u32 %v981_v1, %v822_v63  ;;  %v827_v15 = vor.u32 %v980_v8, %v824_v9 }
  0x1c   : > { %v877_v13 = vld [vmem:[%s1541_s1 + $0x130] sm:$0xf0]  ;;  %v814_v16 = vld [vmem:[%s1541_s1 + $0xc0] sm:$0xf]  ;;  %v979_v17 = vld [vmem:[%s1541_s1 + $0xc4] sm:$0xf0]  ;;  %v876_v19 = vor.u32 %v991_v11, %v875_v10 }
  0x1d   : > { %140 = vmatpush.bf16.msra.mxu0 %v712_v23  ;;  %154 = vmatpush.bf16.msra.mxu1 %v716_v26  ;;  %v909_v18 = vld [vmem:[%s1541_s1 + $0x1b0] sm:$0x33]  ;;  %v880_v20 = vor.u32 %v990_v12, %v877_v13  ;;  %v978_v21 = vld [vmem:[%s1541_s1 + $0xc4] sm:$0xf]  ;;  %v816_v22 = vld [vmem:[%s1541_s1 + $0xc8] sm:$0xf0] }
  0x1e   : > { %232 = vmatpush.bf16.msra.mxu2 %v754_v29  ;;  %246 = vmatpush.bf16.msra.mxu3 %v758_v30  ;;  %v867_v23 = vld [vmem:[%s1541_s1 + $0x118] sm:$0xf]  ;;  %v989_v24 = vld [vmem:[%s1541_s1 + $0x11c] sm:$0xf0]  ;;  %v988_v25 = vld [vmem:[%s1541_s1 + $0x11c] sm:$0xf]  ;;  %v521_v27 = vunpack.c.l.b16 %v909_v18  ;;  %v522_v28 = vunpack.c.h.b16 %v909_v18  ;;  %v815_v29 = vor.u32 %v979_v17, %v814_v16  ;;  %v819_v30 = vor.u32 %v978_v21, %v816_v22 }
  0x1f   : > { %v869_v26 = vld [vmem:[%s1541_s1 + $0x120] sm:$0xf0]  ;;  %v806_v31 = vld [vmem:[%s1541_s1 + $0xb0] sm:$0xf]  ;;  %v977_v32 = vld [vmem:[%s1541_s1 + $0xb4] sm:$0xf0]  ;;  %v868_v33 = vor.u32 %v989_v24, %v867_v23 }
  0x20   : > { %749 = vmatmul.msk.bf16.vlgmr.msra.gmra.mxu0 %vm122_vm3, %v54_v48  ;;  %750 = vmatmul.msk.bf16.vlgmr.msra.gmra.mxu1 %vm122_vm3, %v54_v48  ;;  %v872_v34 = vor.u32 %v988_v25, %v869_v26  ;;  %v976_v35 = vld [vmem:[%s1541_s1 + $0xb4] sm:$0xf]  ;;  %v808_v36 = vld [vmem:[%s1541_s1 + $0xb8] sm:$0xf0]  ;;  %v859_v37 = vld [vmem:[%s1541_s1 + $0x108] sm:$0xf]  ;;  %v533_v41 = vpack.c.b16 %v521_v27, %v521_v27  ;;  %v534_v42 = vpack.c.b16 %v522_v28, %v522_v28 }
  0x21   : > { %334 = vmatpush.bf16.msrb.mxu0 %v327_v39  ;;  %348 = vmatpush.bf16.msrb.mxu1 %v330_v40  ;;  %v987_v38 = vld [vmem:[%s1541_s1 + $0x10c] sm:$0xf0]  ;;  %v986_v39 = vld [vmem:[%s1541_s1 + $0x10c] sm:$0xf]  ;;  %v861_v40 = vld [vmem:[%s1541_s1 + $0x110] sm:$0xf0] }
  0x22   : > { %445 = vmatpush.bf16.msrb.mxu2 %v438_v43  ;;  %459 = vmatpush.bf16.msrb.mxu3 %v441_v44  ;;  %v807_v43 = vor.u32 %v977_v32, %v806_v31  ;;  %v811_v44 = vor.u32 %v976_v35, %v808_v36  ;;  %v254_v46 = vld [vmem:[%s1288_s6 + $0xa] sm:$0x3]  ;;  %v860_v47 = vor.u32 %v987_v38, %v859_v37  ;;  %v944_v51 = vld [vmem:[%s1541_s1 + $0x1a0] sm:$0xf]  ;;  %v1004_v56 = vld [vmem:[%s1541_s1 + $0x1a4] sm:$0xf] }
  0x23   : > { %791 = vmatmul.msk.bf16.vlgmr.msra.gmra.mxu2 %vm122_vm3, %v40_v45  ;;  %792 = vmatmul.msk.bf16.vlgmr.msra.gmra.mxu3 %vm122_vm3, %v40_v45  ;;  %v253_v45 = vld [vmem:[%s1288_s6 + $0x2] sm:$0xff]  ;;  %v864_v48 = vor.u32 %v986_v39, %v861_v40  ;;  %v946_v57 = vld [vmem:[%s1541_s1 + $0x1a8] sm:$0xf0]  ;;  %v1002_v63 = vld [vmem:[%s1541_s1 + $0x194] sm:$0xf]  ;;  %vm599_vm4 = vcmask 261120  }
  0x24   : > { %v1005_v52 = vld [vmem:[%s1541_s1 + $0x1a4] sm:$0xf0]  ;;  %v255_v55 = vpack.c.bf16 %v254_v46, %v253_v45  ;;  %v949_v60 = vor.u32 %v1004_v56, %v946_v57  ;;  %v938_v1 = vld [vmem:[%s1541_s1 + $0x198] sm:$0xf0]  ;;  %v928_v8 = vld [vmem:[%s1541_s1 + $0x180] sm:$0xf] }
  0x25   : > { %335 = vmatpush.bf16.msrb.mxu0 %v839_v49  ;;  %349 = vmatpush.bf16.msrb.mxu1 %v843_v50  ;;  %v364_v49 = vld [vmem:[%s1288_s6 + $0x3] sm:$0xff]  ;;  %v365_v50 = vld [vmem:[%s1288_s6 + $0xb] sm:$0x3]  ;;  %v945_v59 = vor.u32 %v1005_v52, %v944_v51  ;;  %v998_v16 = vld [vmem:[%s1541_s1 + $0x174] sm:$0xf]  ;;  %vm602_vm5 = vcmask 254976  }
  0x26   : > { %446 = vmatpush.bf16.msrb.mxu2 %v892_v53  ;;  %460 = vmatpush.bf16.msrb.mxu3 %v896_v54  ;;  %v549_v53 = vsel %vm21_vm0, %v533_v41, 0  ;;  %v552_v54 = vsel %vm21_vm0, %v534_v42, 0  ;;  %v366_v58 = vpack.c.bf16 %v365_v50, %v364_v49  ;;  %v1001_v9 = vld [vmem:[%s1541_s1 + $0x184] sm:$0xf0]  ;;  %v1000_v10 = vld [vmem:[%s1541_s1 + $0x184] sm:$0xf] }
  0x27   : > { %v930_v11 = vld [vmem:[%s1541_s1 + $0x188] sm:$0xf0]  ;;  %v929_v12 = vor.u32 %v1001_v9, %v928_v8  ;;  %v922_v17 = vld [vmem:[%s1541_s1 + $0x178] sm:$0xf0]  ;;  %v997_v21 = vld [vmem:[%s1541_s1 + $0x164] sm:$0xf0] }
  0x28   : > { %v933_v13 = vor.u32 %v1000_v10, %v930_v11  ;;  %v996_v22 = vld [vmem:[%s1541_s1 + $0x164] sm:$0xf]  ;;  %v914_v23 = vld [vmem:[%s1541_s1 + $0x168] sm:$0xf0]  ;;  %v587_v49 = vperm.slane %v1118_v0, 0  ;;  %v588_v50 = vperm.slane %v1118_v0, 1 }
  0x29   : > { %336 = vmatpush.bf16.msrb.mxu0 %v831_v61  ;;  %350 = vmatpush.bf16.msrb.mxu1 %v835_v62  ;;  %v936_v61 = vld [vmem:[%s1541_s1 + $0x190] sm:$0xf]  ;;  %v1003_v62 = vld [vmem:[%s1541_s1 + $0x194] sm:$0xf0]  ;;  %v917_v25 = vor.u32 %v996_v22, %v914_v23  ;;  %v475_v26 = vld [vmem:[%s1288_s6 + $0x4] sm:$0xff] }
  0x2a   : > { %447 = vmatpush.bf16.msrb.mxu2 %v884_v6  ;;  %461 = vmatpush.bf16.msrb.mxu3 %v888_v7  ;;  %v937_v6 = vor.u32 %v1003_v62, %v936_v61  ;;  %v941_v7 = vor.u32 %v1002_v63, %v938_v1  ;;  %v476_v27 = vld [vmem:[%s1288_s6 + $0xc] sm:$0x3]  ;;  %s1006_s6 = sshll.u32 %s1086_s19, 5  ;;  %s31_s19 = sadd.s32 1, %s1086_s19  }
  0x2b   : > { %v477_v28 = vpack.c.bf16 %v476_v27, %v475_v26  ;;  %s597_s5 = scalar_lea.vmem %s1543_s3, %s1006_s6  ;;  %p28_p0 = scmp.ge.s32.totalorder %s31_s19, 4  }
  0x2c   :  { %vm650_vm6 = vcmask (%p28_p0), 1040384  }
  0x2d   : > { %337 = vmatpush.bf16.msrb.mxu0 %v823_v14  ;;  %351 = vmatpush.bf16.msrb.mxu1 %v827_v15  ;;  %v920_v14 = vld [vmem:[%s1541_s1 + $0x170] sm:$0xf]  ;;  %v999_v15 = vld [vmem:[%s1541_s1 + $0x174] sm:$0xf0] }
  0x2e   : > { %448 = vmatpush.bf16.msrb.mxu2 %v876_v19  ;;  %462 = vmatpush.bf16.msrb.mxu3 %v880_v20  ;;  %v921_v18 = vor.u32 %v999_v15, %v920_v14  ;;  %v925_v19 = vor.u32 %v998_v16, %v922_v17  ;;  %v912_v20 = vld [vmem:[%s1541_s1 + $0x160] sm:$0xf] }
  0x2f   : > { %v913_v24 = vor.u32 %v997_v21, %v912_v20 }
  0x31   : > { %338 = vmatpush.bf16.msrb.mxu0 %v815_v29  ;;  %352 = vmatpush.bf16.msrb.mxu1 %v819_v30 }
  0x32   : > { %449 = vmatpush.bf16.msrb.mxu2 %v868_v33  ;;  %463 = vmatpush.bf16.msrb.mxu3 %v872_v34 }
  0x35   : > { %339 = vmatpush.bf16.msrb.mxu0 %v807_v43  ;;  %353 = vmatpush.bf16.msrb.mxu1 %v811_v44 }
  0x36   : > { %450 = vmatpush.bf16.msrb.mxu2 %v860_v47  ;;  %464 = vmatpush.bf16.msrb.mxu3 %v864_v48 }
  0x38   : > { %844 = vmatmul.msk.bf16.vlgmr.msrb.gmra.mxu0 %vm122_vm3, %v255_v55  ;;  %845 = vmatmul.msk.bf16.vlgmr.msrb.gmra.mxu1 %vm122_vm3, %v255_v55 }
  0x39   : > { %556 = vmatpush.bf16.msra.mxu0 %v549_v53  ;;  %570 = vmatpush.bf16.msra.mxu1 %v552_v54 }
  0x3a   : > { %897 = vmatmul.msk.bf16.vlgmr.msrb.gmra.mxu2 %vm122_vm3, %v366_v58  ;;  %898 = vmatmul.msk.bf16.vlgmr.msrb.gmra.mxu3 %vm122_vm3, %v366_v58 }
  0x3d   : > { %557 = vmatpush.bf16.msra.mxu0 %v945_v59  ;;  %571 = vmatpush.bf16.msra.mxu1 %v949_v60 }
  0x41   : > { %558 = vmatpush.bf16.msra.mxu0 %v937_v6  ;;  %572 = vmatpush.bf16.msra.mxu1 %v941_v7 }
  0x45   : > { %559 = vmatpush.bf16.msra.mxu0 %v929_v12  ;;  %573 = vmatpush.bf16.msra.mxu1 %v933_v13 }
  0x49   : > { %560 = vmatpush.bf16.msra.mxu0 %v921_v18  ;;  %574 = vmatpush.bf16.msra.mxu1 %v925_v19 }
  0x4d   : > { %561 = vmatpush.bf16.msra.mxu0 %v913_v24  ;;  %575 = vmatpush.bf16.msra.mxu1 %v917_v25 }
  0x50   : > { %950 = vmatmul.msk.bf16.vlgmr.msra.gmra.mxu0 %vm122_vm3, %v477_v28  ;;  %951 = vmatmul.msk.bf16.vlgmr.msra.gmra.mxu1 %vm122_vm3, %v477_v28 }
  0x9d   : > { %v142_v29 = vpop.f32.mrf.mxu0  ;;  %v156_v30 = vpop.f32.mrf.mxu1 }
  0xa5   : > { %v144_v31 = vpop.f32.mrf.mxu0  ;;  %v158_v32 = vpop.f32.mrf.mxu1 }
  0xa6   : > { %v234_v33 = vpop.f32.mrf.mxu2  ;;  %v248_v34 = vpop.f32.mrf.mxu3 }
  0xa7   : > { %v235_v43 = vadd.f32 %v234_v33, %v142_v29  ;;  %v249_v44 = vadd.f32 %v248_v34, %v156_v30 }
  0xae   : > { %v236_v37 = vpop.f32.mrf.mxu2  ;;  %v250_v38 = vpop.f32.mrf.mxu3 }
  0xaf   : > { %v237_v55 = vadd.f32 %v236_v37, %v144_v31  ;;  %v251_v56 = vadd.f32 %v250_v38, %v158_v32 }
  0xb5   : > { %v341_v35 = vpop.f32.mrf.mxu0  ;;  %v355_v36 = vpop.f32.mrf.mxu1 }
  0xb6   : > { %v360_v45 = vadd.f32 %v341_v35, %v235_v43  ;;  %v361_v46 = vadd.f32 %v355_v36, %v249_v44 }
  0xbd   : > { %v343_v39 = vpop.f32.mrf.mxu0  ;;  %v357_v40 = vpop.f32.mrf.mxu1 }
  0xbe   : > { %v452_v41 = vpop.f32.mrf.mxu2  ;;  %v466_v42 = vpop.f32.mrf.mxu3  ;;  %v362_v61 = vadd.f32 %v343_v39, %v237_v55  ;;  %v363_v62 = vadd.f32 %v357_v40, %v251_v56  ;;  %v654_v55 = vlaneseq (%p28_p0) }
  0xbf   : > { %v471_v47 = vadd.f32 %v452_v41, %v360_v45  ;;  %v472_v48 = vadd.f32 %v466_v42, %v361_v46 }
  0xc0   :  { %vm656_vm7 = vcmp.lt.s32.totalorder (%p28_p0), %v654_v55, 160 }
  0xc6   : > { %v454_v59 = vpop.f32.mrf.mxu2  ;;  %v468_v60 = vpop.f32.mrf.mxu3 }
  0xc7   : > { %v473_v63 = vadd.f32 %v454_v59, %v362_v61  ;;  %v474_v1 = vadd.f32 %v468_v60, %v363_v62 }
  0xcd   : > { %v563_v51 = vpop.f32.mrf.mxu0  ;;  %v577_v52 = vpop.f32.mrf.mxu1 }
  0xce   : > { %v582_v53 = vadd.f32 %v563_v51, %v471_v47  ;;  %v583_v54 = vadd.f32 %v577_v52, %v472_v48 }
  0xd0   : > { %v591_v57 = vadd.f32 %v587_v49, %v582_v53  ;;  %v592_v58 = vadd.f32 %v588_v50, %v583_v54 }
  0xd2   : > { %598 = vst [vmem:[%s597_s5] sm:$0xff] %v591_v57  ;;  %v624_v10 = vmul.f32 %v592_v58, %v592_v58  ;;  %v612_v13 = vsel %vm599_vm4, %v592_v58, 0.0  ;;  %v623_v18 = vmul.f32 %v591_v57, %v591_v57 }
  0xd3   : > { %600 = vst.msk [vmem:[%s597_s5 + $0x8] sm:$0xff] %vm599_vm4, %v592_v58 }
  0xd4   : > { %v635_v21 = vsel %vm599_vm4, %v624_v10, 0.0 }
  0xd5   : > { %v565_v6 = vpop.f32.mrf.mxu0  ;;  %v579_v7 = vpop.f32.mrf.mxu1 }
  0xd6   : > { %v584_v8 = vadd.f32 %v565_v6, %v473_v63  ;;  %v585_v9 = vadd.f32 %v579_v7, %v474_v1 }
  0xd8   : > { %v593_v11 = vadd.f32 %v587_v49, %v584_v8  ;;  %v594_v12 = vadd.f32 %v588_v50, %v585_v9 }
  0xda   : > { %601 = vst [vmem:[%s597_s5 + $0x10] sm:$0x3] %v593_v11  ;;  %v604_v14 = vsel %vm21_vm0, %v593_v11, 0.0  ;;  %v625_v15 = vmul.f32 %v593_v11, %v593_v11  ;;  %v613_v16 = vsel %vm602_vm5, %v594_v12, 0.0  ;;  %v626_v17 = vmul.f32 %v594_v12, %v594_v12 }
  0xdb   : > { %v605_v19 = vadd.f32 %v604_v14, %v591_v57  ;;  %603 = vst.msk [vmem:[%s597_s5 + $0x18] sm:$0x3] %vm602_vm5, %v594_v12  ;;  %v614_v20 = vadd.f32 %v613_v16, %v612_v13  ;;  %v954_v57 = vld [vmem:[%s1544_s4 + $0x1] ss:$2 sm:$0x3] (%p28_p0) }
  0xdc   : > { %v627_v22 = vsel %vm21_vm0, %v625_v15, 0.0  ;;  %v636_v23 = vsel %vm602_vm5, %v626_v17, 0.0 }
  0xdd   : > { %v606_v24 = vrot.slane %v605_v19, 4  ;;  %v628_v25 = vadd.f32 %v627_v22, %v623_v18  ;;  %v615_v26 = vrot.slane %v614_v20, 4  ;;  %v637_v27 = vadd.f32 %v636_v23, %v635_v21 }
  0xdf   : > { %v607_v28 = vadd.f32 %v606_v24, %v605_v19  ;;  %v629_v29 = vrot.slane %v628_v25, 4  ;;  %v616_v30 = vadd.f32 %v615_v26, %v614_v20  ;;  %v638_v31 = vrot.slane %v637_v27, 4 }
  0xe1   : > { %v608_v32 = vrot.slane %v607_v28, 2  ;;  %v630_v33 = vadd.f32 %v629_v29, %v628_v25  ;;  %v617_v34 = vrot.slane %v616_v30, 2  ;;  %v639_v35 = vadd.f32 %v638_v31, %v637_v27 }
  0xe3   : > { %v609_v36 = vadd.f32 %v608_v32, %v607_v28  ;;  %v631_v37 = vrot.slane %v630_v33, 2  ;;  %v618_v38 = vadd.f32 %v617_v34, %v616_v30  ;;  %v640_v39 = vrot.slane %v639_v35, 2 }
  0xe5   : > { %v610_v40 = vrot.slane %v609_v36, 1  ;;  %v632_v41 = vadd.f32 %v631_v37, %v630_v33  ;;  %v619_v42 = vrot.slane %v618_v38, 1  ;;  %v641_v43 = vadd.f32 %v640_v39, %v639_v35 }
  0xe7   : > { %v611_v44 = vadd.f32 %v610_v40, %v609_v36  ;;  %v633_v45 = vrot.slane %v632_v41, 1  ;;  %v620_v46 = vadd.f32 %v619_v42, %v618_v38  ;;  %v642_v47 = vrot.slane %v641_v43, 1 }
  0xe9   : > { %v621_v48 = vadd.f32 %v1082_v5, %v611_v44   ;;  %v634_v49 = vadd.f32 %v633_v45, %v632_v41  ;;  %v622_v50 = vadd.f32 %v1078_v4, %v620_v46   ;;  %v643_v51 = vadd.f32 %v642_v47, %v641_v43  ;;  %30 = sbr.rel (!%p28_p0) target bundleno = 3 (0x3), region = 58 }
  0xeb   : > { %v644_v52 = vadd.f32 %v1074_v3, %v634_v49   ;;  %v645_v53 = vadd.f32 %v1070_v2, %v643_v51   ;;  %v1547_v4 = vmov %v622_v50  ;;  %v1548_v5 = vmov %v621_v48 }
  0xec   :  { %v646_v5 = vld [vmem:[%s1544_s4] ss:$2 sm:$0x3] (%p28_p0)  ;;  %v649_v54 = vrot.slane (%p28_p0), %v622_v50, 7 }
  0xed   : > { %v1545_v2 = vmov %v645_v53  ;;  %v1546_v3 = vmov %v644_v52  ;;  %v663_v56 = vrot.slane (%p28_p0), %v645_v53, 7 }
  0xee   :  { %v651_v58 = vsel %vm650_vm6, %v621_v48, %v649_v54 }
  0xef   :  { %v664_v59 = vsel %vm650_vm6, %v644_v52, %v663_v56  ;;  %v653_v60 = vadd.f32 %v651_v58, %v646_v5 }
  0xf0   :  { %v666_v61 = vadd.f32 %v954_v57, %v664_v59 }
  0xf1   :  { %658 = vst.msk [vmem:[%s1544_s4] ss:$2 sm:$0x3] %vm656_vm7, %v653_v60 }
  0xf2   :  { %955 = vst.msk [vmem:[%s1544_s4 + $0x1] ss:$2 sm:$0x3] %vm656_vm7, %v666_v61 }

// kernel: lenet_batch_forward.8
= control target key start
LH: loop header
LB: loop body
LE: loop exit
PB: predicated region body
PF: predicated region fallthrough
CT: control target
= control target key end

     0   :  { %s747_s24 = smov 0   ;;  %s811_s0 = inlined_call_operand.vmem [shape: f32[4,10,160], index: 0, kind: input, shape index: {}]   ;;  %s812_s1 = inlined_call_operand.vmem [shape: f32[2,160], index: 1, kind: input, shape index: {}]   ;;  %s813_s2 = inlined_call_operand.vmem [shape: bf16[5,10], index: 2, kind: input, shape index: {}]   ;;  %s814_s3 = inlined_call_operand.vmem [shape: bf16[5,10], index: 3, kind: input, shape index: {}]   ;;  %s815_s4 = inlined_call_operand.vmem [shape: bf16[160,80], index: 4, kind: input, shape index: {}]   ;;  %s816_s6 = inlined_call_operand.vmem [shape: f32[4,5,80], index: 6, kind: output, shape index: {}]   ;;  %s817_s5 = inlined_call_operand.vmem [shape: bf16[160,80], index: 5, kind: input, shape index: {}]  }
   0x1   :  { %v535_v0 = vld [vmem:[%s812_s1] sm:$0xf]  ;;  %v555_v4 = vld [vmem:[%s815_s4] sm:$0xf0]  ;;  %v560_v5 = vld [vmem:[%s815_s4 + $0x8] sm:$0xf] }
   0x2   :  { %819 = vst [vmem:[#allocation2_spill] sm:$0xff] %v535_v0  ;;  %v540_v1 = vld [vmem:[%s813_s2] sm:$0x7]  ;;  %v565_v6 = vld [vmem:[%s815_s4 + $0x8] sm:$0xf0] }
   0x3   :  { %v545_v2 = vld [vmem:[%s814_s3] sm:$0x7]  ;;  %v570_v7 = vld [vmem:[%s815_s4 + $0x10] sm:$0xf]  ;;  %v575_v8 = vld [vmem:[%s815_s4 + $0x10] sm:$0xf0] }
   0x4   :  { %v550_v3 = vld [vmem:[%s815_s4] sm:$0xf]  ;;  %v580_v9 = vld [vmem:[%s815_s4 + $0x18] sm:$0xf]  ;;  %v585_v10 = vld [vmem:[%s815_s4 + $0x18] sm:$0xf0] }
   0x5   :  { %v590_v11 = vld [vmem:[%s815_s4 + $0x20] sm:$0xf]  ;;  %v595_v12 = vld [vmem:[%s815_s4 + $0x20] sm:$0xf0]  ;;  %v600_v13 = vld [vmem:[%s815_s4 + $0x28] sm:$0xf] }
   0x6   :  { %v605_v14 = vld [vmem:[%s815_s4 + $0x28] sm:$0xf0]  ;;  %v610_v15 = vld [vmem:[%s815_s4 + $0x30] sm:$0xf]  ;;  %v615_v16 = vld [vmem:[%s815_s4 + $0x30] sm:$0xf0] }
   0x7   :  { %v620_v17 = vld [vmem:[%s815_s4 + $0x38] sm:$0xf]  ;;  %v625_v18 = vld [vmem:[%s815_s4 + $0x38] sm:$0xf0]  ;;  %v630_v19 = vld [vmem:[%s815_s4 + $0x40] sm:$0xf] }
   0x8   :  { %v635_v20 = vld [vmem:[%s815_s4 + $0x40] sm:$0xf0]  ;;  %v640_v21 = vld [vmem:[%s815_s4 + $0x48] sm:$0xf]  ;;  %v645_v22 = vld [vmem:[%s815_s4 + $0x48] sm:$0xf0] }
   0x9   :  { %v650_v23 = vld [vmem:[%s817_s5] sm:$0xf]  ;;  %v655_v24 = vld [vmem:[%s817_s5] sm:$0xf0]  ;;  %v660_v25 = vld [vmem:[%s817_s5 + $0x8] sm:$0xf] }
   0xa   :  { %820 = vst [vmem:[#allocation3_spill] sm:$0xff] %v655_v24  ;;  %v665_v26 = vld [vmem:[%s817_s5 + $0x8] sm:$0xf0]  ;;  %v670_v27 = vld [vmem:[%s817_s5 + $0x10] sm:$0xf] }
   0xb   :  { %v675_v28 = vld [vmem:[%s817_s5 + $0x10] sm:$0xf0]  ;;  %v680_v29 = vld [vmem:[%s817_s5 + $0x18] sm:$0xf]  ;;  %v685_v30 = vld [vmem:[%s817_s5 + $0x18] sm:$0xf0] }
   0xc   :  { %v690_v31 = vld [vmem:[%s817_s5 + $0x20] sm:$0xf]  ;;  %v695_v32 = vld [vmem:[%s817_s5 + $0x20] sm:$0xf0]  ;;  %v700_v33 = vld [vmem:[%s817_s5 + $0x28] sm:$0xf] }
   0xd   :  { %v705_v34 = vld [vmem:[%s817_s5 + $0x28] sm:$0xf0]  ;;  %v710_v35 = vld [vmem:[%s817_s5 + $0x30] sm:$0xf]  ;;  %v715_v36 = vld [vmem:[%s817_s5 + $0x30] sm:$0xf0] }
   0xe   :  { %v720_v37 = vld [vmem:[%s817_s5 + $0x38] sm:$0xf]  ;;  %v725_v38 = vld [vmem:[%s817_s5 + $0x38] sm:$0xf0]  ;;  %v730_v39 = vld [vmem:[%s817_s5 + $0x40] sm:$0xf] }
   0xf   :  { %v735_v40 = vld [vmem:[%s817_s5 + $0x40] sm:$0xf0]  ;;  %v740_v41 = vld [vmem:[%s817_s5 + $0x48] sm:$0xf]  ;;  %v745_v42 = vld [vmem:[%s817_s5 + $0x48] sm:$0xf0] }
  0x10 LB: > { %v821_v0 = vld [vmem:[#allocation2_spill] sm:$0xff]  ;;  %s480_s25 = sshll.u32 %s495_s24, 5  ;;  %vm111_vm0 = vcmask 1044480   ;;  %vm107_vm1 = vcmask 80896   ;;  %vm237_vm2 = vcmask 261120   ;;  %s459_s28 = sshll.u32 %s495_s24, 3  ;;  %s495_s24 = sphi %s747_s24, %s72_s24  }
  0x11   : > { %v81_v43 = vperm.slane %v821_v0, 0  ;;  %v91_v44 = vperm.slane %v821_v0, 1  ;;  %v82_v45 = vperm.slane %v821_v0, 2  ;;  %v92_v46 = vperm.slane %v821_v0, 3  ;;  %s75_s27 = scalar_lea.vmem %s811_s0, %s480_s25  ;;  %s355_s1 = scalar_lea.vmem %s816_s6, %s459_s28 }
  0x12   : > { %v76_v51 = vld [vmem:[%s75_s27] sm:$0xff]  ;;  %v78_v52 = vld [vmem:[%s75_s27 + $0x10] sm:$0x3]  ;;  %v77_v53 = vld [vmem:[%s75_s27 + $0x8] sm:$0xff]  ;;  %vm356_vm3 = vcmask 651264   ;;  %s72_s24 = sadd.s32 1, %s495_s24  }
  0x13   : > { %v85_v47 = vperm.slane %v81_v43, 0  ;;  %v86_v48 = vperm.slane %v82_v45, 0  ;;  %v95_v49 = vperm.slane %v91_v44, 1  ;;  %v96_v50 = vperm.slane %v92_v46, 1  ;;  %v79_v56 = vld [vmem:[%s75_s27 + $0x18] sm:$0x3] }
  0x14   : > { %v408_v46 = vor.u32 %v625_v18, %v620_v17  ;;  %p69_p0 = scmp.ge.s32.totalorder %s72_s24, 4  }
  0x15   : > { %v87_v54 = vmul.f32 %v85_v47, %v76_v51  ;;  %v89_v55 = vmul.f32 %v85_v47, %v78_v52  ;;  %v88_v57 = vmul.f32 %v86_v48, %v77_v53  ;;  %v90_v58 = vmul.f32 %v86_v48, %v79_v56 }
  0x16   : > { %v449_v47 = vor.u32 %v725_v38, %v720_v37  ;;  %v441_v52 = vor.u32 %v705_v34, %v700_v33  ;;  %v396_v53 = vor.u32 %v595_v12, %v590_v11  ;;  %v433_v56 = vor.u32 %v685_v30, %v680_v29 }
  0x17   : > { %v97_v59 = vadd.f32 %v95_v49, %v87_v54  ;;  %v99_v60 = vadd.f32 %v95_v49, %v89_v55  ;;  %v98_v61 = vadd.f32 %v96_v50, %v88_v57  ;;  %v100_v62 = vadd.f32 %v96_v50, %v90_v58 }
  0x18   : > { %v457_v49 = vor.u32 %v745_v42, %v740_v41  ;;  %v445_v50 = vor.u32 %v715_v36, %v710_v35  ;;  %v437_v54 = vor.u32 %v695_v32, %v690_v31  ;;  %v392_v55 = vor.u32 %v585_v10, %v580_v9 }
  0x19   : > { %v101_v63 = vmax.f32 %v97_v59, 0.0  ;;  %v103_v43 = vmax.f32 %v99_v60, 0.0  ;;  %v102_v45 = vmax.f32 %v98_v61, 0.0  ;;  %v104_v0 = vmax.f32 %v100_v62, 0.0 }
  0x1a   : > { %v388_v57 = vor.u32 %v575_v8, %v570_v7  ;;  %v429_v58 = vor.u32 %v675_v28, %v670_v27  ;;  %v416_v59 = vor.u32 %v645_v22, %v640_v21  ;;  %v453_v60 = vor.u32 %v735_v40, %v730_v39 }
  0x1b   : > { %v105_v24 = vpack.c.bf16 %v103_v43, %v101_v63  ;;  %v106_v44 = vpack.c.bf16 %v104_v0, %v102_v45  ;;  %v404_v0 = vor.u32 %v615_v16, %v610_v15  ;;  %v384_v61 = vor.u32 %v565_v6, %v560_v5  ;;  %v822_v45 = vld [vmem:[#allocation3_spill] sm:$0xff] }
  0x1c   : > { %v425_v62 = vor.u32 %v665_v26, %v660_v25  ;;  %v380_v63 = vor.u32 %v555_v4, %v550_v3  ;;  %v412_v43 = vor.u32 %v635_v20, %v630_v19 }
  0x1d   : > { %v113_v51 = vsel %vm111_vm0, %v105_v24, 0  ;;  %v116_v48 = vsel %vm111_vm0, %v106_v44, 0  ;;  %v400_v24 = vor.u32 %v605_v14, %v600_v13  ;;  %v421_v44 = vor.u32 %v822_v45, %v650_v23 }
  0x1e   : > { %125 = vmatpush.bf16.msra.mxu0 %v113_v51  ;;  %154 = vmatpush.bf16.msra.mxu2 %v113_v51 }
  0x1f   : > { %138 = vmatpush.bf16.msra.mxu1 %v116_v48  ;;  %167 = vmatpush.bf16.msra.mxu3 %v116_v48 }
  0x21   : > { %373 = vmatmul.msk.bf16.vlgmr.msra.gmra.mxu0 %vm107_vm1, %v540_v1  ;;  %375 = vmatmul.msk.bf16.vlgmr.msra.gmra.mxu2 %vm107_vm1, %v545_v2 }
  0x22   : > { %241 = vmatpush.bf16.msrb.mxu0 %v408_v46  ;;  %327 = vmatpush.bf16.msrb.mxu2 %v449_v47 }
  0x23   : > { %374 = vmatmul.msk.bf16.vlgmr.msra.gmra.mxu1 %vm107_vm1, %v540_v1  ;;  %376 = vmatmul.msk.bf16.vlgmr.msra.gmra.mxu3 %vm107_vm1, %v545_v2 }
  0x24   : > { %346 = vmatpush.bf16.msrb.mxu3 %v457_v49  ;;  %260 = vmatpush.bf16.msrb.mxu1 %v416_v59 }
  0x26   : > { %242 = vmatpush.bf16.msrb.mxu0 %v404_v0  ;;  %328 = vmatpush.bf16.msrb.mxu2 %v445_v50 }
  0x28   : > { %347 = vmatpush.bf16.msrb.mxu3 %v453_v60  ;;  %261 = vmatpush.bf16.msrb.mxu1 %v412_v43 }
  0x2a   : > { %243 = vmatpush.bf16.msrb.mxu0 %v400_v24  ;;  %329 = vmatpush.bf16.msrb.mxu2 %v441_v52 }
  0x2e   : > { %244 = vmatpush.bf16.msrb.mxu0 %v396_v53  ;;  %330 = vmatpush.bf16.msrb.mxu2 %v437_v54 }
  0x32   : > { %245 = vmatpush.bf16.msrb.mxu0 %v392_v55  ;;  %331 = vmatpush.bf16.msrb.mxu2 %v433_v56 }
  0x36   : > { %246 = vmatpush.bf16.msrb.mxu0 %v388_v57  ;;  %332 = vmatpush.bf16.msrb.mxu2 %v429_v58 }
  0x3a   : > { %247 = vmatpush.bf16.msrb.mxu0 %v384_v61  ;;  %333 = vmatpush.bf16.msrb.mxu2 %v425_v62 }
  0x3e   : > { %248 = vmatpush.bf16.msrb.mxu0 %v380_v63  ;;  %334 = vmatpush.bf16.msrb.mxu2 %v421_v44 }
  0x9e   : > { %v127_v46 = vpop.f32.mrf.mxu0 }
  0xa0   : > { %v140_v47 = vpop.f32.mrf.mxu1 }
  0xa4   : > { %v156_v51 = vpop.f32.mrf.mxu2 }
  0xa5   : > { %v173_v48 = vmax.f32 %v127_v46, %v156_v51 }
  0xa6   : > { %v169_v49 = vpop.f32.mrf.mxu3  ;;  %v129_v50 = vpop.f32.mrf.mxu0 }
  0xa7   : > { %v174_v0 = vmax.f32 %v140_v47, %v169_v49  ;;  %v175_v24 = vpack.c.bf16 %v173_v48, %v173_v48 }
  0xa8   : > { %v142_v52 = vpop.f32.mrf.mxu1 }
  0xa9   : > { %v176_v53 = vpack.c.bf16 %v174_v0, %v174_v0  ;;  %249 = vmatmul.bf16.vlgmr.msrb.gmra.mxu0 %v175_v24  ;;  %335 = vmatmul.bf16.vlgmr.msrb.gmra.mxu2 %v175_v24 }
  0xab   : > { %417 = vmatmul.msk.bf16.vlgmr.msrb.gmra.mxu1 %vm237_vm2, %v176_v53  ;;  %458 = vmatmul.msk.bf16.vlgmr.msrb.gmra.mxu3 %vm237_vm2, %v176_v53 }
  0xac   : > { %v158_v54 = vpop.f32.mrf.mxu2 }
  0xae   : > { %v171_v55 = vpop.f32.mrf.mxu3 }
 0x126   : > { %v250_v56 = vpop.f32.mrf.mxu0 }
 0x128   : > { %v263_v57 = vpop.f32.mrf.mxu1 }
 0x129   : > { %v264_v60 = vadd.f32 %v263_v57, %v250_v56 }
 0x12c   : > { %v336_v58 = vpop.f32.mrf.mxu2 }
 0x12e   : > { %v349_v59 = vpop.f32.mrf.mxu3  ;;  %v252_v62 = vpop.f32.mrf.mxu0 }
 0x12f   : > { %v350_v61 = vadd.f32 %v349_v59, %v336_v58 }
 0x130   : > { %v265_v63 = vpop.f32.mrf.mxu1 }
 0x131   : > { %v353_v43 = vmax.f32 %v264_v60, %v350_v61 }
 0x132   :  { %71 = sbr.rel (!%p69_p0) target bundleno = 16 (0x10), region = 53 }
 0x133   : > { %357 = vst.msk [vmem:[%s355_s1] sm:$0x1f] %vm356_vm3, %v353_v43 }
 0x134   : > { %v338_v45 = vpop.f32.mrf.mxu2 }
 0x136   : > { %v351_v44 = vpop.f32.mrf.mxu3 }

// kernel: lenet_batch_forward.9
= control target key start
LH: loop header
LB: loop body
LE: loop exit
PB: predicated region body
PF: predicated region fallthrough
CT: control target
= control target key end

     0   :  { %s1068_s0 = inlined_call_operand.vmem [shape: f32[4,400], index: 0, kind: input, shape index: {}]   ;;  %s1069_s1 = inlined_call_operand.vmem [shape: bf16[400,128], index: 1, kind: input, shape index: {}]   ;;  %s1070_s2 = inlined_call_operand.vmem [shape: f32[1,128], index: 2, kind: input, shape index: {}]   ;;  %s1071_s3 = inlined_call_operand.vmem [shape: f32[1,128], index: 3, kind: input, shape index: {}]   ;;  %s1072_s4 = inlined_call_operand.vmem [shape: f32[1,128], index: 4, kind: input, shape index: {}]   ;;  %s1073_s5 = inlined_call_operand.vmem [shape: bf16[128,128], index: 5, kind: input, shape index: {}]   ;;  %s1074_s6 = inlined_call_operand.vmem [shape: f32[1,128], index: 6, kind: input, shape index: {}]   ;;  %s1075_s7 = inlined_call_operand.vmem [shape: f32[1,128], index: 7, kind: input, shape index: {}]   ;;  %s1076_s8 = inlined_call_operand.vmem [shape: f32[1,128], index: 8, kind: input, shape index: {}]   ;;  %s1077_s9 = inlined_call_operand.vmem [shape: bf16[128,128], index: 9, kind: input, shape index: {}]   ;;  %s1078_s10 = inlined_call_operand.vmem [shape: f32[1,128], index: 10, kind: input, shape index: {}]   ;;  %s1079_s11 = inlined_call_operand.hbm [shape: f32[4,128], index: 11, kind: output, shape index: {}]  }
   0x1   :  { %v768_v0 = vld [vmem:[%s1069_s1 + $0x38] sm:$0xff]  ;;  %v767_v3 = vld [vmem:[%s1069_s1 + $0x30] sm:$0xff]  ;;  %v766_v6 = vld [vmem:[%s1069_s1 + $0x28] sm:$0xff] }
   0x2   :  { %v776_v1 = vld [vmem:[%s1069_s1 + $0x78] sm:$0xff]  ;;  %267 = vmatpush.bf16.msra.mxu0 %v768_v0  ;;  %v775_v4 = vld [vmem:[%s1069_s1 + $0x70] sm:$0xff]  ;;  %v774_v7 = vld [vmem:[%s1069_s1 + $0x68] sm:$0xff] }
   0x3   :  { %v784_v2 = vld [vmem:[%s1069_s1 + $0xb8] sm:$0xff]  ;;  %280 = vmatpush.bf16.msra.mxu1 %v776_v1  ;;  %v783_v5 = vld [vmem:[%s1069_s1 + $0xb0] sm:$0xff]  ;;  %v785_v8 = vld [vmem:[%s1069_s1 + $0xc0] sm:$0xff] }
   0x4   :  { %293 = vmatpush.bf16.msra.mxu2 %v784_v2  ;;  %v782_v9 = vld [vmem:[%s1069_s1 + $0xa8] sm:$0xff]  ;;  %v765_v11 = vld [vmem:[%s1069_s1 + $0x20] sm:$0xff]  ;;  %313 = vmatpush.bf16.msra.mxu3 %v785_v8 }
   0x5   :  { %v41_v10 = vld [vmem:[%s1068_s0 + $0x8] sm:$0xff]  ;;  %v40_v12 = vld [vmem:[%s1068_s0] sm:$0xff] }
   0x6   :  { %268 = vmatpush.bf16.msra.mxu0 %v767_v3  ;;  %46 = vst [vmem:[#allocation1 + $0x10] ss:$2 sm:$0xff] %v41_v10  ;;  %v773_v13 = vld [vmem:[%s1069_s1 + $0x60] sm:$0xff] }
   0x7   :  { %281 = vmatpush.bf16.msra.mxu1 %v775_v4  ;;  %v781_v14 = vld [vmem:[%s1069_s1 + $0xa0] sm:$0xff]  ;;  %44 = vst [vmem:[#allocation1] ss:$2 sm:$0xff] %v40_v12 }
   0x8   :  { %294 = vmatpush.bf16.msra.mxu2 %v783_v5 }
   0xa   :  { %269 = vmatpush.bf16.msra.mxu0 %v766_v6 }
   0xb   :  { %282 = vmatpush.bf16.msra.mxu1 %v774_v7 }
   0xc   :  { %295 = vmatpush.bf16.msra.mxu2 %v782_v9 }
   0xd   :  { %16 = vsyncpa [#allocation3], 0  ;;  %v764_v15 = vld [vmem:[%s1069_s1 + $0x18] sm:$0xff]  ;;  %vm263_vm0 = vcmask 130048   ;;  %v763_v20 = vld [vmem:[%s1069_s1 + $0x10] sm:$0xff]  ;;  %v843_v37 = vmov 4.0  }
   0xe   :  { %270 = vmatpush.bf16.msra.mxu0 %v765_v11  ;;  %v772_v16 = vld [vmem:[%s1069_s1 + $0x58] sm:$0xff]  ;;  %v771_v21 = vld [vmem:[%s1069_s1 + $0x50] sm:$0xff]  ;;  %v762_v23 = vld [vmem:[%s1069_s1 + $0x8] sm:$0xff]  ;;  %811 = vrcp.f32 %v843_v37  ;;  %vm321_vm1 = vcmask 1043456   ;;  %s844_s28 = smov [#allocation2]  }
   0xf   :  { %283 = vmatpush.bf16.msra.mxu1 %v773_v13  ;;  %v780_v17 = vld [vmem:[%s1069_s1 + $0x98] sm:$0xff]  ;;  %v779_v22 = vld [vmem:[%s1069_s1 + $0x90] sm:$0xff]  ;;  %v770_v24 = vld [vmem:[%s1069_s1 + $0x48] sm:$0xff]  ;;  %s585_s29 = sshll.u32 %s844_s28, 4  ;;  %s586_s29 = int_to_ptr.vmem [resolvable:$true] %s585_s29 }
  0x10   :  { %296 = vmatpush.bf16.msra.mxu2 %v781_v14  ;;  %v50_v18 = vld.sshfl [vmem:[#allocation1 + $0x18] sm:$0xff pattern:$0x75316420]  ;;  %v778_v25 = vld [vmem:[%s1069_s1 + $0x88] sm:$0xff]  ;;  %v761_v26 = vld [vmem:[%s1069_s1] sm:$0xff] }
  0x11   :  { %v58_v19 = vpack.c.bf16 %v50_v18, %v50_v18  ;;  %v769_v27 = vld [vmem:[%s1069_s1 + $0x40] sm:$0xff]  ;;  %v48_v29 = vld.sshfl [vmem:[#allocation1 + $0x8] sm:$0xff pattern:$0x75316420]  ;;  %v793_v38 = vld [vmem:[%s1073_s5 + $0x38] sm:$0xff] }
  0x12   :  { %271 = vmatpush.bf16.msra.mxu0 %v764_v15  ;;  %v47_v28 = vld.sshfl [vmem:[#allocation1] sm:$0xff pattern:$0x75316420]  ;;  %v49_v31 = vld.sshfl [vmem:[#allocation1 + $0x10] sm:$0xff pattern:$0x75316420]  ;;  %v56_v33 = vpack.c.bf16 %v48_v29, %v48_v29  ;;  %440 = vmatpush.bf16.msrb.mxu3 %v793_v38 }
  0x13   :  { %284 = vmatpush.bf16.msra.mxu1 %v772_v16  ;;  %696 = vmatmul.msk.bf16.vlgmr.msra.gmra.mxu3 %vm263_vm0, %v58_v19  ;;  %v777_v30 = vld [vmem:[%s1069_s1 + $0x80] sm:$0xff]  ;;  %v55_v32 = vpack.c.bf16 %v47_v28, %v47_v28  ;;  %v57_v34 = vpack.c.bf16 %v49_v31, %v49_v31  ;;  %v792_v43 = vld [vmem:[%s1073_s5 + $0x30] sm:$0xff]  ;;  %v791_v47 = vld [vmem:[%s1073_s5 + $0x28] sm:$0xff] }
  0x14   :  { %297 = vmatpush.bf16.msra.mxu2 %v780_v17  ;;  %v804_v36 = vld [vmem:[%s1070_s2] ss:$0 sm:$0xff]  ;;  %v812_v44 = vpop.eup %811  ;;  %v789_v57 = vld [vmem:[%s1073_s5 + $0x18] sm:$0xff]  ;;  %v788_v0 = vld [vmem:[%s1073_s5 + $0x10] sm:$0xff] }
  0x15   :  { %v330_v46 = vmul.f32 4.0, %v812_v44  ;;  %v790_v54 = vld [vmem:[%s1073_s5 + $0x20] sm:$0xff]  ;;  %vm334_vm2 = vweird.f32 %v812_v44  ;;  %v787_v6 = vld [vmem:[%s1073_s5 + $0x8] sm:$0xff] }
  0x16   :  { %272 = vmatpush.bf16.msra.mxu0 %v763_v20  ;;  %441 = vmatpush.bf16.msrb.mxu3 %v792_v43  ;;  %v786_v12 = vld [vmem:[%s1073_s5] sm:$0xff]  ;;  %v799_v38 = vld [vmem:[%s1077_s9 + $0x28] sm:$0xff] }
  0x17   :  { %285 = vmatpush.bf16.msra.mxu1 %v771_v21  ;;  %v331_v53 = vsub.f32 1.0, %v330_v46  ;;  %v807_v37 = vld [vmem:[%s1074_s6] ss:$0 sm:$0xff]  ;;  %v797_v46 = vld [vmem:[%s1077_s9 + $0x18] sm:$0xff] }
  0x18   :  { %298 = vmatpush.bf16.msra.mxu2 %v779_v22 }
  0x19   :  { %v332_v59 = vmul.f32 %v812_v44, %v331_v53 }
  0x1a   :  { %273 = vmatpush.bf16.msra.mxu0 %v762_v23  ;;  %442 = vmatpush.bf16.msrb.mxu3 %v791_v47 }
  0x1b   :  { %286 = vmatpush.bf16.msra.mxu1 %v770_v24  ;;  %v333_v3 = vadd.f32 %v812_v44, %v332_v59 }
  0x1c   :  { %299 = vmatpush.bf16.msra.mxu2 %v778_v25 }
  0x1d   :  { %v1012_v9 = vsel %vm334_vm2, %v812_v44, %v333_v3 }
  0x1e   :  { %274 = vmatpush.bf16.msra.mxu0 %v761_v26  ;;  %443 = vmatpush.bf16.msrb.mxu3 %v790_v54 }
  0x1f   :  { %287 = vmatpush.bf16.msra.mxu1 %v769_v27  ;;  %v805_v27 = vld [vmem:[%s1071_s3] ss:$0 sm:$0xff] }
  0x20   :  { %300 = vmatpush.bf16.msra.mxu2 %v777_v30  ;;  %v806_v30 = vld [vmem:[%s1072_s4] ss:$0 sm:$0xff] }
  0x21   :  { %275 = vmatmul.bf16.vlgmr.msra.gmra.mxu0 %v55_v32 }
  0x22   :  { %288 = vmatmul.bf16.vlgmr.msra.gmra.mxu1 %v56_v33  ;;  %444 = vmatpush.bf16.msrb.mxu3 %v789_v57  ;;  %v795_v57 = vld [vmem:[%s1077_s9 + $0x8] sm:$0xff] }
  0x23   :  { %301 = vmatmul.bf16.vlgmr.msra.gmra.mxu2 %v57_v34 }
  0x26   :  { %445 = vmatpush.bf16.msrb.mxu3 %v788_v0 }
  0x2a   :  { %446 = vmatpush.bf16.msrb.mxu3 %v787_v6 }
  0x2e   :  { %447 = vmatpush.bf16.msrb.mxu3 %v786_v12 }
  0x96   :  { %v315_v35 = vpop.f32.mrf.mxu3 }
  0x9e   :  { %v276_v39 = vpop.f32.mrf.mxu0  ;;  %v317_v42 = vpop.f32.mrf.mxu3 }
  0x9f   :  { %v289_v40 = vpop.f32.mrf.mxu1  ;;  %v277_v41 = vadd.f32 %v804_v36, %v276_v39  ;;  %v800_v36 = vld [vmem:[%s1077_s9 + $0x30] sm:$0xff] }
  0xa1   :  { %v290_v45 = vadd.f32 %v289_v40, %v277_v41  ;;  %v798_v41 = vld [vmem:[%s1077_s9 + $0x20] sm:$0xff] }
  0xa6   :  { %v302_v48 = vpop.f32.mrf.mxu2  ;;  %v278_v50 = vpop.f32.mrf.mxu0 }
  0xa7   :  { %v303_v49 = vadd.f32 %v302_v48, %v290_v45  ;;  %v291_v51 = vpop.f32.mrf.mxu1 }
  0xa9   :  { %v316_v52 = vadd.f32 %v315_v35, %v303_v49  ;;  %v801_v35 = vld [vmem:[%s1077_s9 + $0x38] sm:$0xff] }
  0xaa   :  { %566 = vmatpush.bf16.msrb.mxu0 %v801_v35 }
  0xab   :  { %v322_v55 = vsel %vm321_vm1, %v316_v52, 0.0  ;;  %v337_v56 = vmul.f32 %v316_v52, %v316_v52 }
  0xac   :  { %v323_v58 = vrot.slane %v322_v55, 4 }
  0xad   :  { %v338_v60 = vsel %vm321_vm1, %v337_v56, 0.0 }
  0xae   :  { %v324_v61 = vadd.f32 %v323_v58, %v322_v55  ;;  %v339_v62 = vrot.slane %v338_v60, 4  ;;  %v304_v63 = vpop.f32.mrf.mxu2  ;;  %567 = vmatpush.bf16.msrb.mxu0 %v800_v36 }
  0xb0   :  { %v325_v1 = vrot.slane %v324_v61, 2  ;;  %v340_v2 = vadd.f32 %v339_v62, %v338_v60  ;;  %v794_v60 = vld [vmem:[%s1077_s9] sm:$0xff] }
  0xb2   :  { %v326_v4 = vadd.f32 %v325_v1, %v324_v61  ;;  %v341_v5 = vrot.slane %v340_v2, 2  ;;  %568 = vmatpush.bf16.msrb.mxu0 %v799_v38 }
  0xb4   :  { %v327_v7 = vrot.slane %v326_v4, 1  ;;  %v342_v8 = vadd.f32 %v341_v5, %v340_v2 }
  0xb6   :  { %v328_v10 = vadd.f32 %v327_v7, %v326_v4  ;;  %v343_v11 = vrot.slane %v342_v8, 1  ;;  %569 = vmatpush.bf16.msrb.mxu0 %v798_v41 }
  0xb8   :  { %v336_v13 = vmul.f32 %v1012_v9, %v328_v10  ;;  %v344_v14 = vadd.f32 %v343_v11, %v342_v8 }
  0xba   :  { %v345_v15 = vmul.f32 %v344_v14, %v1012_v9  ;;  %v346_v16 = vmul.f32 %v336_v13, %v336_v13  ;;  %v349_v26 = vsub.f32 %v316_v52, %v336_v13  ;;  %570 = vmatpush.bf16.msrb.mxu0 %v797_v46  ;;  %v796_v52 = vld [vmem:[%s1077_s9 + $0x10] sm:$0xff]  ;;  %v809_v14 = vld [vmem:[%s1076_s8] ss:$0 sm:$0xff] }
  0xbc   :  { %v347_v17 = vsub.f32 %v345_v15, %v346_v16 }
  0xbe   :  { %v348_v18 = vmax.f32 %v347_v17, 0.0  ;;  %571 = vmatpush.bf16.msrb.mxu0 %v796_v52 }
  0xc0   :  { %v350_v19 = vadd.f32 1e-05, %v348_v18 }
  0xc2   :  { %813 = vrsqrt.f32 %v350_v19  ;;  %vm357_vm4 = vweird.f32 %v350_v19  ;;  %572 = vmatpush.bf16.msrb.mxu0 %v795_v57 }
  0xc6   :  { %573 = vmatpush.bf16.msrb.mxu0 %v794_v60 }
  0xc8   :  { %v814_v20 = vpop.eup %813 }
  0xc9   :  { %v352_v21 = vmul.f32 %v814_v20, %v350_v19  ;;  %vm358_vm3 = vweird.f32 %v814_v20  ;;  %v810_v19 = vld [vmem:[%s1078_s10] ss:$0 sm:$0xff] }
  0xca   :  { %vm359_vm5 = vmor %vm357_vm4, %vm358_vm3 }
  0xcb   :  { %v353_v22 = vmul.f32 %v814_v20, %v352_v21 }
  0xcd   :  { %v354_v23 = vmul.f32 0.5, %v353_v22 }
  0xcf   :  { %v355_v24 = vsub.f32 1.5, %v354_v23 }
  0xd1   :  { %v356_v25 = vmul.f32 %v814_v20, %v355_v24 }
  0xd3   :  { %v360_v28 = vsel %vm359_vm5, %v814_v20, %v356_v25 }
  0xd4   :  { %v361_v29 = vmul.f32 %v360_v28, %v349_v26 }
  0xd6   :  { %v365_v31 = vmul.f32 %v805_v27, %v361_v29 }
  0xd8   :  { %v369_v32 = vadd.f32 %v806_v30, %v365_v31 }
  0xda   :  { %v370_v33 = vmax.f32 %v369_v32, 0.0 }
  0xdc   :  { %v371_v34 = vpack.c.bf16 %v370_v33, %v370_v33 }
  0xde   :  { %448 = vmatmul.bf16.vlgmr.msrb.gmra.mxu3 %v371_v34 }
 0x161   :  { %v449_v39 = vpop.f32.mrf.mxu3 }
 0x162   :  { %v450_v40 = vadd.f32 %v807_v37, %v449_v39 }
 0x164   :  { %v455_v42 = vsel %vm321_vm1, %v450_v40, 0.0  ;;  %v463_v43 = vmul.f32 %v450_v40, %v450_v40 }
 0x165   :  { %v456_v44 = vrot.slane %v455_v42, 4 }
 0x166   :  { %v464_v45 = vsel %vm321_vm1, %v463_v43, 0.0 }
 0x167   :  { %v457_v47 = vadd.f32 %v456_v44, %v455_v42  ;;  %v465_v48 = vrot.slane %v464_v45, 4 }
 0x169   :  { %v458_v49 = vrot.slane %v457_v47, 2  ;;  %v466_v50 = vadd.f32 %v465_v48, %v464_v45  ;;  %v451_v51 = vpop.f32.mrf.mxu3 }
 0x16b   :  { %v459_v53 = vadd.f32 %v458_v49, %v457_v47  ;;  %v467_v54 = vrot.slane %v466_v50, 2 }
 0x16d   :  { %v460_v55 = vrot.slane %v459_v53, 1  ;;  %v468_v56 = vadd.f32 %v467_v54, %v466_v50 }
 0x16f   :  { %v461_v58 = vadd.f32 %v460_v55, %v459_v53  ;;  %v469_v59 = vrot.slane %v468_v56, 1 }
 0x171   :  { %v462_v61 = vmul.f32 %v461_v58, %v1012_v9  ;;  %v470_v62 = vadd.f32 %v469_v59, %v468_v56 }
 0x173   :  { %v471_v63 = vmul.f32 %v470_v62, %v1012_v9  ;;  %v472_v0 = vmul.f32 %v462_v61, %v462_v61  ;;  %v475_v11 = vsub.f32 %v450_v40, %v462_v61  ;;  %v808_v9 = vld [vmem:[%s1075_s7] ss:$0 sm:$0xff]  ;;  %s587_s7 = sshll.u32 %s1079_s11, 4  ;;  %s588_s7 = int_to_ptr.hbm [resolvable:$true] %s587_s7 }
 0x175   :  { %v473_v1 = vsub.f32 %v471_v63, %v472_v0 }
 0x177   :  { %v474_v2 = vmax.f32 %v473_v1, 0.0 }
 0x179   :  { %v476_v3 = vadd.f32 1e-05, %v474_v2 }
 0x17b   :  { %815 = vrsqrt.f32 %v476_v3  ;;  %vm483_vm7 = vweird.f32 %v476_v3 }
 0x181   :  { %v816_v4 = vpop.eup %815 }
 0x182   :  { %v478_v5 = vmul.f32 %v816_v4, %v476_v3  ;;  %vm484_vm6 = vweird.f32 %v816_v4 }
 0x183   :  { %vm485_vm8 = vmor %vm483_vm7, %vm484_vm6 }
 0x184   :  { %v479_v6 = vmul.f32 %v816_v4, %v478_v5 }
 0x186   :  { %v480_v7 = vmul.f32 0.5, %v479_v6 }
 0x188   :  { %v481_v8 = vsub.f32 1.5, %v480_v7 }
 0x18a   :  { %v482_v10 = vmul.f32 %v816_v4, %v481_v8 }
 0x18c   :  { %v486_v12 = vsel %vm485_vm8, %v816_v4, %v482_v10 }
 0x18d   :  { %v487_v13 = vmul.f32 %v486_v12, %v475_v11 }
 0x18f   :  { %v491_v15 = vmul.f32 %v808_v9, %v487_v13 }
 0x191   :  { %v495_v16 = vadd.f32 %v809_v14, %v491_v15 }
 0x193   :  { %v496_v17 = vmax.f32 %v495_v16, 0.0 }
 0x195   :  { %v497_v18 = vpack.c.bf16 %v496_v17, %v496_v17 }
 0x197   :  { %574 = vmatmul.bf16.vlgmr.msrb.gmra.mxu0 %v497_v18 }
 0x214   :  { %v575_v20 = vpop.f32.mrf.mxu0 }
 0x215   :  { %v576_v21 = vadd.f32 %v810_v19, %v575_v20 }
 0x217   :  { %579 = vst [vmem:[#allocation2] sm:$0xf] %v576_v21 }
 0x218   :  { %590 = dma.vmem_to_hbm [thread:$0]  %s586_s29, 64, %s588_s7, [#allocation3]  }
 0x21c   :  { %v577_v22 = vpop.f32.mrf.mxu0 }
 0x21d   :  { %841 = dma.done.wait [#allocation3], 64  }
 0x21e   :  { %842 = vsyncadd [#allocation3], 4294967232 }
 0x21f   :  { %595 = vsyncpa [#allocation3], 1 }

</bundles_post_ra>
